<compile_context>
chip_gen: v5e
topology: v5e:2x2
jax: 0.10.0
libtpu: 0.0.40
codegen_flags: <defaults>
</compile_context>

<pallas_src>
import jax
import jax.numpy as jnp
from jax import lax
from jax.experimental import pallas as pl
from jax.experimental.pallas import tpu as pltpu

# ---------------- problem sizes (small, consistent with the module) --------------
B = 2            # batch
T = 8            # sequence length
E = 128          # embedding_dim
H = 128          # num_units
L = 2            # num_layers
C = 10           # n_classes
VOCAB = 1000     # vocab_size  (embedding table has VOCAB + 1 rows)

BP = 8           # batch padded to a full 8-sublane tile
CP = 128         # classes padded to a full 128-lane tile (lane-dense output store)

assert E == H, "layer-0 projection folding assumes embedding_dim == num_units"
assert L == 2, "wavefront interleave below is written for exactly 2 LSTM layers"


# ---------------------------------- kernel ---------------------------------------
def lstm_classifier_kernel(gates0_ref, whh0_ref, wih1_ref, whh1_ref, b1_ref,
                           wout_ref, bout_ref, out_ref):
    """Wavefront 2-layer LSTM recurrence + final linear + softmax, fully VMEM-resident.

    gates0_ref: (T, BP, 4H) f32   layer-0 input->gate pre-activations (incl. bias),
                                  precomputed in the wrapper via the folded embedding table
    whh0_ref  : (H, 4H)     bf16  layer-0 hidden->gates weights (i,f,g,o order)
    wih1_ref  : (H, 4H)     bf16  layer-1 input->gates weights
    whh1_ref  : (H, 4H)     bf16  layer-1 hidden->gates weights
    b1_ref    : (1, 4H)     f32   layer-1 combined bias (b_ih + b_hh)
    wout_ref  : (H, CP)     f32   output linear weight (pre-transposed, class-padded w/ 0)
    bout_ref  : (1, CP)     f32   output linear bias (padded classes = -1e30)
    out_ref   : (BP, CP)    f32   softmax probabilities (lane-dense block)
    """
    whh0 = whh0_ref[...]     # bf16, fed straight to the MXU
    wih1 = wih1_ref[...]
    whh1 = whh1_ref[...]
    b1 = b1_ref[...]

    def sigmoid(x):
        # 1 EUP push instead of exp + reciprocal.
        return 0.5 * (jnp.tanh(0.5 * x) + 1.0)

    def lstm_cell(gates, c_prev):
        i_g = sigmoid(gates[:, 0 * H:1 * H])
        f_g = sigmoid(gates[:, 1 * H:2 * H])
        g_g = jnp.tanh(gates[:, 2 * H:3 * H])
        o_g = sigmoid(gates[:, 3 * H:4 * H])
        c_new = f_g * c_prev + i_g * g_g
        h_new = o_g * jnp.tanh(c_new)
        return h_new, c_new

    zeros = jnp.zeros((BP, H), jnp.float32)

    # Prologue (superstep 0): layer-0 time step 0.  h0_prev = 0, so the h@W_hh term
    # vanishes exactly; gates0_ref[0] already carries the input projection + bias.
    h0, c0 = lstm_cell(gates0_ref[0], zeros)
    h1, c1 = zeros, zeros

    # Wavefront supersteps s = 1..T-1: layer-0 step s  ||  layer-1 step s-1.
    # Layer-1 consumes the OLD h0 (layer-0 output at time s-1), so the two matmul chains
    # are independent and stay in flight together each superstep.
    def superstep(s, carry):
        h0, c0, h1, c1 = carry
        h0_b = h0.astype(jnp.bfloat16)
        h1_b = h1.astype(jnp.bfloat16)
        # layer 0, time s
        g0 = gates0_ref[s] + jnp.dot(h0_b, whh0, preferred_element_type=jnp.float32)
        h0n, c0n = lstm_cell(g0, c0)
        # layer 1, time s-1 (input = old h0)
        g1 = (b1
              + jnp.dot(h0_b, wih1, preferred_element_type=jnp.float32)
              + jnp.dot(h1_b, whh1, preferred_element_type=jnp.float32))
        h1n, c1n = lstm_cell(g1, c1)
        return h0n, c0n, h1n, c1n

    h0, c0, h1, c1 = lax.fori_loop(1, T, superstep, (h0, c0, h1, c1), unroll=True)

    # Epilogue (superstep T): layer-1 time step T-1, consuming layer-0's final hidden.
    g1 = (b1
          + jnp.dot(h0.astype(jnp.bfloat16), wih1, preferred_element_type=jnp.float32)
          + jnp.dot(h1.astype(jnp.bfloat16), whh1, preferred_element_type=jnp.float32))
    h1, c1 = lstm_cell(g1, c1)

    # rec_out[-1] == last layer's final hidden state == h1.  Dropout(p=0.0) is identity.
    # Padded classes carry bias -1e30 -> exp underflows to exactly 0, so the softmax over
    # CP lanes equals the softmax over the real C classes.
    logits = jnp.dot(h1, wout_ref[...], preferred_element_type=jnp.float32) + bout_ref[...]
    m = jnp.max(logits, axis=-1, keepdims=True)
    e = jnp.exp(logits - m)
    out_ref[...] = e / jnp.sum(e, axis=-1, keepdims=True)


# --------------------------- one-time parameter prep -------------------------------
def prepare_params(params):
    """One-time parameter transform (off the forward path).

    Folds the layer-0 input projection + bias into the embedding table, pads the output
    head to a lane-dense (H, CP)/(1, CP) layout, and exposes per-layer bf16 LSTM weights.
    """
    w_ih0 = params["w_ih"][0].astype(jnp.float32)                     # (E, 4H)
    emb_proj_table = (jnp.dot(params["emb_table"], w_ih0)
                      + params["bias"][0])                            # (VOCAB+1, 4H) f32
    return {
        "emb_proj_table": emb_proj_table,
        "whh0": params["w_hh"][0],                                    # (H, 4H) bf16
        "wih1": params["w_ih"][1],                                    # (H, 4H) bf16
        "whh1": params["w_hh"][1],                                    # (H, 4H) bf16
        "b1": params["bias"][1],                                      # (1, 4H) f32
        "w_out_p": jnp.pad(params["w_out"], ((0, 0), (0, CP - C))),   # (H, CP) f32
        "b_out_p": jnp.pad(params["b_out"], ((0, 0), (0, CP - C)),
                           constant_values=-1e30),                    # (1, CP) f32
    }


# --------------------------------- forward wrapper ---------------------------------
@jax.jit
def rnn_classifier_forward(x_tokens, prepped):
    """x_tokens: (B, T) int32 token ids. Returns (B, C) softmax probabilities."""
    # Layer-0 gate pre-activations via table gather (glue, plain JAX gather),
    # then (T, B, 4H) layout + batch padding to a full sublane tile.
    gates0 = prepped["emb_proj_table"][x_tokens]                 # (B, T, 4H)
    gates0 = jnp.transpose(gates0, (1, 0, 2))                    # (T, B, 4H)
    gates0 = jnp.pad(gates0, ((0, 0), (0, BP - B), (0, 0)))      # (T, BP, 4H)

    vmem = pl.BlockSpec(memory_space=pltpu.MemorySpace.VMEM)
    out = pl.pallas_call(
        lstm_classifier_kernel,
        out_shape=jax.ShapeDtypeStruct((BP, CP), jnp.float32),
        in_specs=[vmem] * 7,
        out_specs=vmem,
    )(gates0, prepped["whh0"], prepped["wih1"], prepped["whh1"],
      prepped["b1"], prepped["w_out_p"], prepped["b_out_p"])
    return out[:B, :C]


# --------------------------- pure-JAX reference ------------------------------------
def rnn_classifier_reference(x_tokens, params):
    """Pure-JAX reference with the same numerics path as the kernel:
    bf16-stored LSTM weights, bf16 activation operands on matmuls, f32 accumulation."""
    w_ih0 = params["w_ih"][0].astype(jnp.float32)
    emb = params["emb_table"][x_tokens]                  # (B, T, E)
    seq = jnp.transpose(emb, (1, 0, 2))                  # (T, B, E)

    def sigmoid(x):
        return 0.5 * (jnp.tanh(0.5 * x) + 1.0)

    def cell(gates, c_prev):
        i_g = sigmoid(gates[:, 0 * H:1 * H])
        f_g = sigmoid(gates[:, 1 * H:2 * H])
        g_g = jnp.tanh(gates[:, 2 * H:3 * H])
        o_g = sigmoid(gates[:, 3 * H:4 * H])
        c_new = f_g * c_prev + i_g * g_g
        return o_g * jnp.tanh(c_new), c_new

    def bdot(a_f32, w_bf16):
        return jnp.dot(a_f32.astype(jnp.bfloat16), w_bf16,
                       preferred_element_type=jnp.float32)

    # layer 0 (input projection in f32, matching the wrapper's folded table)
    gates0_pre = jnp.einsum("tbe,ef->tbf", seq, w_ih0) + params["bias"][0]
    h0 = jnp.zeros((B, H), jnp.float32)
    c0 = jnp.zeros((B, H), jnp.float32)
    outs0 = []
    for t in range(T):
        g = gates0_pre[t] + bdot(h0, params["w_hh"][0])
        h0, c0 = cell(g, c0)
        outs0.append(h0)

    # layer 1
    h1 = jnp.zeros((B, H), jnp.float32)
    c1 = jnp.zeros((B, H), jnp.float32)
    for t in range(T):
        g = (params["bias"][1]
             + bdot(outs0[t], params["w_ih"][1])
             + bdot(h1, params["w_hh"][1]))
        h1, c1 = cell(g, c1)

    logits = h1 @ params["w_out"] + params["b_out"]
    return jax.nn.softmax(logits, axis=-1)


# ----------------------------------- main ------------------------------------------
if __name__ == "__main__":
    key = jax.random.PRNGKey(0)
    keys = jax.random.split(key, 8)

    params = {
        # nn.Embedding(vocab_size + 1, embedding_dim)
        "emb_table": 0.1 * jax.random.normal(keys[0], (VOCAB + 1, E), jnp.float32),
        # LSTM weights, PyTorch (4H, in) transposed to (in, 4H), stacked over layers,
        # stored in bf16 (native bf16 MXU operands, half the weight DMA).
        "w_ih": (0.1 * jax.random.normal(keys[1], (L, E, 4 * H), jnp.float32)
                 ).astype(jnp.bfloat16),
        "w_hh": (0.1 * jax.random.normal(keys[2], (L, H, 4 * H), jnp.float32)
                 ).astype(jnp.bfloat16),
        # combined bias b_ih + b_hh (kept f32)
        "bias": 0.1 * jax.random.normal(keys[3], (L, 1, 4 * H), jnp.float32),
        # nn.Linear(num_units, n_classes): weight (C, H) transposed to (H, C)
        "w_out": 0.1 * jax.random.normal(keys[4], (H, C), jnp.float32),
        "b_out": 0.1 * jax.random.normal(keys[5], (1, C), jnp.float32),
    }

    x_tokens = jax.random.randint(keys[6], (B, T), 0, VOCAB + 1, dtype=jnp.int32)

    prepped = jax.tree_util.tree_map(jax.block_until_ready, prepare_params(params))

    out = jax.block_until_ready(rnn_classifier_forward(x_tokens, prepped))
    ref = jax.block_until_ready(rnn_classifier_reference(x_tokens, params))

    assert out.shape == (B, C), out.shape
    assert jnp.allclose(jnp.sum(out, axis=-1), 1.0, atol=1e-5)
    assert jnp.allclose(out, ref, atol=1e-4, rtol=1e-3), (out, ref)

    print("KERNEL_OK")
</pallas_src>

<mosaic_0001>
module attributes {stable_mosaic.version = 11 : i64} {
  func.func @lstm_classifier_kernel(%arg0: memref<8x8x512xf32, #tpu.memory_space<vmem>>, %arg1: memref<128x512xbf16, #tpu.memory_space<vmem>>, %arg2: memref<128x512xbf16, #tpu.memory_space<vmem>>, %arg3: memref<128x512xbf16, #tpu.memory_space<vmem>>, %arg4: memref<1x512xf32, #tpu.memory_space<vmem>>, %arg5: memref<128x128xf32, #tpu.memory_space<vmem>>, %arg6: memref<1x128xf32, #tpu.memory_space<vmem>>, %arg7: memref<8x128xf32, #tpu.memory_space<vmem>>) attributes {dimension_semantics = [], scalar_prefetch = 0 : i64, scratch_operands = 0 : i64, tpu.core_type = #tpu.core_type<tc>} {
    %c0 = arith.constant 0 : index
    %c0_0 = arith.constant 0 : index
    %0 = vector.load %arg1[%c0, %c0_0] : memref<128x512xbf16, #tpu.memory_space<vmem>>, vector<128x512xbf16>
    %c0_1 = arith.constant 0 : index
    %c0_2 = arith.constant 0 : index
    %1 = vector.load %arg2[%c0_1, %c0_2] : memref<128x512xbf16, #tpu.memory_space<vmem>>, vector<128x512xbf16>
    %c0_3 = arith.constant 0 : index
    %c0_4 = arith.constant 0 : index
    %2 = vector.load %arg3[%c0_3, %c0_4] : memref<128x512xbf16, #tpu.memory_space<vmem>>, vector<128x512xbf16>
    %c0_5 = arith.constant 0 : index
    %c0_6 = arith.constant 0 : index
    %3 = vector.load %arg4[%c0_5, %c0_6] : memref<1x512xf32, #tpu.memory_space<vmem>>, vector<1x512xf32>
    %cst = arith.constant 0.000000e+00 : f32
    %4 = vector.broadcast %cst : f32 to vector<8x128xf32>
    %c0_7 = arith.constant 0 : index
    %c0_8 = arith.constant 0 : index
    %c0_9 = arith.constant 0 : index
    %5 = vector.load %arg0[%c0_7, %c0_8, %c0_9] : memref<8x8x512xf32, #tpu.memory_space<vmem>>, vector<1x8x512xf32>
    %6 = vector.shape_cast %5 : vector<1x8x512xf32> to vector<8x512xf32>
    %7 = vector.extract_strided_slice %6 {offsets = [0, 0], sizes = [8, 128], strides = [1, 1]} : vector<8x512xf32> to vector<8x128xf32>
    %cst_10 = arith.constant 5.000000e-01 : f32
    %8 = vector.broadcast %cst_10 : f32 to vector<8x128xf32>
    %9 = arith.mulf %8, %7 : vector<8x128xf32>
    %10 = math.tanh %9 : vector<8x128xf32>
    %cst_11 = arith.constant 1.000000e+00 : f32
    %11 = vector.broadcast %cst_11 : f32 to vector<8x128xf32>
    %12 = arith.addf %10, %11 : vector<8x128xf32>
    %cst_12 = arith.constant 5.000000e-01 : f32
    %13 = vector.broadcast %cst_12 : f32 to vector<8x128xf32>
    %14 = arith.mulf %13, %12 : vector<8x128xf32>
    %15 = vector.extract_strided_slice %6 {offsets = [0, 128], sizes = [8, 128], strides = [1, 1]} : vector<8x512xf32> to vector<8x128xf32>
    %cst_13 = arith.constant 5.000000e-01 : f32
    %16 = vector.broadcast %cst_13 : f32 to vector<8x128xf32>
    %17 = arith.mulf %16, %15 : vector<8x128xf32>
    %18 = math.tanh %17 : vector<8x128xf32>
    %cst_14 = arith.constant 1.000000e+00 : f32
    %19 = vector.broadcast %cst_14 : f32 to vector<8x128xf32>
    %20 = arith.addf %18, %19 : vector<8x128xf32>
    %cst_15 = arith.constant 5.000000e-01 : f32
    %21 = vector.broadcast %cst_15 : f32 to vector<8x128xf32>
    %22 = arith.mulf %21, %20 : vector<8x128xf32>
    %23 = vector.extract_strided_slice %6 {offsets = [0, 256], sizes = [8, 128], strides = [1, 1]} : vector<8x512xf32> to vector<8x128xf32>
    %24 = math.tanh %23 : vector<8x128xf32>
    %25 = vector.extract_strided_slice %6 {offsets = [0, 384], sizes = [8, 128], strides = [1, 1]} : vector<8x512xf32> to vector<8x128xf32>
    %cst_16 = arith.constant 5.000000e-01 : f32
    %26 = vector.broadcast %cst_16 : f32 to vector<8x128xf32>
    %27 = arith.mulf %26, %25 : vector<8x128xf32>
    %28 = math.tanh %27 : vector<8x128xf32>
    %cst_17 = arith.constant 1.000000e+00 : f32
    %29 = vector.broadcast %cst_17 : f32 to vector<8x128xf32>
    %30 = arith.addf %28, %29 : vector<8x128xf32>
    %cst_18 = arith.constant 5.000000e-01 : f32
    %31 = vector.broadcast %cst_18 : f32 to vector<8x128xf32>
    %32 = arith.mulf %31, %30 : vector<8x128xf32>
    %33 = arith.mulf %22, %4 : vector<8x128xf32>
    %34 = arith.mulf %14, %24 : vector<8x128xf32>
    %35 = arith.addf %33, %34 : vector<8x128xf32>
    %36 = math.tanh %35 : vector<8x128xf32>
    %37 = arith.mulf %32, %36 : vector<8x128xf32>
    %c1_i32 = arith.constant 1 : i32
    %38 = arith.truncf %37 : vector<8x128xf32> to vector<8x128xbf16>
    %39 = arith.truncf %4 : vector<8x128xf32> to vector<8x128xbf16>
    %40 = arith.index_cast %c1_i32 : i32 to index
    %c0_19 = arith.constant 0 : index
    %c0_20 = arith.constant 0 : index
    %41 = vector.load %arg0[%40, %c0_19, %c0_20] : memref<8x8x512xf32, #tpu.memory_space<vmem>>, vector<1x8x512xf32>
    %42 = vector.shape_cast %41 : vector<1x8x512xf32> to vector<8x512xf32>
    %cst_21 = arith.constant dense<0.000000e+00> : vector<8x512xf32>
    %43 = tpu.matmul %38, %0, %cst_21 {dimension_numbers = #tpu.dot_dimension_numbers<[1], [0], [0], [1], [0, 0, 1, 1], [], []>} : vector<8x128xbf16>, vector<128x512xbf16>, vector<8x512xf32> -> vector<8x512xf32>
    %44 = arith.addf %42, %43 : vector<8x512xf32>
    %45 = vector.extract_strided_slice %44 {offsets = [0, 0], sizes = [8, 128], strides = [1, 1]} : vector<8x512xf32> to vector<8x128xf32>
    %cst_22 = arith.constant 5.000000e-01 : f32
    %46 = vector.broadcast %cst_22 : f32 to vector<8x128xf32>
    %47 = arith.mulf %46, %45 : vector<8x128xf32>
    %48 = math.tanh %47 : vector<8x128xf32>
    %cst_23 = arith.constant 1.000000e+00 : f32
    %49 = vector.broadcast %cst_23 : f32 to vector<8x128xf32>
    %50 = arith.addf %48, %49 : vector<8x128xf32>
    %cst_24 = arith.constant 5.000000e-01 : f32
    %51 = vector.broadcast %cst_24 : f32 to vector<8x128xf32>
    %52 = arith.mulf %51, %50 : vector<8x128xf32>
    %53 = vector.extract_strided_slice %44 {offsets = [0, 128], sizes = [8, 128], strides = [1, 1]} : vector<8x512xf32> to vector<8x128xf32>
    %cst_25 = arith.constant 5.000000e-01 : f32
    %54 = vector.broadcast %cst_25 : f32 to vector<8x128xf32>
    %55 = arith.mulf %54, %53 : vector<8x128xf32>
    %56 = math.tanh %55 : vector<8x128xf32>
    %cst_26 = arith.constant 1.000000e+00 : f32
    %57 = vector.broadcast %cst_26 : f32 to vector<8x128xf32>
    %58 = arith.addf %56, %57 : vector<8x128xf32>
    %cst_27 = arith.constant 5.000000e-01 : f32
    %59 = vector.broadcast %cst_27 : f32 to vector<8x128xf32>
    %60 = arith.mulf %59, %58 : vector<8x128xf32>
    %61 = vector.extract_strided_slice %44 {offsets = [0, 256], sizes = [8, 128], strides = [1, 1]} : vector<8x512xf32> to vector<8x128xf32>
    %62 = math.tanh %61 : vector<8x128xf32>
    %63 = vector.extract_strided_slice %44 {offsets = [0, 384], sizes = [8, 128], strides = [1, 1]} : vector<8x512xf32> to vector<8x128xf32>
    %cst_28 = arith.constant 5.000000e-01 : f32
    %64 = vector.broadcast %cst_28 : f32 to vector<8x128xf32>
    %65 = arith.mulf %64, %63 : vector<8x128xf32>
    %66 = math.tanh %65 : vector<8x128xf32>
    %cst_29 = arith.constant 1.000000e+00 : f32
    %67 = vector.broadcast %cst_29 : f32 to vector<8x128xf32>
    %68 = arith.addf %66, %67 : vector<8x128xf32>
    %cst_30 = arith.constant 5.000000e-01 : f32
    %69 = vector.broadcast %cst_30 : f32 to vector<8x128xf32>
    %70 = arith.mulf %69, %68 : vector<8x128xf32>
    %71 = arith.mulf %60, %35 : vector<8x128xf32>
    %72 = arith.mulf %52, %62 : vector<8x128xf32>
    %73 = arith.addf %71, %72 : vector<8x128xf32>
    %74 = math.tanh %73 : vector<8x128xf32>
    %75 = arith.mulf %70, %74 : vector<8x128xf32>
    %cst_31 = arith.constant dense<0.000000e+00> : vector<8x512xf32>
    %76 = tpu.matmul %38, %1, %cst_31 {dimension_numbers = #tpu.dot_dimension_numbers<[1], [0], [0], [1], [0, 0, 1, 1], [], []>} : vector<8x128xbf16>, vector<128x512xbf16>, vector<8x512xf32> -> vector<8x512xf32>
    %77 = vector.broadcast %3 : vector<1x512xf32> to vector<8x512xf32>
    %78 = arith.addf %77, %76 : vector<8x512xf32>
    %cst_32 = arith.constant dense<0.000000e+00> : vector<8x512xf32>
    %79 = tpu.matmul %39, %2, %cst_32 {dimension_numbers = #tpu.dot_dimension_numbers<[1], [0], [0], [1], [0, 0, 1, 1], [], []>} : vector<8x128xbf16>, vector<128x512xbf16>, vector<8x512xf32> -> vector<8x512xf32>
    %80 = arith.addf %78, %79 : vector<8x512xf32>
    %81 = vector.extract_strided_slice %80 {offsets = [0, 0], sizes = [8, 128], strides = [1, 1]} : vector<8x512xf32> to vector<8x128xf32>
    %cst_33 = arith.constant 5.000000e-01 : f32
    %82 = vector.broadcast %cst_33 : f32 to vector<8x128xf32>
    %83 = arith.mulf %82, %81 : vector<8x128xf32>
    %84 = math.tanh %83 : vector<8x128xf32>
    %cst_34 = arith.constant 1.000000e+00 : f32
    %85 = vector.broadcast %cst_34 : f32 to vector<8x128xf32>
    %86 = arith.addf %84, %85 : vector<8x128xf32>
    %cst_35 = arith.constant 5.000000e-01 : f32
    %87 = vector.broadcast %cst_35 : f32 to vector<8x128xf32>
    %88 = arith.mulf %87, %86 : vector<8x128xf32>
    %89 = vector.extract_strided_slice %80 {offsets = [0, 128], sizes = [8, 128], strides = [1, 1]} : vector<8x512xf32> to vector<8x128xf32>
    %cst_36 = arith.constant 5.000000e-01 : f32
    %90 = vector.broadcast %cst_36 : f32 to vector<8x128xf32>
    %91 = arith.mulf %90, %89 : vector<8x128xf32>
    %92 = math.tanh %91 : vector<8x128xf32>
    %cst_37 = arith.constant 1.000000e+00 : f32
    %93 = vector.broadcast %cst_37 : f32 to vector<8x128xf32>
    %94 = arith.addf %92, %93 : vector<8x128xf32>
    %cst_38 = arith.constant 5.000000e-01 : f32
    %95 = vector.broadcast %cst_38 : f32 to vector<8x128xf32>
    %96 = arith.mulf %95, %94 : vector<8x128xf32>
    %97 = vector.extract_strided_slice %80 {offsets = [0, 256], sizes = [8, 128], strides = [1, 1]} : vector<8x512xf32> to vector<8x128xf32>
    %98 = math.tanh %97 : vector<8x128xf32>
    %99 = vector.extract_strided_slice %80 {offsets = [0, 384], sizes = [8, 128], strides = [1, 1]} : vector<8x512xf32> to vector<8x128xf32>
    %cst_39 = arith.constant 5.000000e-01 : f32
    %100 = vector.broadcast %cst_39 : f32 to vector<8x128xf32>
    %101 = arith.mulf %100, %99 : vector<8x128xf32>
    %102 = math.tanh %101 : vector<8x128xf32>
    %cst_40 = arith.constant 1.000000e+00 : f32
    %103 = vector.broadcast %cst_40 : f32 to vector<8x128xf32>
    %104 = arith.addf %102, %103 : vector<8x128xf32>
    %cst_41 = arith.constant 5.000000e-01 : f32
    %105 = vector.broadcast %cst_41 : f32 to vector<8x128xf32>
    %106 = arith.mulf %105, %104 : vector<8x128xf32>
    %107 = arith.mulf %96, %4 : vector<8x128xf32>
    %108 = arith.mulf %88, %98 : vector<8x128xf32>
    %109 = arith.addf %107, %108 : vector<8x128xf32>
    %110 = math.tanh %109 : vector<8x128xf32>
    %111 = arith.mulf %106, %110 : vector<8x128xf32>
    %c2_i32 = arith.constant 2 : i32
    %112 = arith.truncf %75 : vector<8x128xf32> to vector<8x128xbf16>
    %113 = arith.truncf %111 : vector<8x128xf32> to vector<8x128xbf16>
    %114 = arith.index_cast %c2_i32 : i32 to index
    %c0_42 = arith.constant 0 : index
    %c0_43 = arith.constant 0 : index
    %115 = vector.load %arg0[%114, %c0_42, %c0_43] : memref<8x8x512xf32, #tpu.memory_space<vmem>>, vector<1x8x512xf32>
    %116 = vector.shape_cast %115 : vector<1x8x512xf32> to vector<8x512xf32>
    %cst_44 = arith.constant dense<0.000000e+00> : vector<8x512xf32>
    %117 = tpu.matmul %112, %0, %cst_44 {dimension_numbers = #tpu.dot_dimension_numbers<[1], [0], [0], [1], [0, 0, 1, 1], [], []>} : vector<8x128xbf16>, vector<128x512xbf16>, vector<8x512xf32> -> vector<8x512xf32>
    %118 = arith.addf %116, %117 : vector<8x512xf32>
    %119 = vector.extract_strided_slice %118 {offsets = [0, 0], sizes = [8, 128], strides = [1, 1]} : vector<8x512xf32> to vector<8x128xf32>
    %cst_45 = arith.constant 5.000000e-01 : f32
    %120 = vector.broadcast %cst_45 : f32 to vector<8x128xf32>
    %121 = arith.mulf %120, %119 : vector<8x128xf32>
    %122 = math.tanh %121 : vector<8x128xf32>
    %cst_46 = arith.constant 1.000000e+00 : f32
    %123 = vector.broadcast %cst_46 : f32 to vector<8x128xf32>
    %124 = arith.addf %122, %123 : vector<8x128xf32>
    %cst_47 = arith.constant 5.000000e-01 : f32
    %125 = vector.broadcast %cst_47 : f32 to vector<8x128xf32>
    %126 = arith.mulf %125, %124 : vector<8x128xf32>
    %127 = vector.extract_strided_slice %118 {offsets = [0, 128], sizes = [8, 128], strides = [1, 1]} : vector<8x512xf32> to vector<8x128xf32>
    %cst_48 = arith.constant 5.000000e-01 : f32
    %128 = vector.broadcast %cst_48 : f32 to vector<8x128xf32>
    %129 = arith.mulf %128, %127 : vector<8x128xf32>
    %130 = math.tanh %129 : vector<8x128xf32>
    %cst_49 = arith.constant 1.000000e+00 : f32
    %131 = vector.broadcast %cst_49 : f32 to vector<8x128xf32>
    %132 = arith.addf %130, %131 : vector<8x128xf32>
    %cst_50 = arith.constant 5.000000e-01 : f32
    %133 = vector.broadcast %cst_50 : f32 to vector<8x128xf32>
    %134 = arith.mulf %133, %132 : vector<8x128xf32>
    %135 = vector.extract_strided_slice %118 {offsets = [0, 256], sizes = [8, 128], strides = [1, 1]} : vector<8x512xf32> to vector<8x128xf32>
    %136 = math.tanh %135 : vector<8x128xf32>
    %137 = vector.extract_strided_slice %118 {offsets = [0, 384], sizes = [8, 128], strides = [1, 1]} : vector<8x512xf32> to vector<8x128xf32>
    %cst_51 = arith.constant 5.000000e-01 : f32
    %138 = vector.broadcast %cst_51 : f32 to vector<8x128xf32>
    %139 = arith.mulf %138, %137 : vector<8x128xf32>
    %140 = math.tanh %139 : vector<8x128xf32>
    %cst_52 = arith.constant 1.000000e+00 : f32
    %141 = vector.broadcast %cst_52 : f32 to vector<8x128xf32>
    %142 = arith.addf %140, %141 : vector<8x128xf32>
    %cst_53 = arith.constant 5.000000e-01 : f32
    %143 = vector.broadcast %cst_53 : f32 to vector<8x128xf32>
    %144 = arith.mulf %143, %142 : vector<8x128xf32>
    %145 = arith.mulf %134, %73 : vector<8x128xf32>
    %146 = arith.mulf %126, %136 : vector<8x128xf32>
    %147 = arith.addf %145, %146 : vector<8x128xf32>
    %148 = math.tanh %147 : vector<8x128xf32>
    %149 = arith.mulf %144, %148 : vector<8x128xf32>
    %cst_54 = arith.constant dense<0.000000e+00> : vector<8x512xf32>
    %150 = tpu.matmul %112, %1, %cst_54 {dimension_numbers = #tpu.dot_dimension_numbers<[1], [0], [0], [1], [0, 0, 1, 1], [], []>} : vector<8x128xbf16>, vector<128x512xbf16>, vector<8x512xf32> -> vector<8x512xf32>
    %151 = vector.broadcast %3 : vector<1x512xf32> to vector<8x512xf32>
    %152 = arith.addf %151, %150 : vector<8x512xf32>
    %cst_55 = arith.constant dense<0.000000e+00> : vector<8x512xf32>
    %153 = tpu.matmul %113, %2, %cst_55 {dimension_numbers = #tpu.dot_dimension_numbers<[1], [0], [0], [1], [0, 0, 1, 1], [], []>} : vector<8x128xbf16>, vector<128x512xbf16>, vector<8x512xf32> -> vector<8x512xf32>
    %154 = arith.addf %152, %153 : vector<8x512xf32>
    %155 = vector.extract_strided_slice %154 {offsets = [0, 0], sizes = [8, 128], strides = [1, 1]} : vector<8x512xf32> to vector<8x128xf32>
    %cst_56 = arith.constant 5.000000e-01 : f32
    %156 = vector.broadcast %cst_56 : f32 to vector<8x128xf32>
    %157 = arith.mulf %156, %155 : vector<8x128xf32>
    %158 = math.tanh %157 : vector<8x128xf32>
    %cst_57 = arith.constant 1.000000e+00 : f32
    %159 = vector.broadcast %cst_57 : f32 to vector<8x128xf32>
    %160 = arith.addf %158, %159 : vector<8x128xf32>
    %cst_58 = arith.constant 5.000000e-01 : f32
    %161 = vector.broadcast %cst_58 : f32 to vector<8x128xf32>
    %162 = arith.mulf %161, %160 : vector<8x128xf32>
    %163 = vector.extract_strided_slice %154 {offsets = [0, 128], sizes = [8, 128], strides = [1, 1]} : vector<8x512xf32> to vector<8x128xf32>
    %cst_59 = arith.constant 5.000000e-01 : f32
    %164 = vector.broadcast %cst_59 : f32 to vector<8x128xf32>
    %165 = arith.mulf %164, %163 : vector<8x128xf32>
    %166 = math.tanh %165 : vector<8x128xf32>
    %cst_60 = arith.constant 1.000000e+00 : f32
    %167 = vector.broadcast %cst_60 : f32 to vector<8x128xf32>
    %168 = arith.addf %166, %167 : vector<8x128xf32>
    %cst_61 = arith.constant 5.000000e-01 : f32
    %169 = vector.broadcast %cst_61 : f32 to vector<8x128xf32>
    %170 = arith.mulf %169, %168 : vector<8x128xf32>
    %171 = vector.extract_strided_slice %154 {offsets = [0, 256], sizes = [8, 128], strides = [1, 1]} : vector<8x512xf32> to vector<8x128xf32>
    %172 = math.tanh %171 : vector<8x128xf32>
    %173 = vector.extract_strided_slice %154 {offsets = [0, 384], sizes = [8, 128], strides = [1, 1]} : vector<8x512xf32> to vector<8x128xf32>
    %cst_62 = arith.constant 5.000000e-01 : f32
    %174 = vector.broadcast %cst_62 : f32 to vector<8x128xf32>
    %175 = arith.mulf %174, %173 : vector<8x128xf32>
    %176 = math.tanh %175 : vector<8x128xf32>
    %cst_63 = arith.constant 1.000000e+00 : f32
    %177 = vector.broadcast %cst_63 : f32 to vector<8x128xf32>
    %178 = arith.addf %176, %177 : vector<8x128xf32>
    %cst_64 = arith.constant 5.000000e-01 : f32
    %179 = vector.broadcast %cst_64 : f32 to vector<8x128xf32>
    %180 = arith.mulf %179, %178 : vector<8x128xf32>
    %181 = arith.mulf %170, %109 : vector<8x128xf32>
    %182 = arith.mulf %162, %172 : vector<8x128xf32>
    %183 = arith.addf %181, %182 : vector<8x128xf32>
    %184 = math.tanh %183 : vector<8x128xf32>
    %185 = arith.mulf %180, %184 : vector<8x128xf32>
    %c3_i32 = arith.constant 3 : i32
    %186 = arith.truncf %149 : vector<8x128xf32> to vector<8x128xbf16>
    %187 = arith.truncf %185 : vector<8x128xf32> to vector<8x128xbf16>
    %188 = arith.index_cast %c3_i32 : i32 to index
    %c0_65 = arith.constant 0 : index
    %c0_66 = arith.constant 0 : index
    %189 = vector.load %arg0[%188, %c0_65, %c0_66] : memref<8x8x512xf32, #tpu.memory_space<vmem>>, vector<1x8x512xf32>
    %190 = vector.shape_cast %189 : vector<1x8x512xf32> to vector<8x512xf32>
    %cst_67 = arith.constant dense<0.000000e+00> : vector<8x512xf32>
    %191 = tpu.matmul %186, %0, %cst_67 {dimension_numbers = #tpu.dot_dimension_numbers<[1], [0], [0], [1], [0, 0, 1, 1], [], []>} : vector<8x128xbf16>, vector<128x512xbf16>, vector<8x512xf32> -> vector<8x512xf32>
    %192 = arith.addf %190, %191 : vector<8x512xf32>
    %193 = vector.extract_strided_slice %192 {offsets = [0, 0], sizes = [8, 128], strides = [1, 1]} : vector<8x512xf32> to vector<8x128xf32>
    %cst_68 = arith.constant 5.000000e-01 : f32
    %194 = vector.broadcast %cst_68 : f32 to vector<8x128xf32>
    %195 = arith.mulf %194, %193 : vector<8x128xf32>
    %196 = math.tanh %195 : vector<8x128xf32>
    %cst_69 = arith.constant 1.000000e+00 : f32
    %197 = vector.broadcast %cst_69 : f32 to vector<8x128xf32>
    %198 = arith.addf %196, %197 : vector<8x128xf32>
    %cst_70 = arith.constant 5.000000e-01 : f32
    %199 = vector.broadcast %cst_70 : f32 to vector<8x128xf32>
    %200 = arith.mulf %199, %198 : vector<8x128xf32>
    %201 = vector.extract_strided_slice %192 {offsets = [0, 128], sizes = [8, 128], strides = [1, 1]} : vector<8x512xf32> to vector<8x128xf32>
    %cst_71 = arith.constant 5.000000e-01 : f32
    %202 = vector.broadcast %cst_71 : f32 to vector<8x128xf32>
    %203 = arith.mulf %202, %201 : vector<8x128xf32>
    %204 = math.tanh %203 : vector<8x128xf32>
    %cst_72 = arith.constant 1.000000e+00 : f32
    %205 = vector.broadcast %cst_72 : f32 to vector<8x128xf32>
    %206 = arith.addf %204, %205 : vector<8x128xf32>
    %cst_73 = arith.constant 5.000000e-01 : f32
    %207 = vector.broadcast %cst_73 : f32 to vector<8x128xf32>
    %208 = arith.mulf %207, %206 : vector<8x128xf32>
    %209 = vector.extract_strided_slice %192 {offsets = [0, 256], sizes = [8, 128], strides = [1, 1]} : vector<8x512xf32> to vector<8x128xf32>
    %210 = math.tanh %209 : vector<8x128xf32>
    %211 = vector.extract_strided_slice %192 {offsets = [0, 384], sizes = [8, 128], strides = [1, 1]} : vector<8x512xf32> to vector<8x128xf32>
    %cst_74 = arith.constant 5.000000e-01 : f32
    %212 = vector.broadcast %cst_74 : f32 to vector<8x128xf32>
    %213 = arith.mulf %212, %211 : vector<8x128xf32>
    %214 = math.tanh %213 : vector<8x128xf32>
    %cst_75 = arith.constant 1.000000e+00 : f32
    %215 = vector.broadcast %cst_75 : f32 to vector<8x128xf32>
    %216 = arith.addf %214, %215 : vector<8x128xf32>
    %cst_76 = arith.constant 5.000000e-01 : f32
    %217 = vector.broadcast %cst_76 : f32 to vector<8x128xf32>
    %218 = arith.mulf %217, %216 : vector<8x128xf32>
    %219 = arith.mulf %208, %147 : vector<8x128xf32>
    %220 = arith.mulf %200, %210 : vector<8x128xf32>
    %221 = arith.addf %219, %220 : vector<8x128xf32>
    %222 = math.tanh %221 : vector<8x128xf32>
    %223 = arith.mulf %218, %222 : vector<8x128xf32>
    %cst_77 = arith.constant dense<0.000000e+00> : vector<8x512xf32>
    %224 = tpu.matmul %186, %1, %cst_77 {dimension_numbers = #tpu.dot_dimension_numbers<[1], [0], [0], [1], [0, 0, 1, 1], [], []>} : vector<8x128xbf16>, vector<128x512xbf16>, vector<8x512xf32> -> vector<8x512xf32>
    %225 = vector.broadcast %3 : vector<1x512xf32> to vector<8x512xf32>
    %226 = arith.addf %225, %224 : vector<8x512xf32>
    %cst_78 = arith.constant dense<0.000000e+00> : vector<8x512xf32>
    %227 = tpu.matmul %187, %2, %cst_78 {dimension_numbers = #tpu.dot_dimension_numbers<[1], [0], [0], [1], [0, 0, 1, 1], [], []>} : vector<8x128xbf16>, vector<128x512xbf16>, vector<8x512xf32> -> vector<8x512xf32>
    %228 = arith.addf %226, %227 : vector<8x512xf32>
    %229 = vector.extract_strided_slice %228 {offsets = [0, 0], sizes = [8, 128], strides = [1, 1]} : vector<8x512xf32> to vector<8x128xf32>
    %cst_79 = arith.constant 5.000000e-01 : f32
    %230 = vector.broadcast %cst_79 : f32 to vector<8x128xf32>
    %231 = arith.mulf %230, %229 : vector<8x128xf32>
    %232 = math.tanh %231 : vector<8x128xf32>
    %cst_80 = arith.constant 1.000000e+00 : f32
    %233 = vector.broadcast %cst_80 : f32 to vector<8x128xf32>
    %234 = arith.addf %232, %233 : vector<8x128xf32>
    %cst_81 = arith.constant 5.000000e-01 : f32
    %235 = vector.broadcast %cst_81 : f32 to vector<8x128xf32>
    %236 = arith.mulf %235, %234 : vector<8x128xf32>
    %237 = vector.extract_strided_slice %228 {offsets = [0, 128], sizes = [8, 128], strides = [1, 1]} : vector<8x512xf32> to vector<8x128xf32>
    %cst_82 = arith.constant 5.000000e-01 : f32
    %238 = vector.broadcast %cst_82 : f32 to vector<8x128xf32>
    %239 = arith.mulf %238, %237 : vector<8x128xf32>
    %240 = math.tanh %239 : vector<8x128xf32>
    %cst_83 = arith.constant 1.000000e+00 : f32
    %241 = vector.broadcast %cst_83 : f32 to vector<8x128xf32>
    %242 = arith.addf %240, %241 : vector<8x128xf32>
    %cst_84 = arith.constant 5.000000e-01 : f32
    %243 = vector.broadcast %cst_84 : f32 to vector<8x128xf32>
    %244 = arith.mulf %243, %242 : vector<8x128xf32>
    %245 = vector.extract_strided_slice %228 {offsets = [0, 256], sizes = [8, 128], strides = [1, 1]} : vector<8x512xf32> to vector<8x128xf32>
    %246 = math.tanh %245 : vector<8x128xf32>
    %247 = vector.extract_strided_slice %228 {offsets = [0, 384], sizes = [8, 128], strides = [1, 1]} : vector<8x512xf32> to vector<8x128xf32>
    %cst_85 = arith.constant 5.000000e-01 : f32
    %248 = vector.broadcast %cst_85 : f32 to vector<8x128xf32>
    %249 = arith.mulf %248, %247 : vector<8x128xf32>
    %250 = math.tanh %249 : vector<8x128xf32>
    %cst_86 = arith.constant 1.000000e+00 : f32
    %251 = vector.broadcast %cst_86 : f32 to vector<8x128xf32>
    %252 = arith.addf %250, %251 : vector<8x128xf32>
    %cst_87 = arith.constant 5.000000e-01 : f32
    %253 = vector.broadcast %cst_87 : f32 to vector<8x128xf32>
    %254 = arith.mulf %253, %252 : vector<8x128xf32>
    %255 = arith.mulf %244, %183 : vector<8x128xf32>
    %256 = arith.mulf %236, %246 : vector<8x128xf32>
    %257 = arith.addf %255, %256 : vector<8x128xf32>
    %258 = math.tanh %257 : vector<8x128xf32>
    %259 = arith.mulf %254, %258 : vector<8x128xf32>
    %c4_i32 = arith.constant 4 : i32
    %260 = arith.truncf %223 : vector<8x128xf32> to vector<8x128xbf16>
    %261 = arith.truncf %259 : vector<8x128xf32> to vector<8x128xbf16>
    %262 = arith.index_cast %c4_i32 : i32 to index
    %c0_88 = arith.constant 0 : index
    %c0_89 = arith.constant 0 : index
    %263 = vector.load %arg0[%262, %c0_88, %c0_89] : memref<8x8x512xf32, #tpu.memory_space<vmem>>, vector<1x8x512xf32>
    %264 = vector.shape_cast %263 : vector<1x8x512xf32> to vector<8x512xf32>
    %cst_90 = arith.constant dense<0.000000e+00> : vector<8x512xf32>
    %265 = tpu.matmul %260, %0, %cst_90 {dimension_numbers = #tpu.dot_dimension_numbers<[1], [0], [0], [1], [0, 0, 1, 1], [], []>} : vector<8x128xbf16>, vector<128x512xbf16>, vector<8x512xf32> -> vector<8x512xf32>
    %266 = arith.addf %264, %265 : vector<8x512xf32>
    %267 = vector.extract_strided_slice %266 {offsets = [0, 0], sizes = [8, 128], strides = [1, 1]} : vector<8x512xf32> to vector<8x128xf32>
    %cst_91 = arith.constant 5.000000e-01 : f32
    %268 = vector.broadcast %cst_91 : f32 to vector<8x128xf32>
    %269 = arith.mulf %268, %267 : vector<8x128xf32>
    %270 = math.tanh %269 : vector<8x128xf32>
    %cst_92 = arith.constant 1.000000e+00 : f32
    %271 = vector.broadcast %cst_92 : f32 to vector<8x128xf32>
    %272 = arith.addf %270, %271 : vector<8x128xf32>
    %cst_93 = arith.constant 5.000000e-01 : f32
    %273 = vector.broadcast %cst_93 : f32 to vector<8x128xf32>
    %274 = arith.mulf %273, %272 : vector<8x128xf32>
    %275 = vector.extract_strided_slice %266 {offsets = [0, 128], sizes = [8, 128], strides = [1, 1]} : vector<8x512xf32> to vector<8x128xf32>
    %cst_94 = arith.constant 5.000000e-01 : f32
    %276 = vector.broadcast %cst_94 : f32 to vector<8x128xf32>
    %277 = arith.mulf %276, %275 : vector<8x128xf32>
    %278 = math.tanh %277 : vector<8x128xf32>
    %cst_95 = arith.constant 1.000000e+00 : f32
    %279 = vector.broadcast %cst_95 : f32 to vector<8x128xf32>
    %280 = arith.addf %278, %279 : vector<8x128xf32>
    %cst_96 = arith.constant 5.000000e-01 : f32
    %281 = vector.broadcast %cst_96 : f32 to vector<8x128xf32>
    %282 = arith.mulf %281, %280 : vector<8x128xf32>
    %283 = vector.extract_strided_slice %266 {offsets = [0, 256], sizes = [8, 128], strides = [1, 1]} : vector<8x512xf32> to vector<8x128xf32>
    %284 = math.tanh %283 : vector<8x128xf32>
    %285 = vector.extract_strided_slice %266 {offsets = [0, 384], sizes = [8, 128], strides = [1, 1]} : vector<8x512xf32> to vector<8x128xf32>
    %cst_97 = arith.constant 5.000000e-01 : f32
    %286 = vector.broadcast %cst_97 : f32 to vector<8x128xf32>
    %287 = arith.mulf %286, %285 : vector<8x128xf32>
    %288 = math.tanh %287 : vector<8x128xf32>
    %cst_98 = arith.constant 1.000000e+00 : f32
    %289 = vector.broadcast %cst_98 : f32 to vector<8x128xf32>
    %290 = arith.addf %288, %289 : vector<8x128xf32>
    %cst_99 = arith.constant 5.000000e-01 : f32
    %291 = vector.broadcast %cst_99 : f32 to vector<8x128xf32>
    %292 = arith.mulf %291, %290 : vector<8x128xf32>
    %293 = arith.mulf %282, %221 : vector<8x128xf32>
    %294 = arith.mulf %274, %284 : vector<8x128xf32>
    %295 = arith.addf %293, %294 : vector<8x128xf32>
    %296 = math.tanh %295 : vector<8x128xf32>
    %297 = arith.mulf %292, %296 : vector<8x128xf32>
    %cst_100 = arith.constant dense<0.000000e+00> : vector<8x512xf32>
    %298 = tpu.matmul %260, %1, %cst_100 {dimension_numbers = #tpu.dot_dimension_numbers<[1], [0], [0], [1], [0, 0, 1, 1], [], []>} : vector<8x128xbf16>, vector<128x512xbf16>, vector<8x512xf32> -> vector<8x512xf32>
    %299 = vector.broadcast %3 : vector<1x512xf32> to vector<8x512xf32>
    %300 = arith.addf %299, %298 : vector<8x512xf32>
    %cst_101 = arith.constant dense<0.000000e+00> : vector<8x512xf32>
    %301 = tpu.matmul %261, %2, %cst_101 {dimension_numbers = #tpu.dot_dimension_numbers<[1], [0], [0], [1], [0, 0, 1, 1], [], []>} : vector<8x128xbf16>, vector<128x512xbf16>, vector<8x512xf32> -> vector<8x512xf32>
    %302 = arith.addf %300, %301 : vector<8x512xf32>
    %303 = vector.extract_strided_slice %302 {offsets = [0, 0], sizes = [8, 128], strides = [1, 1]} : vector<8x512xf32> to vector<8x128xf32>
    %cst_102 = arith.constant 5.000000e-01 : f32
    %304 = vector.broadcast %cst_102 : f32 to vector<8x128xf32>
    %305 = arith.mulf %304, %303 : vector<8x128xf32>
    %306 = math.tanh %305 : vector<8x128xf32>
    %cst_103 = arith.constant 1.000000e+00 : f32
    %307 = vector.broadcast %cst_103 : f32 to vector<8x128xf32>
    %308 = arith.addf %306, %307 : vector<8x128xf32>
    %cst_104 = arith.constant 5.000000e-01 : f32
    %309 = vector.broadcast %cst_104 : f32 to vector<8x128xf32>
    %310 = arith.mulf %309, %308 : vector<8x128xf32>
    %311 = vector.extract_strided_slice %302 {offsets = [0, 128], sizes = [8, 128], strides = [1, 1]} : vector<8x512xf32> to vector<8x128xf32>
    %cst_105 = arith.constant 5.000000e-01 : f32
    %312 = vector.broadcast %cst_105 : f32 to vector<8x128xf32>
    %313 = arith.mulf %312, %311 : vector<8x128xf32>
    %314 = math.tanh %313 : vector<8x128xf32>
    %cst_106 = arith.constant 1.000000e+00 : f32
    %315 = vector.broadcast %cst_106 : f32 to vector<8x128xf32>
    %316 = arith.addf %314, %315 : vector<8x128xf32>
    %cst_107 = arith.constant 5.000000e-01 : f32
    %317 = vector.broadcast %cst_107 : f32 to vector<8x128xf32>
    %318 = arith.mulf %317, %316 : vector<8x128xf32>
    %319 = vector.extract_strided_slice %302 {offsets = [0, 256], sizes = [8, 128], strides = [1, 1]} : vector<8x512xf32> to vector<8x128xf32>
    %320 = math.tanh %319 : vector<8x128xf32>
    %321 = vector.extract_strided_slice %302 {offsets = [0, 384], sizes = [8, 128], strides = [1, 1]} : vector<8x512xf32> to vector<8x128xf32>
    %cst_108 = arith.constant 5.000000e-01 : f32
    %322 = vector.broadcast %cst_108 : f32 to vector<8x128xf32>
    %323 = arith.mulf %322, %321 : vector<8x128xf32>
    %324 = math.tanh %323 : vector<8x128xf32>
    %cst_109 = arith.constant 1.000000e+00 : f32
    %325 = vector.broadcast %cst_109 : f32 to vector<8x128xf32>
    %326 = arith.addf %324, %325 : vector<8x128xf32>
    %cst_110 = arith.constant 5.000000e-01 : f32
    %327 = vector.broadcast %cst_110 : f32 to vector<8x128xf32>
    %328 = arith.mulf %327, %326 : vector<8x128xf32>
    %329 = arith.mulf %318, %257 : vector<8x128xf32>
    %330 = arith.mulf %310, %320 : vector<8x128xf32>
    %331 = arith.addf %329, %330 : vector<8x128xf32>
    %332 = math.tanh %331 : vector<8x128xf32>
    %333 = arith.mulf %328, %332 : vector<8x128xf32>
    %c5_i32 = arith.constant 5 : i32
    %334 = arith.truncf %297 : vector<8x128xf32> to vector<8x128xbf16>
    %335 = arith.truncf %333 : vector<8x128xf32> to vector<8x128xbf16>
    %336 = arith.index_cast %c5_i32 : i32 to index
    %c0_111 = arith.constant 0 : index
    %c0_112 = arith.constant 0 : index
    %337 = vector.load %arg0[%336, %c0_111, %c0_112] : memref<8x8x512xf32, #tpu.memory_space<vmem>>, vector<1x8x512xf32>
    %338 = vector.shape_cast %337 : vector<1x8x512xf32> to vector<8x512xf32>
    %cst_113 = arith.constant dense<0.000000e+00> : vector<8x512xf32>
    %339 = tpu.matmul %334, %0, %cst_113 {dimension_numbers = #tpu.dot_dimension_numbers<[1], [0], [0], [1], [0, 0, 1, 1], [], []>} : vector<8x128xbf16>, vector<128x512xbf16>, vector<8x512xf32> -> vector<8x512xf32>
    %340 = arith.addf %338, %339 : vector<8x512xf32>
    %341 = vector.extract_strided_slice %340 {offsets = [0, 0], sizes = [8, 128], strides = [1, 1]} : vector<8x512xf32> to vector<8x128xf32>
    %cst_114 = arith.constant 5.000000e-01 : f32
    %342 = vector.broadcast %cst_114 : f32 to vector<8x128xf32>
    %343 = arith.mulf %342, %341 : vector<8x128xf32>
    %344 = math.tanh %343 : vector<8x128xf32>
    %cst_115 = arith.constant 1.000000e+00 : f32
    %345 = vector.broadcast %cst_115 : f32 to vector<8x128xf32>
    %346 = arith.addf %344, %345 : vector<8x128xf32>
    %cst_116 = arith.constant 5.000000e-01 : f32
    %347 = vector.broadcast %cst_116 : f32 to vector<8x128xf32>
    %348 = arith.mulf %347, %346 : vector<8x128xf32>
    %349 = vector.extract_strided_slice %340 {offsets = [0, 128], sizes = [8, 128], strides = [1, 1]} : vector<8x512xf32> to vector<8x128xf32>
    %cst_117 = arith.constant 5.000000e-01 : f32
    %350 = vector.broadcast %cst_117 : f32 to vector<8x128xf32>
    %351 = arith.mulf %350, %349 : vector<8x128xf32>
    %352 = math.tanh %351 : vector<8x128xf32>
    %cst_118 = arith.constant 1.000000e+00 : f32
    %353 = vector.broadcast %cst_118 : f32 to vector<8x128xf32>
    %354 = arith.addf %352, %353 : vector<8x128xf32>
    %cst_119 = arith.constant 5.000000e-01 : f32
    %355 = vector.broadcast %cst_119 : f32 to vector<8x128xf32>
    %356 = arith.mulf %355, %354 : vector<8x128xf32>
    %357 = vector.extract_strided_slice %340 {offsets = [0, 256], sizes = [8, 128], strides = [1, 1]} : vector<8x512xf32> to vector<8x128xf32>
    %358 = math.tanh %357 : vector<8x128xf32>
    %359 = vector.extract_strided_slice %340 {offsets = [0, 384], sizes = [8, 128], strides = [1, 1]} : vector<8x512xf32> to vector<8x128xf32>
    %cst_120 = arith.constant 5.000000e-01 : f32
    %360 = vector.broadcast %cst_120 : f32 to vector<8x128xf32>
    %361 = arith.mulf %360, %359 : vector<8x128xf32>
    %362 = math.tanh %361 : vector<8x128xf32>
    %cst_121 = arith.constant 1.000000e+00 : f32
    %363 = vector.broadcast %cst_121 : f32 to vector<8x128xf32>
    %364 = arith.addf %362, %363 : vector<8x128xf32>
    %cst_122 = arith.constant 5.000000e-01 : f32
    %365 = vector.broadcast %cst_122 : f32 to vector<8x128xf32>
    %366 = arith.mulf %365, %364 : vector<8x128xf32>
    %367 = arith.mulf %356, %295 : vector<8x128xf32>
    %368 = arith.mulf %348, %358 : vector<8x128xf32>
    %369 = arith.addf %367, %368 : vector<8x128xf32>
    %370 = math.tanh %369 : vector<8x128xf32>
    %371 = arith.mulf %366, %370 : vector<8x128xf32>
    %cst_123 = arith.constant dense<0.000000e+00> : vector<8x512xf32>
    %372 = tpu.matmul %334, %1, %cst_123 {dimension_numbers = #tpu.dot_dimension_numbers<[1], [0], [0], [1], [0, 0, 1, 1], [], []>} : vector<8x128xbf16>, vector<128x512xbf16>, vector<8x512xf32> -> vector<8x512xf32>
    %373 = vector.broadcast %3 : vector<1x512xf32> to vector<8x512xf32>
    %374 = arith.addf %373, %372 : vector<8x512xf32>
    %cst_124 = arith.constant dense<0.000000e+00> : vector<8x512xf32>
    %375 = tpu.matmul %335, %2, %cst_124 {dimension_numbers = #tpu.dot_dimension_numbers<[1], [0], [0], [1], [0, 0, 1, 1], [], []>} : vector<8x128xbf16>, vector<128x512xbf16>, vector<8x512xf32> -> vector<8x512xf32>
    %376 = arith.addf %374, %375 : vector<8x512xf32>
    %377 = vector.extract_strided_slice %376 {offsets = [0, 0], sizes = [8, 128], strides = [1, 1]} : vector<8x512xf32> to vector<8x128xf32>
    %cst_125 = arith.constant 5.000000e-01 : f32
    %378 = vector.broadcast %cst_125 : f32 to vector<8x128xf32>
    %379 = arith.mulf %378, %377 : vector<8x128xf32>
    %380 = math.tanh %379 : vector<8x128xf32>
    %cst_126 = arith.constant 1.000000e+00 : f32
    %381 = vector.broadcast %cst_126 : f32 to vector<8x128xf32>
    %382 = arith.addf %380, %381 : vector<8x128xf32>
    %cst_127 = arith.constant 5.000000e-01 : f32
    %383 = vector.broadcast %cst_127 : f32 to vector<8x128xf32>
    %384 = arith.mulf %383, %382 : vector<8x128xf32>
    %385 = vector.extract_strided_slice %376 {offsets = [0, 128], sizes = [8, 128], strides = [1, 1]} : vector<8x512xf32> to vector<8x128xf32>
    %cst_128 = arith.constant 5.000000e-01 : f32
    %386 = vector.broadcast %cst_128 : f32 to vector<8x128xf32>
    %387 = arith.mulf %386, %385 : vector<8x128xf32>
    %388 = math.tanh %387 : vector<8x128xf32>
    %cst_129 = arith.constant 1.000000e+00 : f32
    %389 = vector.broadcast %cst_129 : f32 to vector<8x128xf32>
    %390 = arith.addf %388, %389 : vector<8x128xf32>
    %cst_130 = arith.constant 5.000000e-01 : f32
    %391 = vector.broadcast %cst_130 : f32 to vector<8x128xf32>
    %392 = arith.mulf %391, %390 : vector<8x128xf32>
    %393 = vector.extract_strided_slice %376 {offsets = [0, 256], sizes = [8, 128], strides = [1, 1]} : vector<8x512xf32> to vector<8x128xf32>
    %394 = math.tanh %393 : vector<8x128xf32>
    %395 = vector.extract_strided_slice %376 {offsets = [0, 384], sizes = [8, 128], strides = [1, 1]} : vector<8x512xf32> to vector<8x128xf32>
    %cst_131 = arith.constant 5.000000e-01 : f32
    %396 = vector.broadcast %cst_131 : f32 to vector<8x128xf32>
    %397 = arith.mulf %396, %395 : vector<8x128xf32>
    %398 = math.tanh %397 : vector<8x128xf32>
    %cst_132 = arith.constant 1.000000e+00 : f32
    %399 = vector.broadcast %cst_132 : f32 to vector<8x128xf32>
    %400 = arith.addf %398, %399 : vector<8x128xf32>
    %cst_133 = arith.constant 5.000000e-01 : f32
    %401 = vector.broadcast %cst_133 : f32 to vector<8x128xf32>
    %402 = arith.mulf %401, %400 : vector<8x128xf32>
    %403 = arith.mulf %392, %331 : vector<8x128xf32>
    %404 = arith.mulf %384, %394 : vector<8x128xf32>
    %405 = arith.addf %403, %404 : vector<8x128xf32>
    %406 = math.tanh %405 : vector<8x128xf32>
    %407 = arith.mulf %402, %406 : vector<8x128xf32>
    %c6_i32 = arith.constant 6 : i32
    %408 = arith.truncf %371 : vector<8x128xf32> to vector<8x128xbf16>
    %409 = arith.truncf %407 : vector<8x128xf32> to vector<8x128xbf16>
    %410 = arith.index_cast %c6_i32 : i32 to index
    %c0_134 = arith.constant 0 : index
    %c0_135 = arith.constant 0 : index
    %411 = vector.load %arg0[%410, %c0_134, %c0_135] : memref<8x8x512xf32, #tpu.memory_space<vmem>>, vector<1x8x512xf32>
    %412 = vector.shape_cast %411 : vector<1x8x512xf32> to vector<8x512xf32>
    %cst_136 = arith.constant dense<0.000000e+00> : vector<8x512xf32>
    %413 = tpu.matmul %408, %0, %cst_136 {dimension_numbers = #tpu.dot_dimension_numbers<[1], [0], [0], [1], [0, 0, 1, 1], [], []>} : vector<8x128xbf16>, vector<128x512xbf16>, vector<8x512xf32> -> vector<8x512xf32>
    %414 = arith.addf %412, %413 : vector<8x512xf32>
    %415 = vector.extract_strided_slice %414 {offsets = [0, 0], sizes = [8, 128], strides = [1, 1]} : vector<8x512xf32> to vector<8x128xf32>
    %cst_137 = arith.constant 5.000000e-01 : f32
    %416 = vector.broadcast %cst_137 : f32 to vector<8x128xf32>
    %417 = arith.mulf %416, %415 : vector<8x128xf32>
    %418 = math.tanh %417 : vector<8x128xf32>
    %cst_138 = arith.constant 1.000000e+00 : f32
    %419 = vector.broadcast %cst_138 : f32 to vector<8x128xf32>
    %420 = arith.addf %418, %419 : vector<8x128xf32>
    %cst_139 = arith.constant 5.000000e-01 : f32
    %421 = vector.broadcast %cst_139 : f32 to vector<8x128xf32>
    %422 = arith.mulf %421, %420 : vector<8x128xf32>
    %423 = vector.extract_strided_slice %414 {offsets = [0, 128], sizes = [8, 128], strides = [1, 1]} : vector<8x512xf32> to vector<8x128xf32>
    %cst_140 = arith.constant 5.000000e-01 : f32
    %424 = vector.broadcast %cst_140 : f32 to vector<8x128xf32>
    %425 = arith.mulf %424, %423 : vector<8x128xf32>
    %426 = math.tanh %425 : vector<8x128xf32>
    %cst_141 = arith.constant 1.000000e+00 : f32
    %427 = vector.broadcast %cst_141 : f32 to vector<8x128xf32>
    %428 = arith.addf %426, %427 : vector<8x128xf32>
    %cst_142 = arith.constant 5.000000e-01 : f32
    %429 = vector.broadcast %cst_142 : f32 to vector<8x128xf32>
    %430 = arith.mulf %429, %428 : vector<8x128xf32>
    %431 = vector.extract_strided_slice %414 {offsets = [0, 256], sizes = [8, 128], strides = [1, 1]} : vector<8x512xf32> to vector<8x128xf32>
    %432 = math.tanh %431 : vector<8x128xf32>
    %433 = vector.extract_strided_slice %414 {offsets = [0, 384], sizes = [8, 128], strides = [1, 1]} : vector<8x512xf32> to vector<8x128xf32>
    %cst_143 = arith.constant 5.000000e-01 : f32
    %434 = vector.broadcast %cst_143 : f32 to vector<8x128xf32>
    %435 = arith.mulf %434, %433 : vector<8x128xf32>
    %436 = math.tanh %435 : vector<8x128xf32>
    %cst_144 = arith.constant 1.000000e+00 : f32
    %437 = vector.broadcast %cst_144 : f32 to vector<8x128xf32>
    %438 = arith.addf %436, %437 : vector<8x128xf32>
    %cst_145 = arith.constant 5.000000e-01 : f32
    %439 = vector.broadcast %cst_145 : f32 to vector<8x128xf32>
    %440 = arith.mulf %439, %438 : vector<8x128xf32>
    %441 = arith.mulf %430, %369 : vector<8x128xf32>
    %442 = arith.mulf %422, %432 : vector<8x128xf32>
    %443 = arith.addf %441, %442 : vector<8x128xf32>
    %444 = math.tanh %443 : vector<8x128xf32>
    %445 = arith.mulf %440, %444 : vector<8x128xf32>
    %cst_146 = arith.constant dense<0.000000e+00> : vector<8x512xf32>
    %446 = tpu.matmul %408, %1, %cst_146 {dimension_numbers = #tpu.dot_dimension_numbers<[1], [0], [0], [1], [0, 0, 1, 1], [], []>} : vector<8x128xbf16>, vector<128x512xbf16>, vector<8x512xf32> -> vector<8x512xf32>
    %447 = vector.broadcast %3 : vector<1x512xf32> to vector<8x512xf32>
    %448 = arith.addf %447, %446 : vector<8x512xf32>
    %cst_147 = arith.constant dense<0.000000e+00> : vector<8x512xf32>
    %449 = tpu.matmul %409, %2, %cst_147 {dimension_numbers = #tpu.dot_dimension_numbers<[1], [0], [0], [1], [0, 0, 1, 1], [], []>} : vector<8x128xbf16>, vector<128x512xbf16>, vector<8x512xf32> -> vector<8x512xf32>
    %450 = arith.addf %448, %449 : vector<8x512xf32>
    %451 = vector.extract_strided_slice %450 {offsets = [0, 0], sizes = [8, 128], strides = [1, 1]} : vector<8x512xf32> to vector<8x128xf32>
    %cst_148 = arith.constant 5.000000e-01 : f32
    %452 = vector.broadcast %cst_148 : f32 to vector<8x128xf32>
    %453 = arith.mulf %452, %451 : vector<8x128xf32>
    %454 = math.tanh %453 : vector<8x128xf32>
    %cst_149 = arith.constant 1.000000e+00 : f32
    %455 = vector.broadcast %cst_149 : f32 to vector<8x128xf32>
    %456 = arith.addf %454, %455 : vector<8x128xf32>
    %cst_150 = arith.constant 5.000000e-01 : f32
    %457 = vector.broadcast %cst_150 : f32 to vector<8x128xf32>
    %458 = arith.mulf %457, %456 : vector<8x128xf32>
    %459 = vector.extract_strided_slice %450 {offsets = [0, 128], sizes = [8, 128], strides = [1, 1]} : vector<8x512xf32> to vector<8x128xf32>
    %cst_151 = arith.constant 5.000000e-01 : f32
    %460 = vector.broadcast %cst_151 : f32 to vector<8x128xf32>
    %461 = arith.mulf %460, %459 : vector<8x128xf32>
    %462 = math.tanh %461 : vector<8x128xf32>
    %cst_152 = arith.constant 1.000000e+00 : f32
    %463 = vector.broadcast %cst_152 : f32 to vector<8x128xf32>
    %464 = arith.addf %462, %463 : vector<8x128xf32>
    %cst_153 = arith.constant 5.000000e-01 : f32
    %465 = vector.broadcast %cst_153 : f32 to vector<8x128xf32>
    %466 = arith.mulf %465, %464 : vector<8x128xf32>
    %467 = vector.extract_strided_slice %450 {offsets = [0, 256], sizes = [8, 128], strides = [1, 1]} : vector<8x512xf32> to vector<8x128xf32>
    %468 = math.tanh %467 : vector<8x128xf32>
    %469 = vector.extract_strided_slice %450 {offsets = [0, 384], sizes = [8, 128], strides = [1, 1]} : vector<8x512xf32> to vector<8x128xf32>
    %cst_154 = arith.constant 5.000000e-01 : f32
    %470 = vector.broadcast %cst_154 : f32 to vector<8x128xf32>
    %471 = arith.mulf %470, %469 : vector<8x128xf32>
    %472 = math.tanh %471 : vector<8x128xf32>
    %cst_155 = arith.constant 1.000000e+00 : f32
    %473 = vector.broadcast %cst_155 : f32 to vector<8x128xf32>
    %474 = arith.addf %472, %473 : vector<8x128xf32>
    %cst_156 = arith.constant 5.000000e-01 : f32
    %475 = vector.broadcast %cst_156 : f32 to vector<8x128xf32>
    %476 = arith.mulf %475, %474 : vector<8x128xf32>
    %477 = arith.mulf %466, %405 : vector<8x128xf32>
    %478 = arith.mulf %458, %468 : vector<8x128xf32>
    %479 = arith.addf %477, %478 : vector<8x128xf32>
    %480 = math.tanh %479 : vector<8x128xf32>
    %481 = arith.mulf %476, %480 : vector<8x128xf32>
    %c7_i32 = arith.constant 7 : i32
    %482 = arith.truncf %445 : vector<8x128xf32> to vector<8x128xbf16>
    %483 = arith.truncf %481 : vector<8x128xf32> to vector<8x128xbf16>
    %484 = arith.index_cast %c7_i32 : i32 to index
    %c0_157 = arith.constant 0 : index
    %c0_158 = arith.constant 0 : index
    %485 = vector.load %arg0[%484, %c0_157, %c0_158] : memref<8x8x512xf32, #tpu.memory_space<vmem>>, vector<1x8x512xf32>
    %486 = vector.shape_cast %485 : vector<1x8x512xf32> to vector<8x512xf32>
    %cst_159 = arith.constant dense<0.000000e+00> : vector<8x512xf32>
    %487 = tpu.matmul %482, %0, %cst_159 {dimension_numbers = #tpu.dot_dimension_numbers<[1], [0], [0], [1], [0, 0, 1, 1], [], []>} : vector<8x128xbf16>, vector<128x512xbf16>, vector<8x512xf32> -> vector<8x512xf32>
    %488 = arith.addf %486, %487 : vector<8x512xf32>
    %489 = vector.extract_strided_slice %488 {offsets = [0, 0], sizes = [8, 128], strides = [1, 1]} : vector<8x512xf32> to vector<8x128xf32>
    %cst_160 = arith.constant 5.000000e-01 : f32
    %490 = vector.broadcast %cst_160 : f32 to vector<8x128xf32>
    %491 = arith.mulf %490, %489 : vector<8x128xf32>
    %492 = math.tanh %491 : vector<8x128xf32>
    %cst_161 = arith.constant 1.000000e+00 : f32
    %493 = vector.broadcast %cst_161 : f32 to vector<8x128xf32>
    %494 = arith.addf %492, %493 : vector<8x128xf32>
    %cst_162 = arith.constant 5.000000e-01 : f32
    %495 = vector.broadcast %cst_162 : f32 to vector<8x128xf32>
    %496 = arith.mulf %495, %494 : vector<8x128xf32>
    %497 = vector.extract_strided_slice %488 {offsets = [0, 128], sizes = [8, 128], strides = [1, 1]} : vector<8x512xf32> to vector<8x128xf32>
    %cst_163 = arith.constant 5.000000e-01 : f32
    %498 = vector.broadcast %cst_163 : f32 to vector<8x128xf32>
    %499 = arith.mulf %498, %497 : vector<8x128xf32>
    %500 = math.tanh %499 : vector<8x128xf32>
    %cst_164 = arith.constant 1.000000e+00 : f32
    %501 = vector.broadcast %cst_164 : f32 to vector<8x128xf32>
    %502 = arith.addf %500, %501 : vector<8x128xf32>
    %cst_165 = arith.constant 5.000000e-01 : f32
    %503 = vector.broadcast %cst_165 : f32 to vector<8x128xf32>
    %504 = arith.mulf %503, %502 : vector<8x128xf32>
    %505 = vector.extract_strided_slice %488 {offsets = [0, 256], sizes = [8, 128], strides = [1, 1]} : vector<8x512xf32> to vector<8x128xf32>
    %506 = math.tanh %505 : vector<8x128xf32>
    %507 = vector.extract_strided_slice %488 {offsets = [0, 384], sizes = [8, 128], strides = [1, 1]} : vector<8x512xf32> to vector<8x128xf32>
    %cst_166 = arith.constant 5.000000e-01 : f32
    %508 = vector.broadcast %cst_166 : f32 to vector<8x128xf32>
    %509 = arith.mulf %508, %507 : vector<8x128xf32>
    %510 = math.tanh %509 : vector<8x128xf32>
    %cst_167 = arith.constant 1.000000e+00 : f32
    %511 = vector.broadcast %cst_167 : f32 to vector<8x128xf32>
    %512 = arith.addf %510, %511 : vector<8x128xf32>
    %cst_168 = arith.constant 5.000000e-01 : f32
    %513 = vector.broadcast %cst_168 : f32 to vector<8x128xf32>
    %514 = arith.mulf %513, %512 : vector<8x128xf32>
    %515 = arith.mulf %504, %443 : vector<8x128xf32>
    %516 = arith.mulf %496, %506 : vector<8x128xf32>
    %517 = arith.addf %515, %516 : vector<8x128xf32>
    %518 = math.tanh %517 : vector<8x128xf32>
    %519 = arith.mulf %514, %518 : vector<8x128xf32>
    %cst_169 = arith.constant dense<0.000000e+00> : vector<8x512xf32>
    %520 = tpu.matmul %482, %1, %cst_169 {dimension_numbers = #tpu.dot_dimension_numbers<[1], [0], [0], [1], [0, 0, 1, 1], [], []>} : vector<8x128xbf16>, vector<128x512xbf16>, vector<8x512xf32> -> vector<8x512xf32>
    %521 = vector.broadcast %3 : vector<1x512xf32> to vector<8x512xf32>
    %522 = arith.addf %521, %520 : vector<8x512xf32>
    %cst_170 = arith.constant dense<0.000000e+00> : vector<8x512xf32>
    %523 = tpu.matmul %483, %2, %cst_170 {dimension_numbers = #tpu.dot_dimension_numbers<[1], [0], [0], [1], [0, 0, 1, 1], [], []>} : vector<8x128xbf16>, vector<128x512xbf16>, vector<8x512xf32> -> vector<8x512xf32>
    %524 = arith.addf %522, %523 : vector<8x512xf32>
    %525 = vector.extract_strided_slice %524 {offsets = [0, 0], sizes = [8, 128], strides = [1, 1]} : vector<8x512xf32> to vector<8x128xf32>
    %cst_171 = arith.constant 5.000000e-01 : f32
    %526 = vector.broadcast %cst_171 : f32 to vector<8x128xf32>
    %527 = arith.mulf %526, %525 : vector<8x128xf32>
    %528 = math.tanh %527 : vector<8x128xf32>
    %cst_172 = arith.constant 1.000000e+00 : f32
    %529 = vector.broadcast %cst_172 : f32 to vector<8x128xf32>
    %530 = arith.addf %528, %529 : vector<8x128xf32>
    %cst_173 = arith.constant 5.000000e-01 : f32
    %531 = vector.broadcast %cst_173 : f32 to vector<8x128xf32>
    %532 = arith.mulf %531, %530 : vector<8x128xf32>
    %533 = vector.extract_strided_slice %524 {offsets = [0, 128], sizes = [8, 128], strides = [1, 1]} : vector<8x512xf32> to vector<8x128xf32>
    %cst_174 = arith.constant 5.000000e-01 : f32
    %534 = vector.broadcast %cst_174 : f32 to vector<8x128xf32>
    %535 = arith.mulf %534, %533 : vector<8x128xf32>
    %536 = math.tanh %535 : vector<8x128xf32>
    %cst_175 = arith.constant 1.000000e+00 : f32
    %537 = vector.broadcast %cst_175 : f32 to vector<8x128xf32>
    %538 = arith.addf %536, %537 : vector<8x128xf32>
    %cst_176 = arith.constant 5.000000e-01 : f32
    %539 = vector.broadcast %cst_176 : f32 to vector<8x128xf32>
    %540 = arith.mulf %539, %538 : vector<8x128xf32>
    %541 = vector.extract_strided_slice %524 {offsets = [0, 256], sizes = [8, 128], strides = [1, 1]} : vector<8x512xf32> to vector<8x128xf32>
    %542 = math.tanh %541 : vector<8x128xf32>
    %543 = vector.extract_strided_slice %524 {offsets = [0, 384], sizes = [8, 128], strides = [1, 1]} : vector<8x512xf32> to vector<8x128xf32>
    %cst_177 = arith.constant 5.000000e-01 : f32
    %544 = vector.broadcast %cst_177 : f32 to vector<8x128xf32>
    %545 = arith.mulf %544, %543 : vector<8x128xf32>
    %546 = math.tanh %545 : vector<8x128xf32>
    %cst_178 = arith.constant 1.000000e+00 : f32
    %547 = vector.broadcast %cst_178 : f32 to vector<8x128xf32>
    %548 = arith.addf %546, %547 : vector<8x128xf32>
    %cst_179 = arith.constant 5.000000e-01 : f32
    %549 = vector.broadcast %cst_179 : f32 to vector<8x128xf32>
    %550 = arith.mulf %549, %548 : vector<8x128xf32>
    %551 = arith.mulf %540, %479 : vector<8x128xf32>
    %552 = arith.mulf %532, %542 : vector<8x128xf32>
    %553 = arith.addf %551, %552 : vector<8x128xf32>
    %554 = math.tanh %553 : vector<8x128xf32>
    %555 = arith.mulf %550, %554 : vector<8x128xf32>
    %c7_i32_180 = arith.constant 7 : i32
    %556 = arith.truncf %519 : vector<8x128xf32> to vector<8x128xbf16>
    %cst_181 = arith.constant dense<0.000000e+00> : vector<8x512xf32>
    %557 = tpu.matmul %556, %1, %cst_181 {dimension_numbers = #tpu.dot_dimension_numbers<[1], [0], [0], [1], [0, 0, 1, 1], [], []>} : vector<8x128xbf16>, vector<128x512xbf16>, vector<8x512xf32> -> vector<8x512xf32>
    %558 = vector.broadcast %3 : vector<1x512xf32> to vector<8x512xf32>
    %559 = arith.addf %558, %557 : vector<8x512xf32>
    %560 = arith.truncf %555 : vector<8x128xf32> to vector<8x128xbf16>
    %cst_182 = arith.constant dense<0.000000e+00> : vector<8x512xf32>
    %561 = tpu.matmul %560, %2, %cst_182 {dimension_numbers = #tpu.dot_dimension_numbers<[1], [0], [0], [1], [0, 0, 1, 1], [], []>} : vector<8x128xbf16>, vector<128x512xbf16>, vector<8x512xf32> -> vector<8x512xf32>
    %562 = arith.addf %559, %561 : vector<8x512xf32>
    %563 = vector.extract_strided_slice %562 {offsets = [0, 0], sizes = [8, 128], strides = [1, 1]} : vector<8x512xf32> to vector<8x128xf32>
    %cst_183 = arith.constant 5.000000e-01 : f32
    %564 = vector.broadcast %cst_183 : f32 to vector<8x128xf32>
    %565 = arith.mulf %564, %563 : vector<8x128xf32>
    %566 = math.tanh %565 : vector<8x128xf32>
    %cst_184 = arith.constant 1.000000e+00 : f32
    %567 = vector.broadcast %cst_184 : f32 to vector<8x128xf32>
    %568 = arith.addf %566, %567 : vector<8x128xf32>
    %cst_185 = arith.constant 5.000000e-01 : f32
    %569 = vector.broadcast %cst_185 : f32 to vector<8x128xf32>
    %570 = arith.mulf %569, %568 : vector<8x128xf32>
    %571 = vector.extract_strided_slice %562 {offsets = [0, 128], sizes = [8, 128], strides = [1, 1]} : vector<8x512xf32> to vector<8x128xf32>
    %cst_186 = arith.constant 5.000000e-01 : f32
    %572 = vector.broadcast %cst_186 : f32 to vector<8x128xf32>
    %573 = arith.mulf %572, %571 : vector<8x128xf32>
    %574 = math.tanh %573 : vector<8x128xf32>
    %cst_187 = arith.constant 1.000000e+00 : f32
    %575 = vector.broadcast %cst_187 : f32 to vector<8x128xf32>
    %576 = arith.addf %574, %575 : vector<8x128xf32>
    %cst_188 = arith.constant 5.000000e-01 : f32
    %577 = vector.broadcast %cst_188 : f32 to vector<8x128xf32>
    %578 = arith.mulf %577, %576 : vector<8x128xf32>
    %579 = vector.extract_strided_slice %562 {offsets = [0, 256], sizes = [8, 128], strides = [1, 1]} : vector<8x512xf32> to vector<8x128xf32>
    %580 = math.tanh %579 : vector<8x128xf32>
    %581 = vector.extract_strided_slice %562 {offsets = [0, 384], sizes = [8, 128], strides = [1, 1]} : vector<8x512xf32> to vector<8x128xf32>
    %cst_189 = arith.constant 5.000000e-01 : f32
    %582 = vector.broadcast %cst_189 : f32 to vector<8x128xf32>
    %583 = arith.mulf %582, %581 : vector<8x128xf32>
    %584 = math.tanh %583 : vector<8x128xf32>
    %cst_190 = arith.constant 1.000000e+00 : f32
    %585 = vector.broadcast %cst_190 : f32 to vector<8x128xf32>
    %586 = arith.addf %584, %585 : vector<8x128xf32>
    %cst_191 = arith.constant 5.000000e-01 : f32
    %587 = vector.broadcast %cst_191 : f32 to vector<8x128xf32>
    %588 = arith.mulf %587, %586 : vector<8x128xf32>
    %589 = arith.mulf %578, %553 : vector<8x128xf32>
    %590 = arith.mulf %570, %580 : vector<8x128xf32>
    %591 = arith.addf %589, %590 : vector<8x128xf32>
    %592 = math.tanh %591 : vector<8x128xf32>
    %593 = arith.mulf %588, %592 : vector<8x128xf32>
    %c0_192 = arith.constant 0 : index
    %c0_193 = arith.constant 0 : index
    %594 = vector.load %arg5[%c0_192, %c0_193] : memref<128x128xf32, #tpu.memory_space<vmem>>, vector<128x128xf32>
    %cst_194 = arith.constant dense<0.000000e+00> : vector<8x128xf32>
    %595 = tpu.matmul %593, %594, %cst_194 {dimension_numbers = #tpu.dot_dimension_numbers<[1], [0], [0], [1], [0, 0, 1, 1], [], []>} : vector<8x128xf32>, vector<128x128xf32>, vector<8x128xf32> -> vector<8x128xf32>
    %c0_195 = arith.constant 0 : index
    %c0_196 = arith.constant 0 : index
    %596 = vector.load %arg6[%c0_195, %c0_196] : memref<1x128xf32, #tpu.memory_space<vmem>>, vector<1x128xf32>
    %597 = vector.broadcast %596 : vector<1x128xf32> to vector<8x128xf32>
    %598 = arith.addf %595, %597 : vector<8x128xf32>
    %cst_197 = arith.constant dense<0xFF800000> : vector<8xf32>
    %599 = vector.multi_reduction <maximumf>, %598, %cst_197 [1] : vector<8x128xf32> to vector<8xf32>
    %600 = vector.shape_cast %599 : vector<8xf32> to vector<8x1xf32>
    %601 = vector.broadcast %600 : vector<8x1xf32> to vector<8x128xf32>
    %602 = arith.subf %598, %601 : vector<8x128xf32>
    %603 = math.exp %602 : vector<8x128xf32>
    %cst_198 = arith.constant dense<0.000000e+00> : vector<8xf32>
    %604 = vector.multi_reduction <add>, %603, %cst_198 [1] : vector<8x128xf32> to vector<8xf32>
    %605 = vector.shape_cast %604 : vector<8xf32> to vector<8x1xf32>
    %606 = vector.broadcast %605 : vector<8x1xf32> to vector<8x128xf32>
    %607 = arith.divf %603, %606 : vector<8x128xf32>
    %c0_199 = arith.constant 0 : index
    %c0_200 = arith.constant 0 : index
    %608 = vector.load %arg7[%c0_199, %c0_200] : memref<8x128xf32, #tpu.memory_space<vmem>>, vector<8x128xf32>
    tpu.vector_store %arg7[%c0_199, %c0_200], %607 {strides = array<i32>} : memref<8x128xf32, #tpu.memory_space<vmem>>, vector<8x128xf32>,
    return
  }
}

</mosaic_0001>

<bundles_post_ra>
// kernel: rnn_classifier_forward.1
= control target key start
LH: loop header
LB: loop body
LE: loop exit
PB: predicated region body
PF: predicated region fallthrough
CT: control target
= control target key end

     0   :  { %12 = vsyncpa [#allocation3], 0  ;;  %s4442_s0 = inlined_call_operand.vmem [shape: f32[8,8,512], index: 0, kind: input, shape index: {}]   ;;  %s4443_s1 = inlined_call_operand.hbm [shape: bf16[128,512], index: 1, kind: input, shape index: {}]   ;;  %s4444_s2 = inlined_call_operand.hbm [shape: bf16[128,512], index: 2, kind: input, shape index: {}]   ;;  %s4445_s3 = inlined_call_operand.hbm [shape: bf16[128,512], index: 3, kind: input, shape index: {}]   ;;  %s4446_s4 = inlined_call_operand.hbm [shape: f32[1,512], index: 4, kind: input, shape index: {}]   ;;  %s4447_s5 = inlined_call_operand.hbm [shape: f32[128,128], index: 5, kind: input, shape index: {}]   ;;  %s4448_s6 = inlined_call_operand.hbm [shape: f32[1,128], index: 6, kind: input, shape index: {}]   ;;  %s4449_s7 = inlined_call_operand.vmem [shape: f32[8,128], index: 7, kind: output, shape index: {}]  }
   0x1   :  { %13 = vsyncpa [#allocation5], 0 }
   0x2   :  { %14 = vsyncpa [#allocation8], 0 }
   0x3   :  { %15 = vsyncpa [#allocation11], 0  ;;  %s35_s26 = sshll.u32 %s4444_s2, 4  ;;  %s3240_s27 = smov [#allocation4]   ;;  %s36_s26 = int_to_ptr.hbm [resolvable:$true] %s35_s26 }
   0x4   :  { %s37_s28 = sshll.u32 %s3240_s27, 4  ;;  %s62_s8 = sshll.u32 %s4446_s4, 4  ;;  %s38_s28 = int_to_ptr.vmem [resolvable:$true] %s37_s28  ;;  %s63_s8 = int_to_ptr.hbm [resolvable:$true] %s62_s8 }
   0x5   :  { %s3241_s9 = smov 256   ;;  %s3242_s10 = smov 16  }
   0x6   :  { %43 = dma.hbm_to_vmem [thread:$0]  %s36_s26, 4096, %s38_s28, [#allocation5], %s3241_s9, %s3241_s9, %s3242_s10  }
   0x7   :  { %s3243_s11 = smov [#allocation7]   ;;  %s22_s15 = sshll.u32 %s4443_s1, 4  ;;  %s23_s15 = int_to_ptr.hbm [resolvable:$true] %s22_s15 }
   0x8   :  { %s64_s12 = sshll.u32 %s3243_s11, 4  ;;  %s48_s17 = sshll.u32 %s4445_s3, 4  ;;  %s65_s12 = int_to_ptr.vmem [resolvable:$true] %s64_s12  ;;  %s49_s17 = int_to_ptr.hbm [resolvable:$true] %s48_s17 }
   0x9   :  { %67 = dma.hbm_to_vmem [thread:$0]  %s63_s8, 64, %s65_s12, [#allocation8]  }
   0xa   :  { %s3244_s18 = smov [#allocation2]   ;;  %s3245_s4 = smov [#allocation6]  }
   0xb   :  { %s24_s19 = sshll.u32 %s3244_s18, 4  ;;  %s50_s20 = sshll.u32 %s3245_s4, 4  ;;  %s25_s19 = int_to_ptr.vmem [resolvable:$true] %s24_s19  ;;  %s51_s20 = int_to_ptr.vmem [resolvable:$true] %s50_s20 }
   0xc   :  { %30 = dma.hbm_to_vmem [thread:$0]  %s23_s15, 4096, %s25_s19, [#allocation3], %s3241_s9, %s3241_s9, %s3242_s10  }
   0xd   :  { %s72_s23 = sshll.u32 %s4447_s5, 4  ;;  %s3246_s1 = smov [#allocation9]   ;;  %s73_s23 = int_to_ptr.hbm [resolvable:$true] %s72_s23 }
   0xe   :  { %56 = dma.hbm_to_vmem [thread:$0]  %s49_s17, 4096, %s51_s20, [#allocation5], %s3241_s9, %s3241_s9, %s3242_s10  }
   0xf   :  { %s74_s24 = sshll.u32 %s3246_s1, 4  ;;  %s86_s3 = sshll.u32 %s4448_s6, 4  ;;  %s75_s24 = int_to_ptr.vmem [resolvable:$true] %s74_s24  ;;  %s87_s3 = int_to_ptr.hbm [resolvable:$true] %s86_s3 }
  0x10   :  { %s3247_s27 = smov 128   ;;  %s3248_s28 = smov 8  }
  0x11   :  { %80 = dma.hbm_to_vmem [thread:$0]  %s73_s23, 2048, %s75_s24, [#allocation8], %s3247_s27, %s3247_s27, %s3248_s28  }
  0x12   :  { %s3249_s29 = smov [#allocation10]  }
  0x13   :  { %s88_s30 = sshll.u32 %s3249_s29, 4  ;;  %s89_s30 = int_to_ptr.vmem [resolvable:$true] %s88_s30 }
  0x14   :  { %91 = dma.hbm_to_vmem [thread:$0]  %s87_s3, 16, %s89_s30, [#allocation11]  }
  0x15   :  { %3232 = dma.done.wait [#allocation3], 4096  }
  0x16   :  { %3233 = vsyncadd [#allocation3], 4294963200 }
  0x17   :  { %3234 = dma.done.wait [#allocation5], 8192  }
  0x18   :  { %3235 = vsyncadd [#allocation5], 4294959104 }
  0x19   :  { %3236 = dma.done.wait [#allocation8], 2112  }
  0x1a   :  { %3237 = vsyncadd [#allocation8], 4294965184 }
  0x1b   :  { %3238 = dma.done.wait [#allocation11], 16  }
  0x1c   :  { %3239 = vsyncadd [#allocation11], 4294967280  ;;  %v2522_v0 = vld [vmem:[#allocation2 + $0xe0] sm:$0xf]  ;;  %v2846_v1 = vld [vmem:[#allocation2 + $0xec] sm:$0xf0] }
  0x1d   :  { %v2844_v2 = vld [vmem:[#allocation2 + $0xe4] sm:$0xf]  ;;  %v3309_v3 = vor.u32 %v2846_v1, %v2522_v0  ;;  %v2524_v4 = vld [vmem:[#allocation2 + $0xf0] sm:$0xf0]  ;;  %v2530_v5 = vld [vmem:[#allocation2 + $0xe8] sm:$0xf] }
  0x1e   :  { %v2847_v6 = vld [vmem:[#allocation2 + $0xf4] sm:$0xf0]  ;;  %v3311_v7 = vor.u32 %v2844_v2, %v2524_v4  ;;  %v2845_v9 = vld [vmem:[#allocation2 + $0xec] sm:$0xf]  ;;  %v2532_v10 = vld [vmem:[#allocation2 + $0xf8] sm:$0xf0] }
  0x1f   :  { %v3313_v8 = vor.u32 %v2847_v6, %v2530_v5  ;;  %v2506_v11 = vld [vmem:[#allocation2 + $0xc0] sm:$0xf]  ;;  %402 = vmatpush.bf16.msra.mxu0 %v3309_v3  ;;  %v3316_v12 = vor.u32 %v2845_v9, %v2532_v10  ;;  %v2842_v13 = vld [vmem:[#allocation2 + $0xcc] sm:$0xf0]  ;;  %v2840_v14 = vld [vmem:[#allocation2 + $0xc4] sm:$0xf] }
  0x20   :  { %v2508_v15 = vld [vmem:[#allocation2 + $0xd0] sm:$0xf0]  ;;  %415 = vmatpush.bf16.msra.mxu1 %v3311_v7  ;;  %v3320_v16 = vor.u32 %v2842_v13, %v2506_v11  ;;  %v2514_v18 = vld [vmem:[#allocation2 + $0xc8] sm:$0xf]  ;;  %v2843_v19 = vld [vmem:[#allocation2 + $0xd4] sm:$0xf0] }
  0x21   :  { %428 = vmatpush.bf16.msra.mxu2 %v3313_v8  ;;  %v3322_v17 = vor.u32 %v2840_v14, %v2508_v15  ;;  %v2841_v20 = vld [vmem:[#allocation2 + $0xcc] sm:$0xf]  ;;  %441 = vmatpush.bf16.msra.mxu3 %v3316_v12  ;;  %v3325_v21 = vor.u32 %v2843_v19, %v2514_v18  ;;  %v2516_v22 = vld [vmem:[#allocation2 + $0xd8] sm:$0xf0]  ;;  %v2490_v23 = vld [vmem:[#allocation2 + $0xa0] sm:$0xf] }
  0x22   :  { %v2838_v24 = vld [vmem:[#allocation2 + $0xac] sm:$0xf0]  ;;  %v3327_v25 = vor.u32 %v2841_v20, %v2516_v22  ;;  %v2836_v26 = vld [vmem:[#allocation2 + $0xa4] sm:$0xf]  ;;  %v2492_v27 = vld [vmem:[#allocation2 + $0xb0] sm:$0xf0] }
  0x23   :  { %4616 = vst [vmem:[#allocation16_spill] sm:$0xff] %v3322_v17  ;;  %v2498_v28 = vld [vmem:[#allocation2 + $0xa8] sm:$0xf]  ;;  %403 = vmatpush.bf16.msra.mxu0 %v3320_v16  ;;  %v3330_v29 = vor.u32 %v2838_v24, %v2490_v23  ;;  %v2839_v30 = vld [vmem:[#allocation2 + $0xb4] sm:$0xf0]  ;;  %v3334_v33 = vor.u32 %v2836_v26, %v2492_v27 }
  0x24   :  { %4617 = vst [vmem:[#allocation17_spill] sm:$0xff] %v3325_v21  ;;  %v2837_v31 = vld [vmem:[#allocation2 + $0xac] sm:$0xf]  ;;  %v2500_v32 = vld [vmem:[#allocation2 + $0xb8] sm:$0xf0]  ;;  %416 = vmatpush.bf16.msra.mxu1 %v3322_v17  ;;  %v3336_v34 = vor.u32 %v2839_v30, %v2498_v28 }
  0x25   :  { %4618 = vst [vmem:[#allocation18_spill] sm:$0xff] %v3327_v25  ;;  %429 = vmatpush.bf16.msra.mxu2 %v3325_v21  ;;  %v2474_v35 = vld [vmem:[#allocation2 + $0x80] sm:$0xf]  ;;  %v2834_v36 = vld [vmem:[#allocation2 + $0x8c] sm:$0xf0]  ;;  %442 = vmatpush.bf16.msra.mxu3 %v3327_v25  ;;  %v3339_v38 = vor.u32 %v2837_v31, %v2500_v32 }
  0x26   :  { %4619 = vst [vmem:[#allocation19_spill] sm:$0xff] %v3330_v29  ;;  %v2832_v37 = vld [vmem:[#allocation2 + $0x84] sm:$0xf]  ;;  %v2476_v39 = vld [vmem:[#allocation2 + $0x90] sm:$0xf0]  ;;  %v3342_v44 = vor.u32 %v2834_v36, %v2474_v35 }
  0x27   :  { %4620 = vst [vmem:[#allocation20_spill] sm:$0xff] %v3334_v33  ;;  %v2482_v40 = vld [vmem:[#allocation2 + $0x88] sm:$0xf]  ;;  %v2835_v41 = vld [vmem:[#allocation2 + $0x94] sm:$0xf0]  ;;  %404 = vmatpush.bf16.msra.mxu0 %v3330_v29  ;;  %v3346_v45 = vor.u32 %v2832_v37, %v2476_v39  ;;  %v214_v39 = vld [vmem:[%s4442_s0] sm:$0xff] }
  0x28   :  { %4621 = vst [vmem:[#allocation21_spill] sm:$0xff] %v3336_v34  ;;  %v2833_v42 = vld [vmem:[#allocation2 + $0x8c] sm:$0xf]  ;;  %v2484_v43 = vld [vmem:[#allocation2 + $0x98] sm:$0xf0]  ;;  %417 = vmatpush.bf16.msra.mxu1 %v3334_v33  ;;  %v3348_v46 = vor.u32 %v2835_v41, %v2482_v40 }
  0x29   :  { %4622 = vst [vmem:[#allocation22_spill] sm:$0xff] %v3339_v38  ;;  %430 = vmatpush.bf16.msra.mxu2 %v3336_v34  ;;  %v2458_v47 = vld [vmem:[#allocation2 + $0x60] sm:$0xf]  ;;  %v2830_v48 = vld [vmem:[#allocation2 + $0x6c] sm:$0xf0]  ;;  %443 = vmatpush.bf16.msra.mxu3 %v3339_v38  ;;  %v3351_v50 = vor.u32 %v2833_v42, %v2484_v43  ;;  %v215_v40 = vld [vmem:[%s4442_s0 + $0x8] sm:$0xff] }
  0x2a   :  { %4623 = vst [vmem:[#allocation23_spill] sm:$0xff] %v3342_v44  ;;  %v2828_v49 = vld [vmem:[#allocation2 + $0x64] sm:$0xf]  ;;  %v2460_v51 = vld [vmem:[#allocation2 + $0x70] sm:$0xf0]  ;;  %v3354_v56 = vor.u32 %v2830_v48, %v2458_v47  ;;  %v218_v47 = vmul.f32 0.5, %v214_v39 }
  0x2b   :  { %4624 = vst [vmem:[#allocation24_spill] sm:$0xff] %v3346_v45  ;;  %v2466_v52 = vld [vmem:[#allocation2 + $0x68] sm:$0xf]  ;;  %v2831_v53 = vld [vmem:[#allocation2 + $0x74] sm:$0xf0]  ;;  %405 = vmatpush.bf16.msra.mxu0 %v3342_v44  ;;  %v3358_v57 = vor.u32 %v2828_v49, %v2460_v51  ;;  %v222_v48 = vmul.f32 0.5, %v215_v40 }
  0x2c   :  { %4625 = vst [vmem:[#allocation25_spill] sm:$0xff] %v3348_v46  ;;  %v2829_v54 = vld [vmem:[#allocation2 + $0x6c] sm:$0xf]  ;;  %v2468_v55 = vld [vmem:[#allocation2 + $0x78] sm:$0xf0]  ;;  %418 = vmatpush.bf16.msra.mxu1 %v3346_v45  ;;  %v3360_v58 = vor.u32 %v2831_v53, %v2466_v52  ;;  %v216_v51 = vld [vmem:[%s4442_s0 + $0x10] sm:$0xff]  ;;  %2924 = vtanh.f32 %v218_v47 }
  0x2d   :  { %4626 = vst [vmem:[#allocation26_spill] sm:$0xff] %v3351_v50  ;;  %431 = vmatpush.bf16.msra.mxu2 %v3348_v46  ;;  %v2442_v59 = vld [vmem:[#allocation2 + $0x40] sm:$0xf]  ;;  %v2826_v60 = vld [vmem:[#allocation2 + $0x4c] sm:$0xf0]  ;;  %444 = vmatpush.bf16.msra.mxu3 %v3351_v50  ;;  %v3363_v62 = vor.u32 %v2829_v54, %v2468_v55  ;;  %v217_v52 = vld [vmem:[%s4442_s0 + $0x18] sm:$0xff]  ;;  %2926 = vtanh.f32 %v222_v48 }
  0x2e   :  { %4627 = vst [vmem:[#allocation27_spill] sm:$0xff] %v3354_v56  ;;  %v2824_v61 = vld [vmem:[#allocation2 + $0x44] sm:$0xf]  ;;  %v2444_v63 = vld [vmem:[#allocation2 + $0x50] sm:$0xf0]  ;;  %v3366_v5 = vor.u32 %v2826_v60, %v2442_v59  ;;  %2928 = vtanh.f32 %v216_v51 }
  0x2f   :  { %4628 = vst [vmem:[#allocation28_spill] sm:$0xff] %v3358_v57  ;;  %v2450_v0 = vld [vmem:[#allocation2 + $0x48] sm:$0xf]  ;;  %v2827_v1 = vld [vmem:[#allocation2 + $0x54] sm:$0xf0]  ;;  %406 = vmatpush.bf16.msra.mxu0 %v3354_v56  ;;  %v3370_v9 = vor.u32 %v2824_v61, %v2444_v63 }
  0x30   :  { %4629 = vst [vmem:[#allocation29_spill] sm:$0xff] %v3360_v58  ;;  %v2825_v2 = vld [vmem:[#allocation2 + $0x4c] sm:$0xf]  ;;  %v2452_v4 = vld [vmem:[#allocation2 + $0x58] sm:$0xf0]  ;;  %419 = vmatpush.bf16.msra.mxu1 %v3358_v57  ;;  %v3372_v10 = vor.u32 %v2827_v1, %v2450_v0 }
  0x31   :  { %4630 = vst [vmem:[#allocation30_spill] sm:$0xff] %v3363_v62  ;;  %v2426_v6 = vld [vmem:[#allocation2 + $0x20] sm:$0xf]  ;;  %432 = vmatpush.bf16.msra.mxu2 %v3360_v58  ;;  %v2822_v11 = vld [vmem:[#allocation2 + $0x2c] sm:$0xf0]  ;;  %445 = vmatpush.bf16.msra.mxu3 %v3363_v62  ;;  %v3375_v15 = vor.u32 %v2825_v2, %v2452_v4  ;;  %v227_v4 = vmul.f32 0.5, %v217_v52 }
  0x32   :  { %4631 = vst [vmem:[#allocation31_spill] sm:$0xff] %v3366_v5  ;;  %v2820_v13 = vld [vmem:[#allocation2 + $0x24] sm:$0xf]  ;;  %v2428_v14 = vld [vmem:[#allocation2 + $0x30] sm:$0xf0]  ;;  %v3378_v26 = vor.u32 %v2822_v11, %v2426_v6 }
  0x33   :  { %4632 = vst [vmem:[#allocation32_spill] sm:$0xff] %v3370_v9  ;;  %v2434_v18 = vld [vmem:[#allocation2 + $0x28] sm:$0xf]  ;;  %v2823_v19 = vld [vmem:[#allocation2 + $0x34] sm:$0xf0]  ;;  %407 = vmatpush.bf16.msra.mxu0 %v3366_v5  ;;  %v3382_v32 = vor.u32 %v2820_v13, %v2428_v14  ;;  %2930 = vtanh.f32 %v227_v4 }
  0x34   :  { %4633 = vst [vmem:[#allocation33_spill] sm:$0xff] %v3372_v10  ;;  %v2821_v20 = vld [vmem:[#allocation2 + $0x2c] sm:$0xf]  ;;  %v2436_v22 = vld [vmem:[#allocation2 + $0x38] sm:$0xf0]  ;;  %420 = vmatpush.bf16.msra.mxu1 %v3370_v9  ;;  %v3384_v35 = vor.u32 %v2823_v19, %v2434_v18 }
  0x35   :  { %4634 = vst [vmem:[#allocation34_spill] sm:$0xff] %v3375_v15  ;;  %v2410_v23 = vld [vmem:[#allocation2] sm:$0xf]  ;;  %v2818_v24 = vld [vmem:[#allocation2 + $0xc] sm:$0xf0]  ;;  %433 = vmatpush.bf16.msra.mxu2 %v3372_v10  ;;  %446 = vmatpush.bf16.msra.mxu3 %v3375_v15  ;;  %v3393_v41 = vor.u32 %v2821_v20, %v2436_v22 }
  0x36   :  { %4635 = vst [vmem:[#allocation35_spill] sm:$0xff] %v3378_v26  ;;  %v2816_v27 = vld [vmem:[#allocation2 + $0x4] sm:$0xf]  ;;  %v2412_v28 = vld [vmem:[#allocation2 + $0x10] sm:$0xf0]  ;;  %v3402_v53 = vor.u32 %v2818_v24, %v2410_v23 }
  0x37   :  { %v2418_v30 = vld [vmem:[#allocation2 + $0x8] sm:$0xf]  ;;  %v2819_v31 = vld [vmem:[#allocation2 + $0x14] sm:$0xf0]  ;;  %4636 = vst [vmem:[#allocation36_spill] sm:$0xff] %v3382_v32  ;;  %408 = vmatpush.bf16.msra.mxu0 %v3378_v26  ;;  %v3406_v60 = vor.u32 %v2816_v27, %v2412_v28  ;;  %v2925_v28 = vpop.eup %2924 }
  0x38   :  { %4637 = vst [vmem:[#allocation37_spill] sm:$0xff] %v3384_v35  ;;  %v2817_v36 = vld [vmem:[#allocation2 + $0xc] sm:$0xf]  ;;  %v2420_v37 = vld [vmem:[#allocation2 + $0x18] sm:$0xf0]  ;;  %421 = vmatpush.bf16.msra.mxu1 %v3382_v32  ;;  %v3408_v61 = vor.u32 %v2819_v31, %v2418_v30  ;;  %v220_v39 = vadd.f32 1.0, %v2925_v28 }
  0x39   :  { %4638 = vst [vmem:[#allocation38_spill] sm:$0xff] %v3393_v41  ;;  %v2650_v42 = vld [vmem:[#allocation4 + $0xe0] sm:$0xf]  ;;  %v2878_v43 = vld [vmem:[#allocation4 + $0xec] sm:$0xf0]  ;;  %434 = vmatpush.bf16.msra.mxu2 %v3384_v35  ;;  %447 = vmatpush.bf16.msra.mxu3 %v3393_v41  ;;  %v3411_v1 = vor.u32 %v2817_v36, %v2420_v37  ;;  %v2927_v37 = vpop.eup %2926 }
  0x3a   :  { %v2876_v49 = vld [vmem:[#allocation4 + $0xe4] sm:$0xf]  ;;  %4639 = vst [vmem:[#allocation39_spill] sm:$0xff] %v3402_v53  ;;  %v2652_v54 = vld [vmem:[#allocation4 + $0xf0] sm:$0xf0]  ;;  %v3413_v2 = vor.u32 %v2878_v43, %v2650_v42  ;;  %v2929_v48 = vpop.eup %2928 }
  0x3b   :  { %v2658_v55 = vld [vmem:[#allocation4 + $0xe8] sm:$0xf]  ;;  %v2879_v59 = vld [vmem:[#allocation4 + $0xf4] sm:$0xf0]  ;;  %4640 = vst [vmem:[#allocation40_spill] sm:$0xff] %v3406_v60  ;;  %v3415_v6 = vor.u32 %v2876_v49, %v2652_v54  ;;  %409 = vmatpush.bf16.msra.mxu0 %v3402_v53  ;;  %v224_v49 = vadd.f32 1.0, %v2927_v37 }
  0x3c   :  { %4641 = vst [vmem:[#allocation41_spill] sm:$0xff] %v3408_v61  ;;  %v2877_v63 = vld [vmem:[#allocation4 + $0xec] sm:$0xf]  ;;  %v2660_v0 = vld [vmem:[#allocation4 + $0xf8] sm:$0xf0]  ;;  %v3417_v11 = vor.u32 %v2879_v59, %v2658_v55  ;;  %422 = vmatpush.bf16.msra.mxu1 %v3406_v60  ;;  %v221_v55 = vmul.f32 0.5, %v220_v39 }
  0x3d   :  { %4642 = vst [vmem:[#allocation42_spill] sm:$0xff] %v3411_v1  ;;  %v2634_v13 = vld [vmem:[#allocation4 + $0xc0] sm:$0xf]  ;;  %v2874_v14 = vld [vmem:[#allocation4 + $0xcc] sm:$0xf0]  ;;  %v3420_v19 = vor.u32 %v2877_v63, %v2660_v0  ;;  %435 = vmatpush.bf16.msra.mxu2 %v3408_v61  ;;  %448 = vmatpush.bf16.msra.mxu3 %v3411_v1  ;;  %v225_v0 = vmul.f32 0.5, %v224_v49 }
  0x3e   :  { %4643 = vst [vmem:[#allocation43_spill] sm:$0xff] %v3413_v2  ;;  %v2872_v18 = vld [vmem:[#allocation4 + $0xc4] sm:$0xf]  ;;  %v2636_v20 = vld [vmem:[#allocation4 + $0xd0] sm:$0xf0]  ;;  %v3426_v30 = vor.u32 %v2874_v14, %v2634_v13  ;;  %v232_v14 = vmul.f32 %v2929_v48, %v221_v55 }
  0x3f   :  { %4644 = vst [vmem:[#allocation44_spill] sm:$0xff] %v3415_v6  ;;  %v2642_v22 = vld [vmem:[#allocation4 + $0xc8] sm:$0xf]  ;;  %v2875_v23 = vld [vmem:[#allocation4 + $0xd4] sm:$0xf0]  ;;  %636 = vmatpush.bf16.msrb.mxu0 %v3413_v2  ;;  %v3430_v40 = vor.u32 %v2872_v18, %v2636_v20  ;;  %v231_v28 = vmul.f32 0.0, %v225_v0 }
  0x40   :  { %4645 = vst [vmem:[#allocation45_spill] sm:$0xff] %v3417_v11  ;;  %v2873_v24 = vld [vmem:[#allocation4 + $0xcc] sm:$0xf]  ;;  %v2644_v27 = vld [vmem:[#allocation4 + $0xd8] sm:$0xf0]  ;;  %649 = vmatpush.bf16.msrb.mxu1 %v3415_v6  ;;  %v3432_v42 = vor.u32 %v2875_v23, %v2642_v22 }
  0x41   :  { %4646 = vst [vmem:[#allocation46_spill] sm:$0xff] %v3420_v19  ;;  %v2618_v31 = vld [vmem:[#allocation4 + $0xa0] sm:$0xf]  ;;  %v2870_v36 = vld [vmem:[#allocation4 + $0xac] sm:$0xf0]  ;;  %662 = vmatpush.bf16.msrb.mxu2 %v3417_v11  ;;  %675 = vmatpush.bf16.msrb.mxu3 %v3420_v19  ;;  %v3435_v51 = vor.u32 %v2873_v24, %v2644_v27  ;;  %v2931_v27 = vpop.eup %2930  ;;  %v3449_v49 = vadd.f32 %v232_v14, %v231_v28 }
  0x42   :  { %4647 = vst [vmem:[#allocation47_spill] sm:$0xff] %v3426_v30  ;;  %v2868_v43 = vld [vmem:[#allocation4 + $0xa4] sm:$0xf]  ;;  %v2620_v47 = vld [vmem:[#allocation4 + $0xb0] sm:$0xf0]  ;;  %v3438_v4 = vor.u32 %v2870_v36, %v2618_v31 }
  0x43   :  { %4648 = vst [vmem:[#allocation48_spill] sm:$0xff] %v3430_v40  ;;  %v2626_v52 = vld [vmem:[#allocation4 + $0xa8] sm:$0xf]  ;;  %v2871_v54 = vld [vmem:[#allocation4 + $0xb4] sm:$0xf0]  ;;  %637 = vmatpush.bf16.msrb.mxu0 %v3426_v30  ;;  %v3442_v18 = vor.u32 %v2868_v43, %v2620_v47  ;;  %2932 = vtanh.f32 %v3449_v49 }
  0x44   :  { %4649 = vst [vmem:[#allocation49_spill] sm:$0xff] %v3432_v42  ;;  %v2869_v59 = vld [vmem:[#allocation4 + $0xac] sm:$0xf]  ;;  %v2628_v63 = vld [vmem:[#allocation4 + $0xb8] sm:$0xf0]  ;;  %650 = vmatpush.bf16.msrb.mxu1 %v3430_v40  ;;  %v3444_v20 = vor.u32 %v2871_v54, %v2626_v52  ;;  %v229_v52 = vadd.f32 1.0, %v2931_v27 }
  0x45   :  { %4650 = vst [vmem:[#allocation50_spill] sm:$0xff] %v3435_v51  ;;  %v2602_v13 = vld [vmem:[#allocation4 + $0x80] sm:$0xf]  ;;  %663 = vmatpush.bf16.msrb.mxu2 %v3432_v42  ;;  %v2866_v22 = vld [vmem:[#allocation4 + $0x8c] sm:$0xf0]  ;;  %676 = vmatpush.bf16.msrb.mxu3 %v3435_v51  ;;  %v3447_v37 = vor.u32 %v2869_v59, %v2628_v63 }
  0x46   :  { %4651 = vst [vmem:[#allocation51_spill] sm:$0xff] %v3438_v4  ;;  %v2864_v23 = vld [vmem:[#allocation4 + $0x84] sm:$0xf]  ;;  %v2604_v24 = vld [vmem:[#allocation4 + $0x90] sm:$0xf0]  ;;  %v3452_v43 = vor.u32 %v2866_v22, %v2602_v13 }
  0x47   :  { %4652 = vst [vmem:[#allocation52_spill] sm:$0xff] %v3442_v18  ;;  %v2610_v31 = vld [vmem:[#allocation4 + $0x88] sm:$0xf]  ;;  %v2867_v36 = vld [vmem:[#allocation4 + $0x94] sm:$0xf0]  ;;  %638 = vmatpush.bf16.msrb.mxu0 %v3438_v4  ;;  %v3456_v54 = vor.u32 %v2864_v23, %v2604_v24  ;;  %v230_v23 = vmul.f32 0.5, %v229_v52 }
  0x48   :  { %4653 = vst [vmem:[#allocation53_spill] sm:$0xff] %v3444_v20  ;;  %v2865_v39 = vld [vmem:[#allocation4 + $0x8c] sm:$0xf]  ;;  %v2612_v48 = vld [vmem:[#allocation4 + $0x98] sm:$0xf0]  ;;  %651 = vmatpush.bf16.msrb.mxu1 %v3442_v18  ;;  %v3458_v55 = vor.u32 %v2867_v36, %v2610_v31 }
  0x49   :  { %4654 = vst [vmem:[#allocation54_spill] sm:$0xff] %v3447_v37  ;;  %v2586_v47 = vld [vmem:[#allocation4 + $0x60] sm:$0xf]  ;;  %664 = vmatpush.bf16.msrb.mxu2 %v3444_v20  ;;  %v2862_v59 = vld [vmem:[#allocation4 + $0x6c] sm:$0xf0]  ;;  %677 = vmatpush.bf16.msrb.mxu3 %v3447_v37  ;;  %v3462_v0 = vor.u32 %v2865_v39, %v2612_v48 }
  0x4a   :  { %4655 = vst [vmem:[#allocation55_spill] sm:$0xff] %v3449_v49  ;;  %v2860_v63 = vld [vmem:[#allocation4 + $0x64] sm:$0xf]  ;;  %v2588_v13 = vld [vmem:[#allocation4 + $0x70] sm:$0xf0]  ;;  %v3465_v20 = vor.u32 %v2862_v59, %v2586_v47 }
  0x4b   :  { %4656 = vst [vmem:[#allocation56_spill] sm:$0xff] %v3452_v43  ;;  %v2594_v14 = vld [vmem:[#allocation4 + $0x68] sm:$0xf]  ;;  %v2863_v22 = vld [vmem:[#allocation4 + $0x74] sm:$0xf0]  ;;  %639 = vmatpush.bf16.msrb.mxu0 %v3452_v43  ;;  %v3469_v24 = vor.u32 %v2860_v63, %v2588_v13  ;;  %v2933_v43 = vpop.eup %2932 }
  0x4c   :  { %4657 = vst [vmem:[#allocation57_spill] sm:$0xff] %v3456_v54  ;;  %v2861_v27 = vld [vmem:[#allocation4 + $0x6c] sm:$0xf]  ;;  %v2596_v28 = vld [vmem:[#allocation4 + $0x78] sm:$0xf0]  ;;  %652 = vmatpush.bf16.msrb.mxu1 %v3456_v54  ;;  %v3471_v31 = vor.u32 %v2863_v22, %v2594_v14  ;;  %v235_v63 = vmul.f32 %v2933_v43, %v230_v23 }
  0x4d   :  { %4658 = vst [vmem:[#allocation58_spill] sm:$0xff] %v3458_v55  ;;  %665 = vmatpush.bf16.msrb.mxu2 %v3458_v55  ;;  %v2570_v36 = vld [vmem:[#allocation4 + $0x40] sm:$0xf]  ;;  %v2858_v39 = vld [vmem:[#allocation4 + $0x4c] sm:$0xf0]  ;;  %678 = vmatpush.bf16.msrb.mxu3 %v3462_v0  ;;  %v3474_v48 = vor.u32 %v2861_v27, %v2596_v28 }
  0x4e   :  { %4659 = vst [vmem:[#allocation59_spill] sm:$0xff] %v3462_v0  ;;  %v2856_v49 = vld [vmem:[#allocation4 + $0x44] sm:$0xf]  ;;  %v2572_v37 = vld [vmem:[#allocation4 + $0x50] sm:$0xf0]  ;;  %v3477_v47 = vor.u32 %v2858_v39, %v2570_v36  ;;  %v3482_v27 = vpack.c.bf16 %v235_v63, %v235_v63 }
  0x4f   :  { %4660 = vst [vmem:[#allocation60_spill] sm:$0xff] %v3465_v20  ;;  %640 = vmatpush.bf16.msrb.mxu0 %v3465_v20  ;;  %v2578_v52 = vld [vmem:[#allocation4 + $0x48] sm:$0xf]  ;;  %v2859_v59 = vld [vmem:[#allocation4 + $0x54] sm:$0xf0]  ;;  %v3484_v28 = vor.u32 %v2856_v49, %v2572_v37 }
  0x50   :  { %4661 = vst [vmem:[#allocation61_spill] sm:$0xff] %v3469_v24  ;;  %v2857_v55 = vld [vmem:[#allocation4 + $0x4c] sm:$0xf]  ;;  %653 = vmatpush.bf16.msrb.mxu1 %v3469_v24  ;;  %v2580_v13 = vld [vmem:[#allocation4 + $0x58] sm:$0xf0]  ;;  %v3486_v20 = vor.u32 %v2859_v59, %v2578_v52  ;;  %410 = vmatmul.bf16.vlgmr.msra.gmra.mxu0 %v3482_v27 }
  0x51   :  { %4662 = vst [vmem:[#allocation62_spill] sm:$0xff] %v3471_v31  ;;  %666 = vmatpush.bf16.msrb.mxu2 %v3471_v31  ;;  %v2554_v14 = vld [vmem:[#allocation4 + $0x20] sm:$0xf]  ;;  %v2854_v22 = vld [vmem:[#allocation4 + $0x2c] sm:$0xf0]  ;;  %679 = vmatpush.bf16.msrb.mxu3 %v3474_v48  ;;  %v3489_v43 = vor.u32 %v2857_v55, %v2580_v13 }
  0x52   :  { %4663 = vst [vmem:[#allocation63_spill] sm:$0xff] %v3474_v48  ;;  %v2852_v36 = vld [vmem:[#allocation4 + $0x24] sm:$0xf]  ;;  %v2556_v39 = vld [vmem:[#allocation4 + $0x30] sm:$0xf0]  ;;  %v3491_v23 = vor.u32 %v2854_v22, %v2554_v14  ;;  %423 = vmatmul.bf16.vlgmr.msra.gmra.mxu1 %v3482_v27  ;;  %436 = vmatmul.bf16.vlgmr.msra.gmra.mxu2 %v3482_v27 }
  0x53   :  { %4664 = vst [vmem:[#allocation64_spill] sm:$0xff] %v3477_v47  ;;  %641 = vmatpush.bf16.msrb.mxu0 %v3477_v47  ;;  %v2562_v31 = vld [vmem:[#allocation4 + $0x28] sm:$0xf]  ;;  %v2855_v24 = vld [vmem:[#allocation4 + $0x34] sm:$0xf0]  ;;  %449 = vmatmul.bf16.vlgmr.msra.gmra.mxu3 %v3482_v27  ;;  %v3499_v55 = vor.u32 %v2852_v36, %v2556_v39 }
  0x54   :  { %4665 = vst [vmem:[#allocation65_spill] sm:$0xff] %v3484_v28  ;;  %v2853_v0 = vld [vmem:[#allocation4 + $0x2c] sm:$0xf]  ;;  %v2564_v63 = vld [vmem:[#allocation4 + $0x38] sm:$0xf0]  ;;  %654 = vmatpush.bf16.msrb.mxu1 %v3484_v28  ;;  %v3501_v13 = vor.u32 %v2855_v24, %v2562_v31 }
  0x55   :  { %4666 = vst [vmem:[#allocation66_spill] sm:$0xff] %v3486_v20  ;;  %v2538_v37 = vld [vmem:[#allocation4] sm:$0xf]  ;;  %v2850_v49 = vld [vmem:[#allocation4 + $0xc] sm:$0xf0]  ;;  %667 = vmatpush.bf16.msrb.mxu2 %v3486_v20  ;;  %680 = vmatpush.bf16.msrb.mxu3 %v3489_v43  ;;  %v3505_v48 = vor.u32 %v2853_v0, %v2564_v63 }
  0x56   :  { %4667 = vst [vmem:[#allocation67_spill] sm:$0xff] %v3489_v43  ;;  %v2778_v52 = vld [vmem:[#allocation6 + $0xe0] sm:$0xf]  ;;  %v2910_v59 = vld [vmem:[#allocation6 + $0xec] sm:$0xf0]  ;;  %v3507_v54 = vor.u32 %v2850_v49, %v2538_v37 }
  0x57   :  { %4668 = vst [vmem:[#allocation68_spill] sm:$0xff] %v3491_v23  ;;  %v2848_v14 = vld [vmem:[#allocation4 + $0x4] sm:$0xf]  ;;  %v2540_v22 = vld [vmem:[#allocation4 + $0x10] sm:$0xf0]  ;;  %642 = vmatpush.bf16.msrb.mxu0 %v3491_v23  ;;  %v3509_v51 = vor.u32 %v2910_v59, %v2778_v52 }
  0x58   :  { %4669 = vst [vmem:[#allocation69_spill] sm:$0xff] %v3499_v55  ;;  %v2546_v47 = vld [vmem:[#allocation4 + $0x8] sm:$0xf]  ;;  %v2851_v18 = vld [vmem:[#allocation4 + $0x14] sm:$0xf0]  ;;  %655 = vmatpush.bf16.msrb.mxu1 %v3499_v55  ;;  %v3513_v23 = vor.u32 %v2848_v14, %v2540_v22 }
  0x59   :  { %4670 = vst [vmem:[#allocation70_spill] sm:$0xff] %v3501_v13  ;;  %v2849_v4 = vld [vmem:[#allocation4 + $0xc] sm:$0xf]  ;;  %v2548_v28 = vld [vmem:[#allocation4 + $0x18] sm:$0xf0]  ;;  %668 = vmatpush.bf16.msrb.mxu2 %v3501_v13  ;;  %v3515_v0 = vor.u32 %v2851_v18, %v2546_v47  ;;  %681 = vmatpush.bf16.msrb.mxu3 %v3505_v48 }
  0x5a   :  { %4671 = vst [vmem:[#allocation71_spill] sm:$0xff] %v3505_v48  ;;  %v2908_v36 = vld [vmem:[#allocation6 + $0xe4] sm:$0xf]  ;;  %v2780_v39 = vld [vmem:[#allocation6 + $0xf0] sm:$0xf0]  ;;  %v3519_v49 = vor.u32 %v2849_v4, %v2548_v28 }
  0x5b   :  { %4672 = vst [vmem:[#allocation72_spill] sm:$0xff] %v3507_v54  ;;  %v2786_v24 = vld [vmem:[#allocation6 + $0xe8] sm:$0xf]  ;;  %v2911_v31 = vld [vmem:[#allocation6 + $0xf4] sm:$0xf0]  ;;  %643 = vmatpush.bf16.msrb.mxu0 %v3507_v54  ;;  %v3521_v52 = vor.u32 %v2908_v36, %v2780_v39 }
  0x5c   :  { %v2909_v20 = vld [vmem:[#allocation6 + $0xec] sm:$0xf]  ;;  %v2788_v42 = vld [vmem:[#allocation6 + $0xf8] sm:$0xf0]  ;;  %4673 = vst [vmem:[#allocation73_spill] sm:$0xff] %v3513_v23  ;;  %v3524_v59 = vor.u32 %v2911_v31, %v2786_v24  ;;  %656 = vmatpush.bf16.msrb.mxu1 %v3513_v23 }
  0x5d   :  { %4674 = vst [vmem:[#allocation74_spill] sm:$0xff] %v3515_v0  ;;  %v2762_v63 = vld [vmem:[#allocation6 + $0xc0] sm:$0xf]  ;;  %v2906_v37 = vld [vmem:[#allocation6 + $0xcc] sm:$0xf0]  ;;  %v3526_v55 = vor.u32 %v2909_v20, %v2788_v42  ;;  %669 = vmatpush.bf16.msrb.mxu2 %v3515_v0  ;;  %682 = vmatpush.bf16.msrb.mxu3 %v3519_v49 }
  0x5e   :  { %4675 = vst [vmem:[#allocation75_spill] sm:$0xff] %v3519_v49  ;;  %v2904_v14 = vld [vmem:[#allocation6 + $0xc4] sm:$0xf]  ;;  %v2764_v22 = vld [vmem:[#allocation6 + $0xd0] sm:$0xf0]  ;;  %v3528_v47 = vor.u32 %v2906_v37, %v2762_v63 }
  0x5f   :  { %4676 = vst [vmem:[#allocation76_spill] sm:$0xff] %v3521_v52  ;;  %861 = vmatpush.bf16.msra.mxu0 %v3509_v51  ;;  %v2770_v18 = vld [vmem:[#allocation6 + $0xc8] sm:$0xf]  ;;  %v2907_v13 = vld [vmem:[#allocation6 + $0xd4] sm:$0xf0]  ;;  %v3534_v4 = vor.u32 %v2904_v14, %v2764_v22 }
  0x60   :  { %4677 = vst [vmem:[#allocation77_spill] sm:$0xff] %v3524_v59  ;;  %v2905_v43 = vld [vmem:[#allocation6 + $0xcc] sm:$0xf]  ;;  %v2772_v48 = vld [vmem:[#allocation6 + $0xd8] sm:$0xf0]  ;;  %874 = vmatpush.bf16.msra.mxu1 %v3521_v52  ;;  %v3538_v28 = vor.u32 %v2907_v13, %v2770_v18  ;;  %644 = vmatmul.bf16.vlgmr.msrb.gmra.mxu0 %v3482_v27 }
  0x61   :  { %4678 = vst [vmem:[#allocation78_spill] sm:$0xff] %v3526_v55  ;;  %v2746_v42 = vld [vmem:[#allocation6 + $0xa0] sm:$0xf]  ;;  %v2902_v20 = vld [vmem:[#allocation6 + $0xac] sm:$0xf0]  ;;  %887 = vmatpush.bf16.msra.mxu2 %v3524_v59  ;;  %900 = vmatpush.bf16.msra.mxu3 %v3526_v55  ;;  %v3540_v36 = vor.u32 %v2905_v43, %v2772_v48 }
  0x62   :  { %4679 = vst [vmem:[#allocation79_spill] sm:$0xff] %v3528_v47  ;;  %v2900_v39 = vld [vmem:[#allocation6 + $0xa4] sm:$0xf]  ;;  %v2748_v24 = vld [vmem:[#allocation6 + $0xb0] sm:$0xf0]  ;;  %v3543_v14 = vor.u32 %v2902_v20, %v2746_v42  ;;  %657 = vmatmul.bf16.vlgmr.msrb.gmra.mxu1 %v3482_v27  ;;  %670 = vmatmul.bf16.vlgmr.msrb.gmra.mxu2 %v3482_v27 }
  0x63   :  { %4680 = vst [vmem:[#allocation80_spill] sm:$0xff] %v3534_v4  ;;  %v2754_v31 = vld [vmem:[#allocation6 + $0xa8] sm:$0xf]  ;;  %862 = vmatpush.bf16.msra.mxu0 %v3528_v47  ;;  %v2903_v63 = vld [vmem:[#allocation6 + $0xb4] sm:$0xf0]  ;;  %v3546_v22 = vor.u32 %v2900_v39, %v2748_v24  ;;  %683 = vmatmul.bf16.vlgmr.msrb.gmra.mxu3 %v3482_v27 }
  0x64   :  { %4681 = vst [vmem:[#allocation81_spill] sm:$0xff] %v3538_v28  ;;  %v2901_v37 = vld [vmem:[#allocation6 + $0xac] sm:$0xf]  ;;  %v2756_v52 = vld [vmem:[#allocation6 + $0xb8] sm:$0xf0]  ;;  %875 = vmatpush.bf16.msra.mxu1 %v3534_v4  ;;  %v3550_v48 = vor.u32 %v2903_v63, %v2754_v31 }
  0x65   :  { %4682 = vst [vmem:[#allocation82_spill] sm:$0xff] %v3540_v36  ;;  %v2730_v59 = vld [vmem:[#allocation6 + $0x80] sm:$0xf]  ;;  %v2898_v55 = vld [vmem:[#allocation6 + $0x8c] sm:$0xf0]  ;;  %888 = vmatpush.bf16.msra.mxu2 %v3538_v28  ;;  %901 = vmatpush.bf16.msra.mxu3 %v3540_v36  ;;  %v3552_v43 = vor.u32 %v2901_v37, %v2756_v52 }
  0x66   :  { %4683 = vst [vmem:[#allocation83_spill] sm:$0xff] %v3543_v14  ;;  %v2896_v13 = vld [vmem:[#allocation6 + $0x84] sm:$0xf]  ;;  %v2732_v18 = vld [vmem:[#allocation6 + $0x90] sm:$0xf0]  ;;  %v3558_v24 = vor.u32 %v2898_v55, %v2730_v59 }
  0x67   :  { %4684 = vst [vmem:[#allocation84_spill] sm:$0xff] %v3546_v22  ;;  %v2738_v47 = vld [vmem:[#allocation6 + $0x88] sm:$0xf]  ;;  %v2899_v42 = vld [vmem:[#allocation6 + $0x94] sm:$0xf0]  ;;  %863 = vmatpush.bf16.msra.mxu0 %v3543_v14  ;;  %v3562_v52 = vor.u32 %v2896_v13, %v2732_v18 }
  0x68   :  { %4685 = vst [vmem:[#allocation85_spill] sm:$0xff] %v3550_v48  ;;  %v2897_v20 = vld [vmem:[#allocation6 + $0x8c] sm:$0xf]  ;;  %v2740_v39 = vld [vmem:[#allocation6 + $0x98] sm:$0xf0]  ;;  %876 = vmatpush.bf16.msra.mxu1 %v3546_v22  ;;  %v3566_v37 = vor.u32 %v2899_v42, %v2738_v47 }
  0x69   :  { %4686 = vst [vmem:[#allocation86_spill] sm:$0xff] %v3552_v43  ;;  %v2714_v31 = vld [vmem:[#allocation6 + $0x60] sm:$0xf]  ;;  %v2894_v63 = vld [vmem:[#allocation6 + $0x6c] sm:$0xf0]  ;;  %889 = vmatpush.bf16.msra.mxu2 %v3550_v48  ;;  %902 = vmatpush.bf16.msra.mxu3 %v3552_v43  ;;  %v3568_v36 = vor.u32 %v2897_v20, %v2740_v39 }
  0x6a   :  { %4687 = vst [vmem:[#allocation87_spill] sm:$0xff] %v3558_v24  ;;  %v2892_v28 = vld [vmem:[#allocation6 + $0x64] sm:$0xf]  ;;  %v2716_v14 = vld [vmem:[#allocation6 + $0x70] sm:$0xf0]  ;;  %v3571_v27 = vor.u32 %v2894_v63, %v2714_v31 }
  0x6b   :  { %4688 = vst [vmem:[#allocation88_spill] sm:$0xff] %v3562_v52  ;;  %v2722_v55 = vld [vmem:[#allocation6 + $0x68] sm:$0xf]  ;;  %v2895_v59 = vld [vmem:[#allocation6 + $0x74] sm:$0xf0]  ;;  %864 = vmatpush.bf16.msra.mxu0 %v3558_v24  ;;  %v3574_v13 = vor.u32 %v2892_v28, %v2716_v14 }
  0x6c   :  { %4689 = vst [vmem:[#allocation89_spill] sm:$0xff] %v3566_v37  ;;  %v2893_v4 = vld [vmem:[#allocation6 + $0x6c] sm:$0xf]  ;;  %v2724_v22 = vld [vmem:[#allocation6 + $0x78] sm:$0xf0]  ;;  %877 = vmatpush.bf16.msra.mxu1 %v3562_v52  ;;  %v3578_v47 = vor.u32 %v2895_v59, %v2722_v55 }
  0x6d   :  { %4690 = vst [vmem:[#allocation90_spill] sm:$0xff] %v3568_v36  ;;  %v2698_v18 = vld [vmem:[#allocation6 + $0x40] sm:$0xf]  ;;  %v2890_v43 = vld [vmem:[#allocation6 + $0x4c] sm:$0xf0]  ;;  %890 = vmatpush.bf16.msra.mxu2 %v3566_v37  ;;  %903 = vmatpush.bf16.msra.mxu3 %v3568_v36  ;;  %v3580_v42 = vor.u32 %v2893_v4, %v2724_v22 }
  0x6e   :  { %4691 = vst [vmem:[#allocation91_spill] sm:$0xff] %v3571_v27  ;;  %v2888_v20 = vld [vmem:[#allocation6 + $0x44] sm:$0xf]  ;;  %v2700_v39 = vld [vmem:[#allocation6 + $0x50] sm:$0xf0]  ;;  %v3583_v28 = vor.u32 %v2890_v43, %v2698_v18 }
  0x6f   :  { %4692 = vst [vmem:[#allocation92_spill] sm:$0xff] %v3574_v13  ;;  %v2706_v48 = vld [vmem:[#allocation6 + $0x48] sm:$0xf]  ;;  %v2891_v24 = vld [vmem:[#allocation6 + $0x54] sm:$0xf0]  ;;  %865 = vmatpush.bf16.msra.mxu0 %v3571_v27  ;;  %v3586_v14 = vor.u32 %v2888_v20, %v2700_v39 }
  0x70   :  { %4693 = vst [vmem:[#allocation93_spill] sm:$0xff] %v3578_v47  ;;  %v2889_v31 = vld [vmem:[#allocation6 + $0x4c] sm:$0xf]  ;;  %v2708_v63 = vld [vmem:[#allocation6 + $0x58] sm:$0xf0]  ;;  %878 = vmatpush.bf16.msra.mxu1 %v3574_v13  ;;  %v3590_v4 = vor.u32 %v2891_v24, %v2706_v48 }
  0x71   :  { %4694 = vst [vmem:[#allocation94_spill] sm:$0xff] %v3580_v42  ;;  %v2682_v37 = vld [vmem:[#allocation6 + $0x20] sm:$0xf]  ;;  %v2886_v36 = vld [vmem:[#allocation6 + $0x2c] sm:$0xf0]  ;;  %891 = vmatpush.bf16.msra.mxu2 %v3578_v47  ;;  %904 = vmatpush.bf16.msra.mxu3 %v3580_v42  ;;  %v3592_v22 = vor.u32 %v2889_v31, %v2708_v63 }
  0x72   :  { %4695 = vst [vmem:[#allocation95_spill] sm:$0xff] %v3583_v28  ;;  %v2884_v55 = vld [vmem:[#allocation6 + $0x24] sm:$0xf]  ;;  %v2684_v59 = vld [vmem:[#allocation6 + $0x30] sm:$0xf0]  ;;  %v3595_v20 = vor.u32 %v2886_v36, %v2682_v37 }
  0x73   :  { %v2690_v52 = vld [vmem:[#allocation6 + $0x28] sm:$0xf]  ;;  %v2887_v27 = vld [vmem:[#allocation6 + $0x34] sm:$0xf0]  ;;  %v2885_v43 = vld [vmem:[#allocation6 + $0x2c] sm:$0xf]  ;;  %866 = vmatpush.bf16.msra.mxu0 %v3583_v28  ;;  %v3598_v39 = vor.u32 %v2884_v55, %v2684_v59 }
  0x74   :  { %v2692_v18 = vld [vmem:[#allocation6 + $0x38] sm:$0xf0]  ;;  %879 = vmatpush.bf16.msra.mxu1 %v3586_v14  ;;  %v2666_v47 = vld [vmem:[#allocation6] sm:$0xf]  ;;  %v2882_v42 = vld [vmem:[#allocation6 + $0xc] sm:$0xf0]  ;;  %v3602_v48 = vor.u32 %v2887_v27, %v2690_v52 }
  0x75   :  { %892 = vmatpush.bf16.msra.mxu2 %v3590_v4  ;;  %905 = vmatpush.bf16.msra.mxu3 %v3592_v22  ;;  %v3604_v24 = vor.u32 %v2885_v43, %v2692_v18  ;;  %v2880_v31 = vld [vmem:[#allocation6 + $0x4] sm:$0xf]  ;;  %v2668_v63 = vld [vmem:[#allocation6 + $0x10] sm:$0xf0]  ;;  %v2674_v13 = vld [vmem:[#allocation6 + $0x8] sm:$0xf]  ;;  %v3607_v55 = vor.u32 %v2882_v42, %v2666_v47 }
  0x76   :  { %v2883_v28 = vld [vmem:[#allocation6 + $0x14] sm:$0xf0]  ;;  %v2881_v36 = vld [vmem:[#allocation6 + $0xc] sm:$0xf]  ;;  %v2676_v37 = vld [vmem:[#allocation6 + $0x18] sm:$0xf0]  ;;  %v3610_v59 = vor.u32 %v2880_v31, %v2668_v63 }
  0x77   :  { %867 = vmatpush.bf16.msra.mxu0 %v3595_v20  ;;  %v3614_v52 = vor.u32 %v2883_v28, %v2674_v13  ;;  %v3616_v27 = vor.u32 %v2881_v36, %v2676_v37  ;;  %v3250_v47 = vmov 0   ;;  %v4696_v13 = vld [vmem:[#allocation49_spill] sm:$0xff]  ;;  %v4697_v42 = vld [vmem:[#allocation50_spill] sm:$0xff]  ;;  %v4698_v28 = vld [vmem:[#allocation51_spill] sm:$0xff] }
  0x78   :  { %880 = vmatpush.bf16.msra.mxu1 %v3598_v39  ;;  %v4699_v43 = vld [vmem:[#allocation52_spill] sm:$0xff]  ;;  %v4700_v18 = vld [vmem:[#allocation53_spill] sm:$0xff]  ;;  %v4701_v31 = vld [vmem:[#allocation54_spill] sm:$0xff] }
  0x79   :  { %893 = vmatpush.bf16.msra.mxu2 %v3602_v48  ;;  %906 = vmatpush.bf16.msra.mxu3 %v3604_v24  ;;  %v4702_v63 = vld [vmem:[#allocation56_spill] sm:$0xff]  ;;  %v4703_v36 = vld [vmem:[#allocation57_spill] sm:$0xff]  ;;  %v4704_v37 = vld [vmem:[#allocation58_spill] sm:$0xff] }
  0x7b   :  { %868 = vmatpush.bf16.msra.mxu0 %v3607_v55 }
  0x7c   :  { %881 = vmatpush.bf16.msra.mxu1 %v3610_v59 }
  0x7d   :  { %894 = vmatpush.bf16.msra.mxu2 %v3614_v52  ;;  %907 = vmatpush.bf16.msra.mxu3 %v3616_v27 }
  0x7e   :  { %869 = vmatmul.bf16.vlgmr.msra.gmra.mxu0 %v3250_v47 }
  0x7f   :  { %942 = vmatpush.bf16.msrb.mxu0 %v3309_v3  ;;  %882 = vmatmul.bf16.vlgmr.msra.gmra.mxu1 %v3250_v47 }
  0x80   :  { %955 = vmatpush.bf16.msrb.mxu1 %v3311_v7  ;;  %895 = vmatmul.bf16.vlgmr.msra.gmra.mxu2 %v3250_v47 }
  0x81   :  { %968 = vmatpush.bf16.msrb.mxu2 %v3313_v8  ;;  %908 = vmatmul.bf16.vlgmr.msra.gmra.mxu3 %v3250_v47  ;;  %v4705_v47 = vld [vmem:[#allocation59_spill] sm:$0xff] }
  0x82   :  { %981 = vmatpush.bf16.msrb.mxu3 %v3316_v12 }
  0x83   :  { %943 = vmatpush.bf16.msrb.mxu0 %v3320_v16 }
  0x84   :  { %956 = vmatpush.bf16.msrb.mxu1 %v3322_v17 }
  0x85   :  { %969 = vmatpush.bf16.msrb.mxu2 %v3325_v21 }
  0x86   :  { %982 = vmatpush.bf16.msrb.mxu3 %v3327_v25 }
  0x87   :  { %944 = vmatpush.bf16.msrb.mxu0 %v3330_v29 }
  0x88   :  { %957 = vmatpush.bf16.msrb.mxu1 %v3334_v33 }
  0x89   :  { %970 = vmatpush.bf16.msrb.mxu2 %v3336_v34 }
  0x8a   :  { %983 = vmatpush.bf16.msrb.mxu3 %v3339_v38 }
  0x8b   :  { %945 = vmatpush.bf16.msrb.mxu0 %v3342_v44 }
  0x8c   :  { %958 = vmatpush.bf16.msrb.mxu1 %v3346_v45 }
  0x8d   :  { %971 = vmatpush.bf16.msrb.mxu2 %v3348_v46 }
  0x8e   :  { %984 = vmatpush.bf16.msrb.mxu3 %v3351_v50 }
  0x8f   :  { %946 = vmatpush.bf16.msrb.mxu0 %v3354_v56 }
  0x90   :  { %959 = vmatpush.bf16.msrb.mxu1 %v3358_v57 }
  0x91   :  { %972 = vmatpush.bf16.msrb.mxu2 %v3360_v58 }
  0x92   :  { %985 = vmatpush.bf16.msrb.mxu3 %v3363_v62 }
  0x93   :  { %947 = vmatpush.bf16.msrb.mxu0 %v3366_v5 }
  0x94   :  { %960 = vmatpush.bf16.msrb.mxu1 %v3370_v9 }
  0x95   :  { %973 = vmatpush.bf16.msrb.mxu2 %v3372_v10 }
  0x96   :  { %986 = vmatpush.bf16.msrb.mxu3 %v3375_v15 }
  0x97   :  { %948 = vmatpush.bf16.msrb.mxu0 %v3378_v26 }
  0x98   :  { %961 = vmatpush.bf16.msrb.mxu1 %v3382_v32 }
  0x99   :  { %974 = vmatpush.bf16.msrb.mxu2 %v3384_v35 }
  0x9a   :  { %987 = vmatpush.bf16.msrb.mxu3 %v3393_v41 }
  0x9b   :  { %949 = vmatpush.bf16.msrb.mxu0 %v3402_v53 }
  0x9c   :  { %962 = vmatpush.bf16.msrb.mxu1 %v3406_v60 }
  0x9d   :  { %975 = vmatpush.bf16.msrb.mxu2 %v3408_v61 }
  0x9e   :  { %988 = vmatpush.bf16.msrb.mxu3 %v3411_v1 }
  0x9f   :  { %1016 = vmatpush.bf16.msra.mxu0 %v3413_v2  ;;  %v4718_v2 = vld [vmem:[#allocation55_spill] sm:$0xff] }
  0xa0   :  { %1029 = vmatpush.bf16.msra.mxu1 %v3415_v6 }
  0xa1   :  { %1042 = vmatpush.bf16.msra.mxu2 %v3417_v11 }
  0xa2   :  { %1055 = vmatpush.bf16.msra.mxu3 %v3420_v19 }
  0xa3   :  { %1017 = vmatpush.bf16.msra.mxu0 %v3426_v30 }
  0xa4   :  { %1030 = vmatpush.bf16.msra.mxu1 %v3430_v40  ;;  %v4706_v40 = vld [vmem:[#allocation60_spill] sm:$0xff] }
  0xa5   :  { %1043 = vmatpush.bf16.msra.mxu2 %v4696_v13  ;;  %v4707_v13 = vld [vmem:[#allocation61_spill] sm:$0xff] }
  0xa6   :  { %1056 = vmatpush.bf16.msra.mxu3 %v4697_v42  ;;  %v4708_v42 = vld [vmem:[#allocation62_spill] sm:$0xff] }
  0xa7   :  { %1018 = vmatpush.bf16.msra.mxu0 %v4698_v28  ;;  %v4709_v28 = vld [vmem:[#allocation63_spill] sm:$0xff] }
  0xa8   :  { %1031 = vmatpush.bf16.msra.mxu1 %v4699_v43  ;;  %v4710_v43 = vld [vmem:[#allocation64_spill] sm:$0xff] }
  0xa9   :  { %1044 = vmatpush.bf16.msra.mxu2 %v4700_v18  ;;  %v4711_v18 = vld [vmem:[#allocation65_spill] sm:$0xff] }
  0xaa   :  { %1057 = vmatpush.bf16.msra.mxu3 %v4701_v31  ;;  %v4712_v31 = vld [vmem:[#allocation66_spill] sm:$0xff] }
  0xab   :  { %1019 = vmatpush.bf16.msra.mxu0 %v4702_v63  ;;  %v4713_v63 = vld [vmem:[#allocation67_spill] sm:$0xff] }
  0xac   :  { %1032 = vmatpush.bf16.msra.mxu1 %v4703_v36  ;;  %v4714_v36 = vld [vmem:[#allocation68_spill] sm:$0xff] }
  0xad   :  { %1045 = vmatpush.bf16.msra.mxu2 %v4704_v37  ;;  %v4715_v37 = vld [vmem:[#allocation69_spill] sm:$0xff] }
  0xae   :  { %1058 = vmatpush.bf16.msra.mxu3 %v4705_v47  ;;  %v4716_v47 = vld [vmem:[#allocation70_spill] sm:$0xff] }
  0xaf   :  { %1020 = vmatpush.bf16.msra.mxu0 %v4706_v40  ;;  %v4717_v40 = vld [vmem:[#allocation71_spill] sm:$0xff] }
  0xb0   :  { %1033 = vmatpush.bf16.msra.mxu1 %v4707_v13 }
  0xb1   :  { %1046 = vmatpush.bf16.msra.mxu2 %v4708_v42 }
  0xb2   :  { %1059 = vmatpush.bf16.msra.mxu3 %v4709_v28 }
  0xb3   :  { %1021 = vmatpush.bf16.msra.mxu0 %v4710_v43 }
  0xb4   :  { %1034 = vmatpush.bf16.msra.mxu1 %v4711_v18 }
  0xb5   :  { %1047 = vmatpush.bf16.msra.mxu2 %v4712_v31 }
  0xb6   :  { %1060 = vmatpush.bf16.msra.mxu3 %v4713_v63  ;;  %v2404_v63 = vld [vmem:[%s4442_s0 + $0x20] sm:$0xff] }
  0xb7   :  { %1022 = vmatpush.bf16.msra.mxu0 %v4714_v36 }
  0xb8   :  { %1035 = vmatpush.bf16.msra.mxu1 %v4715_v37  ;;  %v2405_v37 = vld [vmem:[%s4442_s0 + $0x28] sm:$0xff] }
  0xb9   :  { %1048 = vmatpush.bf16.msra.mxu2 %v4716_v47 }
  0xba   :  { %1061 = vmatpush.bf16.msra.mxu3 %v4717_v40 }
  0xbb   :  { %1023 = vmatpush.bf16.msra.mxu0 %v3507_v54 }
  0xbc   :  { %1036 = vmatpush.bf16.msra.mxu1 %v3513_v23 }
  0xbd   :  { %1049 = vmatpush.bf16.msra.mxu2 %v3515_v0  ;;  %v2406_v0 = vld [vmem:[%s4442_s0 + $0x30] sm:$0xff] }
  0xbe   :  { %1062 = vmatpush.bf16.msra.mxu3 %v3519_v49  ;;  %v2407_v49 = vld [vmem:[%s4442_s0 + $0x38] sm:$0xff] }
  0xcd   :  { %v411_v36 = vpop.f32.mrf.mxu0 }
  0xce   :  { %v454_v31 = vadd.f32 %v2404_v63, %v411_v36 }
  0xcf   :  { %v424_v47 = vpop.f32.mrf.mxu1 }
  0xd0   :  { %v455_v40 = vadd.f32 %v2405_v37, %v424_v47  ;;  %v458_v18 = vmul.f32 0.5, %v454_v31 }
  0xd2   :  { %v462_v54 = vmul.f32 0.5, %v455_v40  ;;  %2934 = vtanh.f32 %v458_v18 }
  0xd4   :  { %2936 = vtanh.f32 %v462_v54 }
  0xd5   :  { %v437_v23 = vpop.f32.mrf.mxu2  ;;  %v413_v13 = vpop.f32.mrf.mxu0 }
  0xd6   :  { %v450_v43 = vpop.f32.mrf.mxu3  ;;  %v456_v28 = vadd.f32 %v2406_v0, %v437_v23 }
  0xd7   :  { %v457_v42 = vadd.f32 %v2407_v49, %v450_v43  ;;  %v426_v30 = vpop.f32.mrf.mxu1 }
  0xd8   :  { %2938 = vtanh.f32 %v456_v28  ;;  %v2935_v31 = vpop.eup %2934 }
  0xd9   :  { %v467_v63 = vmul.f32 0.5, %v457_v42  ;;  %v460_v18 = vadd.f32 1.0, %v2935_v31 }
  0xda   :  { %v2937_v40 = vpop.eup %2936 }
  0xdb   :  { %2940 = vtanh.f32 %v467_v63  ;;  %v464_v36 = vadd.f32 1.0, %v2937_v40  ;;  %v461_v37 = vmul.f32 0.5, %v460_v18  ;;  %v4720_v18 = vld [vmem:[#allocation77_spill] sm:$0xff] }
  0xdd   :  { %v465_v47 = vmul.f32 0.5, %v464_v36  ;;  %v439_v19 = vpop.f32.mrf.mxu2  ;;  %v645_v61 = vpop.f32.mrf.mxu0  ;;  %v4721_v36 = vld [vmem:[#allocation78_spill] sm:$0xff] }
  0xde   :  { %v452_v11 = vpop.f32.mrf.mxu3  ;;  %v2939_v6 = vpop.eup %2938 }
  0xdf   :  { %v471_v54 = vmul.f32 %v465_v47, %v4718_v2  ;;  %v472_v1 = vmul.f32 %v2939_v6, %v461_v37  ;;  %v658_v23 = vpop.f32.mrf.mxu1  ;;  %v213_v6 = vld [vmem:[#allocation7] sm:$0xf] }
  0xe0   :  { %v3706_v37 = vperm.slane %v213_v6, 0  ;;  %v3708_v47 = vperm.slane %v213_v6, 1 }
  0xe1   :  { %v2941_v0 = vpop.eup %2940  ;;  %v3699_v49 = vadd.f32 %v472_v1, %v471_v54  ;;  %v4719_v1 = vld [vmem:[#allocation76_spill] sm:$0xff]  ;;  %v4723_v54 = vld [vmem:[#allocation79_spill] sm:$0xff] }
  0xe2   :  { %v469_v30 = vadd.f32 1.0, %v2941_v0  ;;  %4722 = vst [vmem:[#allocation55_spill] sm:$0xff] %v3708_v47  ;;  %v4724_v0 = vld [vmem:[#allocation80_spill] sm:$0xff] }
  0xe3   :  { %2942 = vtanh.f32 %v3699_v49 }
  0xe4   :  { %v470_v13 = vmul.f32 0.5, %v469_v30  ;;  %v4725_v30 = vld [vmem:[#allocation81_spill] sm:$0xff] }
  0xe5   :  { %v671_v42 = vpop.f32.mrf.mxu2  ;;  %v647_v28 = vpop.f32.mrf.mxu0 }
  0xe6   :  { %v684_v63 = vpop.f32.mrf.mxu3  ;;  %v697_v28 = vadd.f32 %v3706_v37, %v645_v61 }
  0xe7   :  { %v660_v43 = vpop.f32.mrf.mxu1 }
  0xe8   :  { %v698_v43 = vadd.f32 %v3708_v47, %v658_v23  ;;  %v4733_v23 = vld [vmem:[#allocation87_spill] sm:$0xff] }
  0xe9   :  { %v2943_v31 = vpop.eup %2942 }
  0xea   :  { %v475_v19 = vmul.f32 %v2943_v31, %v470_v13  ;;  %v4726_v13 = vld [vmem:[#allocation82_spill] sm:$0xff] }
  0xec   :  { %v935_v11 = vpack.c.bf16 %v475_v19, %v475_v19 }
  0xed   :  { %v673_v2 = vpop.f32.mrf.mxu2 }
  0xee   :  { %950 = vmatmul.bf16.vlgmr.msrb.gmra.mxu0 %v935_v11  ;;  %963 = vmatmul.bf16.vlgmr.msrb.gmra.mxu1 %v935_v11  ;;  %v686_v40 = vpop.f32.mrf.mxu3 }
  0xef   :  { %976 = vmatmul.bf16.vlgmr.msrb.gmra.mxu2 %v935_v11  ;;  %989 = vmatmul.bf16.vlgmr.msrb.gmra.mxu3 %v935_v11  ;;  %v4727_v40 = vld [vmem:[#allocation83_spill] sm:$0xff] }
  0xf0   :  { %1072 = vmatpush.bf16.msrb.mxu0 %v3509_v51  ;;  %1085 = vmatpush.bf16.msrb.mxu1 %v4719_v1  ;;  %v4729_v1 = vld [vmem:[#allocation85_spill] sm:$0xff] }
  0xf1   :  { %1098 = vmatpush.bf16.msrb.mxu2 %v4720_v18  ;;  %1111 = vmatpush.bf16.msrb.mxu3 %v4721_v36  ;;  %v4728_v36 = vld [vmem:[#allocation84_spill] sm:$0xff] }
  0xf4   :  { %1073 = vmatpush.bf16.msrb.mxu0 %v4723_v54  ;;  %1086 = vmatpush.bf16.msrb.mxu1 %v4724_v0  ;;  %v4730_v54 = vld [vmem:[#allocation86_spill] sm:$0xff]  ;;  %v3720_v0 = vperm.slane %v213_v6, 2 }
  0xf5   :  { %1099 = vmatpush.bf16.msrb.mxu2 %v4725_v30  ;;  %1112 = vmatpush.bf16.msrb.mxu3 %v4726_v13  ;;  %v3722_v30 = vperm.slane %v213_v6, 3 }
  0xf6   :  { %4731 = vst [vmem:[#allocation96_spill] sm:$0xff] %v3720_v0 }
  0xf7   :  { %4732 = vst [vmem:[#allocation97_spill] sm:$0xff] %v3722_v30 }
  0xf8   :  { %1074 = vmatpush.bf16.msrb.mxu0 %v4727_v40  ;;  %1087 = vmatpush.bf16.msrb.mxu1 %v4728_v36  ;;  %v4736_v36 = vld [vmem:[#allocation90_spill] sm:$0xff] }
  0xf9   :  { %1100 = vmatpush.bf16.msrb.mxu2 %v4729_v1  ;;  %1113 = vmatpush.bf16.msrb.mxu3 %v4730_v54  ;;  %v4741_v1 = vld [vmem:[#allocation95_spill] sm:$0xff] }
  0xfb   :  { %v870_v31 = vpop.f32.mrf.mxu0 }
  0xfc   :  { %v913_v19 = vadd.f32 %v870_v31, %v697_v28  ;;  %v883_v2 = vpop.f32.mrf.mxu1  ;;  %1075 = vmatpush.bf16.msrb.mxu0 %v4733_v23  ;;  %v4734_v28 = vld [vmem:[#allocation88_spill] sm:$0xff]  ;;  %v4735_v31 = vld [vmem:[#allocation89_spill] sm:$0xff] }
  0xfd   :  { %v914_v18 = vadd.f32 %v883_v2, %v698_v43  ;;  %1088 = vmatpush.bf16.msrb.mxu1 %v4734_v28  ;;  %1101 = vmatpush.bf16.msrb.mxu2 %v4735_v31  ;;  %v699_v43 = vadd.f32 %v3720_v0, %v671_v42  ;;  %v700_v2 = vadd.f32 %v3722_v30, %v684_v63  ;;  %v4737_v28 = vld [vmem:[#allocation91_spill] sm:$0xff]  ;;  %v4739_v31 = vld [vmem:[#allocation93_spill] sm:$0xff] }
  0xfe   :  { %v917_v13 = vmul.f32 0.5, %v913_v19  ;;  %1114 = vmatpush.bf16.msrb.mxu3 %v4736_v36  ;;  %1024 = vmatmul.bf16.vlgmr.msra.gmra.mxu0 %v935_v11  ;;  %v4740_v36 = vld [vmem:[#allocation94_spill] sm:$0xff] }
  0xff   :  { %v921_v61 = vmul.f32 0.5, %v914_v18  ;;  %1037 = vmatmul.bf16.vlgmr.msra.gmra.mxu1 %v935_v11  ;;  %1050 = vmatmul.bf16.vlgmr.msra.gmra.mxu2 %v935_v11 }
 0x100   :  { %2944 = vtanh.f32 %v917_v13  ;;  %1063 = vmatmul.bf16.vlgmr.msra.gmra.mxu3 %v935_v11  ;;  %1076 = vmatpush.bf16.msrb.mxu0 %v4737_v28 }
 0x101   :  { %2946 = vtanh.f32 %v921_v61  ;;  %v4738_v61 = vld [vmem:[#allocation92_spill] sm:$0xff]  ;;  %1102 = vmatpush.bf16.msrb.mxu2 %v4739_v31 }
 0x102   :  { %1089 = vmatpush.bf16.msrb.mxu1 %v4738_v61  ;;  %1115 = vmatpush.bf16.msrb.mxu3 %v4740_v36 }
 0x103   :  { %v896_v6 = vpop.f32.mrf.mxu2  ;;  %v872_v23 = vpop.f32.mrf.mxu0 }
 0x104   :  { %v909_v18 = vpop.f32.mrf.mxu3  ;;  %v915_v13 = vadd.f32 %v896_v6, %v699_v43  ;;  %v885_v54 = vpop.f32.mrf.mxu1  ;;  %1077 = vmatpush.bf16.msrb.mxu0 %v4741_v1 }
 0x105   :  { %v916_v19 = vadd.f32 %v909_v18, %v700_v2  ;;  %1103 = vmatpush.bf16.msrb.mxu2 %v3590_v4 }
 0x106   :  { %v2945_v42 = vpop.eup %2944  ;;  %2948 = vtanh.f32 %v915_v13  ;;  %1090 = vmatpush.bf16.msrb.mxu1 %v3586_v14  ;;  %1116 = vmatpush.bf16.msrb.mxu3 %v3592_v22 }
 0x107   :  { %v926_v63 = vmul.f32 0.5, %v916_v19  ;;  %v2947_v30 = vpop.eup %2946  ;;  %v919_v0 = vadd.f32 1.0, %v2945_v42 }
 0x108   :  { %v923_v11 = vadd.f32 1.0, %v2947_v30  ;;  %1078 = vmatpush.bf16.msrb.mxu0 %v3595_v20 }
 0x109   :  { %v920_v23 = vmul.f32 0.5, %v919_v0  ;;  %2950 = vtanh.f32 %v926_v63  ;;  %1104 = vmatpush.bf16.msrb.mxu2 %v3602_v48 }
 0x10a   :  { %v924_v54 = vmul.f32 0.5, %v923_v11  ;;  %1091 = vmatpush.bf16.msrb.mxu1 %v3598_v39  ;;  %1117 = vmatpush.bf16.msrb.mxu3 %v3604_v24 }
 0x10b   :  { %v898_v43 = vpop.f32.mrf.mxu2 }
 0x10c   :  { %v911_v2 = vpop.f32.mrf.mxu3  ;;  %v2949_v6 = vpop.eup %2948  ;;  %v930_v18 = vmul.f32 0.0, %v924_v54  ;;  %1079 = vmatpush.bf16.msrb.mxu0 %v3607_v55  ;;  %v4742_v54 = vld [vmem:[#allocation41_spill] sm:$0xff]  ;;  %v4743_v43 = vld [vmem:[#allocation42_spill] sm:$0xff] }
 0x10d   :  { %v931_v30 = vmul.f32 %v2949_v6, %v920_v23  ;;  %1105 = vmatpush.bf16.msrb.mxu2 %v3614_v52  ;;  %v4744_v2 = vld [vmem:[#allocation43_spill] sm:$0xff]  ;;  %v4745_v6 = vld [vmem:[#allocation44_spill] sm:$0xff] }
 0x10e   :  { %1092 = vmatpush.bf16.msrb.mxu1 %v3610_v59  ;;  %1118 = vmatpush.bf16.msrb.mxu3 %v3616_v27 }
 0x10f   :  { %v2951_v0 = vpop.eup %2950  ;;  %v3742_v13 = vadd.f32 %v931_v30, %v930_v18  ;;  %v4746_v18 = vld [vmem:[#allocation45_spill] sm:$0xff]  ;;  %v4747_v30 = vld [vmem:[#allocation46_spill] sm:$0xff] }
 0x110   :  { %v928_v19 = vadd.f32 1.0, %v2951_v0  ;;  %1153 = vmatpush.bf16.msra.mxu0 %v3309_v3  ;;  %v4748_v0 = vld [vmem:[#allocation47_spill] sm:$0xff] }
 0x111   :  { %2952 = vtanh.f32 %v3742_v13  ;;  %1179 = vmatpush.bf16.msra.mxu2 %v3313_v8 }
 0x112   :  { %1166 = vmatpush.bf16.msra.mxu1 %v3311_v7  ;;  %1192 = vmatpush.bf16.msra.mxu3 %v3316_v12  ;;  %v929_v42 = vmul.f32 0.5, %v928_v19  ;;  %v4749_v19 = vld [vmem:[#allocation48_spill] sm:$0xff] }
 0x114   :  { %1154 = vmatpush.bf16.msra.mxu0 %v3320_v16 }
 0x115   :  { %1180 = vmatpush.bf16.msra.mxu2 %v3325_v21 }
 0x116   :  { %1167 = vmatpush.bf16.msra.mxu1 %v3322_v17  ;;  %1193 = vmatpush.bf16.msra.mxu3 %v3327_v25 }
 0x117   :  { %v2953_v63 = vpop.eup %2952 }
 0x118   :  { %v934_v11 = vmul.f32 %v2953_v63, %v929_v42  ;;  %1155 = vmatpush.bf16.msra.mxu0 %v3330_v29  ;;  %v4750_v42 = vld [vmem:[#allocation49_spill] sm:$0xff]  ;;  %v4751_v63 = vld [vmem:[#allocation50_spill] sm:$0xff] }
 0x119   :  { %1181 = vmatpush.bf16.msra.mxu2 %v3336_v34 }
 0x11a   :  { %v936_v23 = vpack.c.bf16 %v934_v11, %v934_v11  ;;  %1168 = vmatpush.bf16.msra.mxu1 %v3334_v33  ;;  %1194 = vmatpush.bf16.msra.mxu3 %v3339_v38  ;;  %v4752_v11 = vld [vmem:[#allocation51_spill] sm:$0xff] }
 0x11c   :  { %1080 = vmatmul.bf16.vlgmr.msrb.gmra.mxu0 %v936_v23  ;;  %1093 = vmatmul.bf16.vlgmr.msrb.gmra.mxu1 %v936_v23 }
 0x11d   :  { %1106 = vmatmul.bf16.vlgmr.msrb.gmra.mxu2 %v936_v23  ;;  %1119 = vmatmul.bf16.vlgmr.msrb.gmra.mxu3 %v936_v23  ;;  %v4753_v23 = vld [vmem:[#allocation52_spill] sm:$0xff] }
 0x11e   :  { %1156 = vmatpush.bf16.msra.mxu0 %v3342_v44  ;;  %1169 = vmatpush.bf16.msra.mxu1 %v3346_v45 }
 0x11f   :  { %1182 = vmatpush.bf16.msra.mxu2 %v3348_v46  ;;  %1195 = vmatpush.bf16.msra.mxu3 %v3351_v50 }
 0x122   :  { %1157 = vmatpush.bf16.msra.mxu0 %v3354_v56  ;;  %1170 = vmatpush.bf16.msra.mxu1 %v3358_v57 }
 0x123   :  { %1183 = vmatpush.bf16.msra.mxu2 %v3360_v58  ;;  %1196 = vmatpush.bf16.msra.mxu3 %v3363_v62 }
 0x126   :  { %1158 = vmatpush.bf16.msra.mxu0 %v3366_v5  ;;  %1171 = vmatpush.bf16.msra.mxu1 %v3370_v9 }
 0x127   :  { %1184 = vmatpush.bf16.msra.mxu2 %v3372_v10  ;;  %1197 = vmatpush.bf16.msra.mxu3 %v3375_v15 }
 0x12a   :  { %1159 = vmatpush.bf16.msra.mxu0 %v3378_v26  ;;  %1172 = vmatpush.bf16.msra.mxu1 %v3382_v32 }
 0x12b   :  { %1185 = vmatpush.bf16.msra.mxu2 %v3384_v35  ;;  %1198 = vmatpush.bf16.msra.mxu3 %v3393_v41 }
 0x12e   :  { %1160 = vmatpush.bf16.msra.mxu0 %v3402_v53  ;;  %1173 = vmatpush.bf16.msra.mxu1 %v3406_v60 }
 0x12f   :  { %1186 = vmatpush.bf16.msra.mxu2 %v4742_v54  ;;  %1199 = vmatpush.bf16.msra.mxu3 %v4743_v43  ;;  %v4754_v43 = vld [vmem:[#allocation53_spill] sm:$0xff] }
 0x132   :  { %1227 = vmatpush.bf16.msrb.mxu0 %v4744_v2  ;;  %1240 = vmatpush.bf16.msrb.mxu1 %v4745_v6  ;;  %v4755_v2 = vld [vmem:[#allocation54_spill] sm:$0xff]  ;;  %v4756_v6 = vld [vmem:[#allocation56_spill] sm:$0xff] }
 0x133   :  { %1253 = vmatpush.bf16.msrb.mxu2 %v4746_v18  ;;  %1266 = vmatpush.bf16.msrb.mxu3 %v4747_v30  ;;  %v4757_v18 = vld [vmem:[#allocation57_spill] sm:$0xff]  ;;  %v4758_v30 = vld [vmem:[#allocation58_spill] sm:$0xff] }
 0x136   :  { %1228 = vmatpush.bf16.msrb.mxu0 %v4748_v0  ;;  %1241 = vmatpush.bf16.msrb.mxu1 %v4749_v19  ;;  %v4759_v0 = vld [vmem:[#allocation59_spill] sm:$0xff]  ;;  %v4760_v19 = vld [vmem:[#allocation60_spill] sm:$0xff] }
 0x137   :  { %1254 = vmatpush.bf16.msrb.mxu2 %v4750_v42  ;;  %1267 = vmatpush.bf16.msrb.mxu3 %v4751_v63  ;;  %v4761_v42 = vld [vmem:[#allocation61_spill] sm:$0xff]  ;;  %v4762_v63 = vld [vmem:[#allocation62_spill] sm:$0xff] }
 0x13a   :  { %1229 = vmatpush.bf16.msrb.mxu0 %v4752_v11  ;;  %1242 = vmatpush.bf16.msrb.mxu1 %v4753_v23  ;;  %v4763_v11 = vld [vmem:[#allocation63_spill] sm:$0xff]  ;;  %v4764_v23 = vld [vmem:[#allocation64_spill] sm:$0xff] }
 0x13b   :  { %1255 = vmatpush.bf16.msrb.mxu2 %v4754_v43  ;;  %1268 = vmatpush.bf16.msrb.mxu3 %v4755_v2  ;;  %v4765_v43 = vld [vmem:[#allocation65_spill] sm:$0xff]  ;;  %v4766_v2 = vld [vmem:[#allocation66_spill] sm:$0xff] }
 0x13e   :  { %1230 = vmatpush.bf16.msrb.mxu0 %v4756_v6  ;;  %1243 = vmatpush.bf16.msrb.mxu1 %v4757_v18  ;;  %v4767_v6 = vld [vmem:[#allocation67_spill] sm:$0xff]  ;;  %v4768_v18 = vld [vmem:[#allocation68_spill] sm:$0xff] }
 0x13f   :  { %1256 = vmatpush.bf16.msrb.mxu2 %v4758_v30  ;;  %1269 = vmatpush.bf16.msrb.mxu3 %v4759_v0  ;;  %v4769_v30 = vld [vmem:[#allocation69_spill] sm:$0xff]  ;;  %v4770_v0 = vld [vmem:[#allocation70_spill] sm:$0xff] }
 0x142   :  { %1231 = vmatpush.bf16.msrb.mxu0 %v4760_v19  ;;  %1244 = vmatpush.bf16.msrb.mxu1 %v4761_v42  ;;  %v4771_v19 = vld [vmem:[#allocation71_spill] sm:$0xff]  ;;  %v4772_v42 = vld [vmem:[#allocation72_spill] sm:$0xff] }
 0x143   :  { %1257 = vmatpush.bf16.msrb.mxu2 %v4762_v63  ;;  %1270 = vmatpush.bf16.msrb.mxu3 %v4763_v11  ;;  %v4773_v63 = vld [vmem:[#allocation73_spill] sm:$0xff]  ;;  %v4774_v11 = vld [vmem:[#allocation74_spill] sm:$0xff] }
 0x146   :  { %1232 = vmatpush.bf16.msrb.mxu0 %v4764_v23  ;;  %1245 = vmatpush.bf16.msrb.mxu1 %v4765_v43  ;;  %v4775_v23 = vld [vmem:[#allocation75_spill] sm:$0xff] }
 0x147   :  { %1258 = vmatpush.bf16.msrb.mxu2 %v4766_v2  ;;  %1271 = vmatpush.bf16.msrb.mxu3 %v4767_v6  ;;  %v2792_v6 = vld [vmem:[%s4442_s0 + $0x40] sm:$0xff] }
 0x14a   :  { %1233 = vmatpush.bf16.msrb.mxu0 %v4768_v18  ;;  %1246 = vmatpush.bf16.msrb.mxu1 %v4769_v30  ;;  %v2793_v30 = vld [vmem:[%s4442_s0 + $0x48] sm:$0xff] }
 0x14b   :  { %1259 = vmatpush.bf16.msrb.mxu2 %v4770_v0  ;;  %1272 = vmatpush.bf16.msrb.mxu3 %v4771_v19 }
 0x14e   :  { %1234 = vmatpush.bf16.msrb.mxu0 %v4772_v42  ;;  %1247 = vmatpush.bf16.msrb.mxu1 %v4773_v63 }
 0x14f   :  { %1260 = vmatpush.bf16.msrb.mxu2 %v4774_v11  ;;  %1273 = vmatpush.bf16.msrb.mxu3 %v4775_v23  ;;  %v2794_v11 = vld [vmem:[%s4442_s0 + $0x50] sm:$0xff]  ;;  %v2795_v23 = vld [vmem:[%s4442_s0 + $0x58] sm:$0xff] }
 0x16b   :  { %v951_v18 = vpop.f32.mrf.mxu0  ;;  %v964_v0 = vpop.f32.mrf.mxu1 }
 0x16c   :  { %v994_v2 = vadd.f32 %v2792_v6, %v951_v18  ;;  %v995_v19 = vadd.f32 %v2793_v30, %v964_v0 }
 0x16e   :  { %v998_v43 = vmul.f32 0.5, %v994_v2  ;;  %v1002_v42 = vmul.f32 0.5, %v995_v19 }
 0x170   :  { %2954 = vtanh.f32 %v998_v43 }
 0x171   :  { %2956 = vtanh.f32 %v1002_v42 }
 0x172   :  { %v977_v63 = vpop.f32.mrf.mxu2  ;;  %v990_v54 = vpop.f32.mrf.mxu3 }
 0x173   :  { %v996_v60 = vadd.f32 %v2794_v11, %v977_v63  ;;  %v997_v53 = vadd.f32 %v2795_v23, %v990_v54  ;;  %v953_v41 = vpop.f32.mrf.mxu0  ;;  %v966_v35 = vpop.f32.mrf.mxu1 }
 0x175   :  { %2958 = vtanh.f32 %v996_v60  ;;  %v1007_v6 = vmul.f32 0.5, %v997_v53 }
 0x176   :  { %v2955_v2 = vpop.eup %2954 }
 0x177   :  { %v2957_v18 = vpop.eup %2956  ;;  %v1000_v43 = vadd.f32 1.0, %v2955_v2  ;;  %2960 = vtanh.f32 %v1007_v6 }
 0x178   :  { %v1004_v30 = vadd.f32 1.0, %v2957_v18 }
 0x179   :  { %v1001_v0 = vmul.f32 0.5, %v1000_v43 }
 0x17a   :  { %v1005_v19 = vmul.f32 0.5, %v1004_v30  ;;  %v979_v32 = vpop.f32.mrf.mxu2  ;;  %v992_v26 = vpop.f32.mrf.mxu3  ;;  %v4779_v30 = vld [vmem:[#allocation79_spill] sm:$0xff] }
 0x17b   :  { %v2959_v15 = vpop.eup %2958  ;;  %v1025_v10 = vpop.f32.mrf.mxu0 }
 0x17c   :  { %v1038_v42 = vpop.f32.mrf.mxu1  ;;  %v1011_v9 = vmul.f32 %v1005_v19, %v3699_v49  ;;  %v1012_v63 = vmul.f32 %v2959_v15, %v1001_v0  ;;  %v4777_v15 = vld [vmem:[#allocation77_spill] sm:$0xff]  ;;  %v4778_v49 = vld [vmem:[#allocation78_spill] sm:$0xff]  ;;  %v4780_v0 = vld [vmem:[#allocation80_spill] sm:$0xff] }
 0x17d   :  { %v2961_v54 = vpop.eup %2960  ;;  %v4781_v19 = vld [vmem:[#allocation81_spill] sm:$0xff] }
 0x17e   :  { %v3826_v41 = vadd.f32 %v1012_v63, %v1011_v9  ;;  %v1009_v35 = vadd.f32 1.0, %v2961_v54  ;;  %v4776_v9 = vld [vmem:[#allocation76_spill] sm:$0xff]  ;;  %v4782_v63 = vld [vmem:[#allocation82_spill] sm:$0xff]  ;;  %v1068_v54 = vadd.f32 %v1025_v10, %v3706_v37  ;;  %v4788_v10 = vld [vmem:[#allocation89_spill] sm:$0xff] }
 0x180   :  { %2962 = vtanh.f32 %v3826_v41  ;;  %v1010_v11 = vmul.f32 0.5, %v1009_v35  ;;  %v1069_v35 = vadd.f32 %v1038_v42, %v3708_v47  ;;  %v4789_v42 = vld [vmem:[#allocation90_spill] sm:$0xff] }
 0x182   :  { %v1051_v53 = vpop.f32.mrf.mxu2 }
 0x183   :  { %v1064_v60 = vpop.f32.mrf.mxu3  ;;  %v1027_v23 = vpop.f32.mrf.mxu0 }
 0x184   :  { %v1040_v6 = vpop.f32.mrf.mxu1 }
 0x185   :  { %v4783_v6 = vld [vmem:[#allocation84_spill] sm:$0xff] }
 0x186   :  { %v2963_v2 = vpop.eup %2962 }
 0x187   :  { %v1015_v32 = vmul.f32 %v2963_v2, %v1010_v11 }
 0x189   :  { %v1146_v26 = vpack.c.bf16 %v1015_v32, %v1015_v32 }
 0x18a   :  { %v1053_v18 = vpop.f32.mrf.mxu2 }
 0x18b   :  { %v1066_v43 = vpop.f32.mrf.mxu3  ;;  %1161 = vmatmul.bf16.vlgmr.msra.gmra.mxu0 %v1146_v26  ;;  %1174 = vmatmul.bf16.vlgmr.msra.gmra.mxu1 %v1146_v26  ;;  %v4784_v18 = vld [vmem:[#allocation85_spill] sm:$0xff] }
 0x18c   :  { %1187 = vmatmul.bf16.vlgmr.msra.gmra.mxu2 %v1146_v26  ;;  %1200 = vmatmul.bf16.vlgmr.msra.gmra.mxu3 %v1146_v26  ;;  %v4785_v43 = vld [vmem:[#allocation86_spill] sm:$0xff] }
 0x18d   :  { %1283 = vmatpush.bf16.msra.mxu0 %v3509_v51  ;;  %1296 = vmatpush.bf16.msra.mxu1 %v4776_v9 }
 0x18e   :  { %1309 = vmatpush.bf16.msra.mxu2 %v4777_v15  ;;  %1322 = vmatpush.bf16.msra.mxu3 %v4778_v49 }
 0x191   :  { %1284 = vmatpush.bf16.msra.mxu0 %v4779_v30  ;;  %1297 = vmatpush.bf16.msra.mxu1 %v4780_v0  ;;  %v4786_v30 = vld [vmem:[#allocation87_spill] sm:$0xff] }
 0x192   :  { %1310 = vmatpush.bf16.msra.mxu2 %v4781_v19  ;;  %1323 = vmatpush.bf16.msra.mxu3 %v4782_v63  ;;  %v4787_v63 = vld [vmem:[#allocation88_spill] sm:$0xff] }
 0x195   :  { %1285 = vmatpush.bf16.msra.mxu0 %v4727_v40  ;;  %1298 = vmatpush.bf16.msra.mxu1 %v4783_v6  ;;  %v4790_v40 = vld [vmem:[#allocation96_spill] sm:$0xff]  ;;  %v4791_v6 = vld [vmem:[#allocation97_spill] sm:$0xff] }
 0x196   :  { %1311 = vmatpush.bf16.msra.mxu2 %v4784_v18  ;;  %1324 = vmatpush.bf16.msra.mxu3 %v4785_v43  ;;  %v1070_v47 = vadd.f32 %v1051_v53, %v4790_v40 }
 0x199   :  { %v1081_v11 = vpop.f32.mrf.mxu0  ;;  %v1094_v23 = vpop.f32.mrf.mxu1  ;;  %1286 = vmatpush.bf16.msra.mxu0 %v4786_v30  ;;  %1299 = vmatpush.bf16.msra.mxu1 %v4787_v63 }
 0x19a   :  { %v1124_v2 = vadd.f32 %v1081_v11, %v1068_v54  ;;  %v1125_v32 = vadd.f32 %v1094_v23, %v1069_v35  ;;  %1312 = vmatpush.bf16.msra.mxu2 %v4788_v10  ;;  %1325 = vmatpush.bf16.msra.mxu3 %v4789_v42  ;;  %v1071_v54 = vadd.f32 %v1064_v60, %v4791_v6 }
 0x19b   :  { %1235 = vmatmul.bf16.vlgmr.msrb.gmra.mxu0 %v1146_v26  ;;  %1248 = vmatmul.bf16.vlgmr.msrb.gmra.mxu1 %v1146_v26 }
 0x19c   :  { %v1128_v0 = vmul.f32 0.5, %v1124_v2  ;;  %v1132_v19 = vmul.f32 0.5, %v1125_v32  ;;  %1261 = vmatmul.bf16.vlgmr.msrb.gmra.mxu2 %v1146_v26  ;;  %1274 = vmatmul.bf16.vlgmr.msrb.gmra.mxu3 %v1146_v26 }
 0x19d   :  { %1287 = vmatpush.bf16.msra.mxu0 %v4737_v28  ;;  %1300 = vmatpush.bf16.msra.mxu1 %v4738_v61 }
 0x19e   :  { %2964 = vtanh.f32 %v1128_v0  ;;  %1313 = vmatpush.bf16.msra.mxu2 %v4739_v31  ;;  %1326 = vmatpush.bf16.msra.mxu3 %v4740_v36 }
 0x19f   :  { %2966 = vtanh.f32 %v1132_v19 }
 0x1a0   :  { %v1107_v35 = vpop.f32.mrf.mxu2  ;;  %v1120_v11 = vpop.f32.mrf.mxu3 }
 0x1a1   :  { %v1126_v23 = vadd.f32 %v1107_v35, %v1070_v47  ;;  %v1127_v2 = vadd.f32 %v1120_v11, %v1071_v54  ;;  %v1083_v32 = vpop.f32.mrf.mxu0  ;;  %v1096_v63 = vpop.f32.mrf.mxu1  ;;  %1288 = vmatpush.bf16.msra.mxu0 %v4741_v1  ;;  %1301 = vmatpush.bf16.msra.mxu1 %v3586_v14 }
 0x1a2   :  { %1314 = vmatpush.bf16.msra.mxu2 %v3590_v4  ;;  %1327 = vmatpush.bf16.msra.mxu3 %v3592_v22 }
 0x1a3   :  { %2968 = vtanh.f32 %v1126_v23  ;;  %v1137_v53 = vmul.f32 0.5, %v1127_v2 }
 0x1a4   :  { %v2965_v60 = vpop.eup %2964 }
 0x1a5   :  { %v2967_v0 = vpop.eup %2966  ;;  %v1130_v19 = vadd.f32 1.0, %v2965_v60  ;;  %2970 = vtanh.f32 %v1137_v53  ;;  %1289 = vmatpush.bf16.msra.mxu0 %v3595_v20  ;;  %1302 = vmatpush.bf16.msra.mxu1 %v3598_v39 }
 0x1a6   :  { %v1134_v47 = vadd.f32 1.0, %v2967_v0  ;;  %1315 = vmatpush.bf16.msra.mxu2 %v3602_v48  ;;  %1328 = vmatpush.bf16.msra.mxu3 %v3604_v24 }
 0x1a7   :  { %v1131_v26 = vmul.f32 0.5, %v1130_v19 }
 0x1a8   :  { %v1135_v63 = vmul.f32 0.5, %v1134_v47  ;;  %v1109_v54 = vpop.f32.mrf.mxu2  ;;  %v1122_v35 = vpop.f32.mrf.mxu3 }
 0x1a9   :  { %v2969_v11 = vpop.eup %2968  ;;  %1290 = vmatpush.bf16.msra.mxu0 %v3607_v55  ;;  %1303 = vmatpush.bf16.msra.mxu1 %v3610_v59  ;;  %v4794_v54 = vld [vmem:[#allocation34_spill] sm:$0xff]  ;;  %v4795_v35 = vld [vmem:[#allocation35_spill] sm:$0xff] }
 0x1aa   :  { %v1141_v23 = vmul.f32 %v1135_v63, %v3742_v13  ;;  %v1142_v2 = vmul.f32 %v2969_v11, %v1131_v26  ;;  %1316 = vmatpush.bf16.msra.mxu2 %v3614_v52  ;;  %1329 = vmatpush.bf16.msra.mxu3 %v3616_v27  ;;  %v4792_v26 = vld [vmem:[#allocation32_spill] sm:$0xff]  ;;  %v4793_v63 = vld [vmem:[#allocation33_spill] sm:$0xff] }
 0x1ab   :  { %v2971_v32 = vpop.eup %2970  ;;  %v4796_v11 = vld [vmem:[#allocation36_spill] sm:$0xff] }
 0x1ac   :  { %v3862_v53 = vadd.f32 %v1142_v2, %v1141_v23  ;;  %v1139_v60 = vadd.f32 1.0, %v2971_v32  ;;  %v4797_v23 = vld [vmem:[#allocation37_spill] sm:$0xff]  ;;  %v4798_v2 = vld [vmem:[#allocation38_spill] sm:$0xff]  ;;  %v4799_v32 = vld [vmem:[#allocation39_spill] sm:$0xff] }
 0x1ad   :  { %1364 = vmatpush.bf16.msrb.mxu0 %v3309_v3  ;;  %1377 = vmatpush.bf16.msrb.mxu1 %v3311_v7 }
 0x1ae   :  { %2972 = vtanh.f32 %v3862_v53  ;;  %1390 = vmatpush.bf16.msrb.mxu2 %v3313_v8  ;;  %1403 = vmatpush.bf16.msrb.mxu3 %v3316_v12  ;;  %v1140_v13 = vmul.f32 0.5, %v1139_v60  ;;  %v4800_v60 = vld [vmem:[#allocation40_spill] sm:$0xff] }
 0x1b1   :  { %1365 = vmatpush.bf16.msrb.mxu0 %v3320_v16  ;;  %1378 = vmatpush.bf16.msrb.mxu1 %v3322_v17 }
 0x1b2   :  { %1391 = vmatpush.bf16.msrb.mxu2 %v3325_v21  ;;  %1404 = vmatpush.bf16.msrb.mxu3 %v3327_v25 }
 0x1b4   :  { %v2973_v0 = vpop.eup %2972 }
 0x1b5   :  { %v1145_v19 = vmul.f32 %v2973_v0, %v1140_v13  ;;  %1366 = vmatpush.bf16.msrb.mxu0 %v3330_v29  ;;  %1379 = vmatpush.bf16.msrb.mxu1 %v3334_v33  ;;  %v4801_v13 = vld [vmem:[#allocation41_spill] sm:$0xff]  ;;  %v4802_v0 = vld [vmem:[#allocation42_spill] sm:$0xff] }
 0x1b6   :  { %1392 = vmatpush.bf16.msrb.mxu2 %v3336_v34  ;;  %1405 = vmatpush.bf16.msrb.mxu3 %v3339_v38 }
 0x1b7   :  { %v1147_v47 = vpack.c.bf16 %v1145_v19, %v1145_v19  ;;  %v4803_v19 = vld [vmem:[#allocation43_spill] sm:$0xff] }
 0x1b9   :  { %1291 = vmatmul.bf16.vlgmr.msra.gmra.mxu0 %v1147_v47  ;;  %1304 = vmatmul.bf16.vlgmr.msra.gmra.mxu1 %v1147_v47 }
 0x1ba   :  { %1317 = vmatmul.bf16.vlgmr.msra.gmra.mxu2 %v1147_v47  ;;  %1330 = vmatmul.bf16.vlgmr.msra.gmra.mxu3 %v1147_v47  ;;  %v4804_v47 = vld [vmem:[#allocation44_spill] sm:$0xff] }
 0x1bb   :  { %1367 = vmatpush.bf16.msrb.mxu0 %v3342_v44  ;;  %1380 = vmatpush.bf16.msrb.mxu1 %v3346_v45 }
 0x1bc   :  { %1393 = vmatpush.bf16.msrb.mxu2 %v3348_v46  ;;  %1406 = vmatpush.bf16.msrb.mxu3 %v3351_v50 }
 0x1bf   :  { %1368 = vmatpush.bf16.msrb.mxu0 %v3354_v56  ;;  %1381 = vmatpush.bf16.msrb.mxu1 %v3358_v57 }
 0x1c0   :  { %1394 = vmatpush.bf16.msrb.mxu2 %v3360_v58  ;;  %1407 = vmatpush.bf16.msrb.mxu3 %v3363_v62 }
 0x1c3   :  { %1369 = vmatpush.bf16.msrb.mxu0 %v3366_v5  ;;  %1382 = vmatpush.bf16.msrb.mxu1 %v4792_v26 }
 0x1c4   :  { %1395 = vmatpush.bf16.msrb.mxu2 %v4793_v63  ;;  %1408 = vmatpush.bf16.msrb.mxu3 %v4794_v54  ;;  %v4805_v54 = vld [vmem:[#allocation45_spill] sm:$0xff] }
 0x1c7   :  { %1370 = vmatpush.bf16.msrb.mxu0 %v4795_v35  ;;  %1383 = vmatpush.bf16.msrb.mxu1 %v4796_v11  ;;  %v4806_v35 = vld [vmem:[#allocation46_spill] sm:$0xff]  ;;  %v4807_v11 = vld [vmem:[#allocation47_spill] sm:$0xff] }
 0x1c8   :  { %1396 = vmatpush.bf16.msrb.mxu2 %v4797_v23  ;;  %1409 = vmatpush.bf16.msrb.mxu3 %v4798_v2  ;;  %v4808_v23 = vld [vmem:[#allocation48_spill] sm:$0xff]  ;;  %v4809_v2 = vld [vmem:[#allocation49_spill] sm:$0xff] }
 0x1cb   :  { %1371 = vmatpush.bf16.msrb.mxu0 %v4799_v32  ;;  %1384 = vmatpush.bf16.msrb.mxu1 %v4800_v60  ;;  %v4810_v32 = vld [vmem:[#allocation50_spill] sm:$0xff]  ;;  %v4811_v60 = vld [vmem:[#allocation51_spill] sm:$0xff] }
 0x1cc   :  { %1397 = vmatpush.bf16.msrb.mxu2 %v4801_v13  ;;  %1410 = vmatpush.bf16.msrb.mxu3 %v4802_v0  ;;  %v4812_v13 = vld [vmem:[#allocation52_spill] sm:$0xff]  ;;  %v4813_v0 = vld [vmem:[#allocation53_spill] sm:$0xff] }
 0x1cf   :  { %1438 = vmatpush.bf16.msra.mxu0 %v4803_v19  ;;  %1451 = vmatpush.bf16.msra.mxu1 %v4804_v47  ;;  %v4814_v19 = vld [vmem:[#allocation54_spill] sm:$0xff]  ;;  %v4815_v47 = vld [vmem:[#allocation56_spill] sm:$0xff] }
 0x1d0   :  { %1464 = vmatpush.bf16.msra.mxu2 %v4805_v54  ;;  %1477 = vmatpush.bf16.msra.mxu3 %v4806_v35  ;;  %v4816_v54 = vld [vmem:[#allocation57_spill] sm:$0xff]  ;;  %v4817_v35 = vld [vmem:[#allocation58_spill] sm:$0xff] }
 0x1d3   :  { %1439 = vmatpush.bf16.msra.mxu0 %v4807_v11  ;;  %1452 = vmatpush.bf16.msra.mxu1 %v4808_v23  ;;  %v4818_v11 = vld [vmem:[#allocation59_spill] sm:$0xff]  ;;  %v4819_v23 = vld [vmem:[#allocation60_spill] sm:$0xff] }
 0x1d4   :  { %1465 = vmatpush.bf16.msra.mxu2 %v4809_v2  ;;  %1478 = vmatpush.bf16.msra.mxu3 %v4810_v32  ;;  %v4820_v2 = vld [vmem:[#allocation61_spill] sm:$0xff]  ;;  %v4821_v32 = vld [vmem:[#allocation62_spill] sm:$0xff] }
 0x1d7   :  { %1440 = vmatpush.bf16.msra.mxu0 %v4811_v60  ;;  %1453 = vmatpush.bf16.msra.mxu1 %v4812_v13  ;;  %v4822_v60 = vld [vmem:[#allocation63_spill] sm:$0xff]  ;;  %v4823_v13 = vld [vmem:[#allocation64_spill] sm:$0xff] }
 0x1d8   :  { %1466 = vmatpush.bf16.msra.mxu2 %v4813_v0  ;;  %1479 = vmatpush.bf16.msra.mxu3 %v4814_v19  ;;  %v4824_v0 = vld [vmem:[#allocation65_spill] sm:$0xff]  ;;  %v4825_v19 = vld [vmem:[#allocation66_spill] sm:$0xff] }
 0x1db   :  { %1441 = vmatpush.bf16.msra.mxu0 %v4815_v47  ;;  %1454 = vmatpush.bf16.msra.mxu1 %v4816_v54  ;;  %v4826_v47 = vld [vmem:[#allocation67_spill] sm:$0xff]  ;;  %v4827_v54 = vld [vmem:[#allocation68_spill] sm:$0xff] }
 0x1dc   :  { %1467 = vmatpush.bf16.msra.mxu2 %v4817_v35  ;;  %1480 = vmatpush.bf16.msra.mxu3 %v4818_v11  ;;  %v4828_v35 = vld [vmem:[#allocation69_spill] sm:$0xff]  ;;  %v4829_v11 = vld [vmem:[#allocation70_spill] sm:$0xff] }
 0x1df   :  { %1442 = vmatpush.bf16.msra.mxu0 %v4819_v23  ;;  %1455 = vmatpush.bf16.msra.mxu1 %v4820_v2  ;;  %v4830_v23 = vld [vmem:[#allocation71_spill] sm:$0xff]  ;;  %v4831_v2 = vld [vmem:[#allocation72_spill] sm:$0xff] }
 0x1e0   :  { %1468 = vmatpush.bf16.msra.mxu2 %v4821_v32  ;;  %1481 = vmatpush.bf16.msra.mxu3 %v4822_v60  ;;  %v4832_v32 = vld [vmem:[#allocation73_spill] sm:$0xff]  ;;  %v4833_v60 = vld [vmem:[#allocation74_spill] sm:$0xff] }
 0x1e3   :  { %1443 = vmatpush.bf16.msra.mxu0 %v4823_v13  ;;  %1456 = vmatpush.bf16.msra.mxu1 %v4824_v0  ;;  %v4834_v13 = vld [vmem:[#allocation75_spill] sm:$0xff] }
 0x1e4   :  { %1469 = vmatpush.bf16.msra.mxu2 %v4825_v19  ;;  %1482 = vmatpush.bf16.msra.mxu3 %v4826_v47  ;;  %v2796_v47 = vld [vmem:[%s4442_s0 + $0x60] sm:$0xff] }
 0x1e7   :  { %1444 = vmatpush.bf16.msra.mxu0 %v4827_v54  ;;  %1457 = vmatpush.bf16.msra.mxu1 %v4828_v35  ;;  %v2797_v35 = vld [vmem:[%s4442_s0 + $0x68] sm:$0xff] }
 0x1e8   :  { %1470 = vmatpush.bf16.msra.mxu2 %v4829_v11  ;;  %1483 = vmatpush.bf16.msra.mxu3 %v4830_v23 }
 0x1eb   :  { %1445 = vmatpush.bf16.msra.mxu0 %v4831_v2  ;;  %1458 = vmatpush.bf16.msra.mxu1 %v4832_v32 }
 0x1ec   :  { %1471 = vmatpush.bf16.msra.mxu2 %v4833_v60  ;;  %1484 = vmatpush.bf16.msra.mxu3 %v4834_v13  ;;  %v2798_v60 = vld [vmem:[%s4442_s0 + $0x70] sm:$0xff]  ;;  %v2799_v13 = vld [vmem:[%s4442_s0 + $0x78] sm:$0xff] }
 0x208   :  { %v1162_v54 = vpop.f32.mrf.mxu0  ;;  %v1175_v11 = vpop.f32.mrf.mxu1 }
 0x209   :  { %v1205_v19 = vadd.f32 %v2796_v47, %v1162_v54  ;;  %v1206_v23 = vadd.f32 %v2797_v35, %v1175_v11 }
 0x20b   :  { %v1209_v0 = vmul.f32 0.5, %v1205_v19  ;;  %v1213_v2 = vmul.f32 0.5, %v1206_v23 }
 0x20d   :  { %2974 = vtanh.f32 %v1209_v0 }
 0x20e   :  { %2976 = vtanh.f32 %v1213_v2 }
 0x20f   :  { %v1188_v32 = vpop.f32.mrf.mxu2  ;;  %v1201_v63 = vpop.f32.mrf.mxu3 }
 0x210   :  { %v1207_v26 = vadd.f32 %v2798_v60, %v1188_v32  ;;  %v1208_v5 = vadd.f32 %v2799_v13, %v1201_v63  ;;  %v1164_v62 = vpop.f32.mrf.mxu0  ;;  %v1177_v58 = vpop.f32.mrf.mxu1 }
 0x212   :  { %2978 = vtanh.f32 %v1207_v26  ;;  %v1218_v54 = vmul.f32 0.5, %v1208_v5 }
 0x213   :  { %v2975_v35 = vpop.eup %2974 }
 0x214   :  { %v2977_v11 = vpop.eup %2976  ;;  %v1211_v23 = vadd.f32 1.0, %v2975_v35  ;;  %2980 = vtanh.f32 %v1218_v54 }
 0x215   :  { %v1215_v0 = vadd.f32 1.0, %v2977_v11 }
 0x216   :  { %v1212_v19 = vmul.f32 0.5, %v1211_v23 }
 0x217   :  { %v1216_v47 = vmul.f32 0.5, %v1215_v0  ;;  %v1190_v57 = vpop.f32.mrf.mxu2  ;;  %v1203_v56 = vpop.f32.mrf.mxu3  ;;  %v4838_v0 = vld [vmem:[#allocation82_spill] sm:$0xff] }
 0x218   :  { %v2979_v50 = vpop.eup %2978  ;;  %v1236_v46 = vpop.f32.mrf.mxu0 }
 0x219   :  { %v1249_v2 = vpop.f32.mrf.mxu1  ;;  %v1222_v45 = vmul.f32 %v1216_v47, %v3826_v41  ;;  %v1223_v32 = vmul.f32 %v2979_v50, %v1212_v19  ;;  %v4836_v50 = vld [vmem:[#allocation80_spill] sm:$0xff]  ;;  %v4837_v41 = vld [vmem:[#allocation81_spill] sm:$0xff]  ;;  %v1279_v19 = vadd.f32 %v1236_v46, %v3706_v37  ;;  %v4839_v47 = vld [vmem:[#allocation55_spill] sm:$0xff] }
 0x21a   :  { %v2981_v63 = vpop.eup %2980 }
 0x21b   :  { %v3946_v62 = vadd.f32 %v1223_v32, %v1222_v45  ;;  %v1220_v58 = vadd.f32 1.0, %v2981_v63  ;;  %v4835_v45 = vld [vmem:[#allocation79_spill] sm:$0xff]  ;;  %v1280_v32 = vadd.f32 %v1249_v2, %v4839_v47 }
 0x21d   :  { %2982 = vtanh.f32 %v3946_v62  ;;  %v1221_v54 = vmul.f32 0.5, %v1220_v58 }
 0x21f   :  { %v1262_v5 = vpop.f32.mrf.mxu2  ;;  %v1275_v26 = vpop.f32.mrf.mxu3 }
 0x220   :  { %v1238_v60 = vpop.f32.mrf.mxu0  ;;  %v1281_v46 = vadd.f32 %v1262_v5, %v4790_v40  ;;  %v1282_v2 = vadd.f32 %v1275_v26, %v4791_v6 }
 0x221   :  { %v1251_v13 = vpop.f32.mrf.mxu1  ;;  %v4840_v60 = vld [vmem:[#allocation83_spill] sm:$0xff] }
 0x222   :  { %v4841_v13 = vld [vmem:[#allocation84_spill] sm:$0xff] }
 0x223   :  { %v2983_v35 = vpop.eup %2982 }
 0x224   :  { %v1226_v57 = vmul.f32 %v2983_v35, %v1221_v54 }
 0x226   :  { %v1357_v56 = vpack.c.bf16 %v1226_v57, %v1226_v57 }
 0x227   :  { %v1264_v11 = vpop.f32.mrf.mxu2  ;;  %v1277_v23 = vpop.f32.mrf.mxu3 }
 0x228   :  { %1372 = vmatmul.bf16.vlgmr.msrb.gmra.mxu0 %v1357_v56  ;;  %1385 = vmatmul.bf16.vlgmr.msrb.gmra.mxu1 %v1357_v56  ;;  %v4842_v23 = vld [vmem:[#allocation88_spill] sm:$0xff] }
 0x229   :  { %1398 = vmatmul.bf16.vlgmr.msrb.gmra.mxu2 %v1357_v56  ;;  %1411 = vmatmul.bf16.vlgmr.msrb.gmra.mxu3 %v1357_v56 }
 0x22a   :  { %1494 = vmatpush.bf16.msrb.mxu0 %v3509_v51  ;;  %1507 = vmatpush.bf16.msrb.mxu1 %v4776_v9 }
 0x22b   :  { %1520 = vmatpush.bf16.msrb.mxu2 %v4777_v15  ;;  %1533 = vmatpush.bf16.msrb.mxu3 %v4778_v49 }
 0x22e   :  { %1495 = vmatpush.bf16.msrb.mxu0 %v4835_v45  ;;  %1508 = vmatpush.bf16.msrb.mxu1 %v4836_v50 }
 0x22f   :  { %1521 = vmatpush.bf16.msrb.mxu2 %v4837_v41  ;;  %1534 = vmatpush.bf16.msrb.mxu3 %v4838_v0 }
 0x232   :  { %1496 = vmatpush.bf16.msrb.mxu0 %v4840_v60  ;;  %1509 = vmatpush.bf16.msrb.mxu1 %v4841_v13 }
 0x233   :  { %1522 = vmatpush.bf16.msrb.mxu2 %v4784_v18  ;;  %1535 = vmatpush.bf16.msrb.mxu3 %v4785_v43 }
 0x236   :  { %v1292_v63 = vpop.f32.mrf.mxu0  ;;  %v1305_v58 = vpop.f32.mrf.mxu1  ;;  %1497 = vmatpush.bf16.msrb.mxu0 %v4786_v30  ;;  %1510 = vmatpush.bf16.msrb.mxu1 %v4842_v23 }
 0x237   :  { %v1335_v54 = vadd.f32 %v1292_v63, %v1279_v19  ;;  %v1336_v35 = vadd.f32 %v1305_v58, %v1280_v32  ;;  %1523 = vmatpush.bf16.msrb.mxu2 %v4788_v10  ;;  %1536 = vmatpush.bf16.msrb.mxu3 %v4789_v42 }
 0x238   :  { %1446 = vmatmul.bf16.vlgmr.msra.gmra.mxu0 %v1357_v56  ;;  %1459 = vmatmul.bf16.vlgmr.msra.gmra.mxu1 %v1357_v56 }
 0x239   :  { %v1339_v57 = vmul.f32 0.5, %v1335_v54  ;;  %v1343_v11 = vmul.f32 0.5, %v1336_v35  ;;  %1472 = vmatmul.bf16.vlgmr.msra.gmra.mxu2 %v1357_v56  ;;  %1485 = vmatmul.bf16.vlgmr.msra.gmra.mxu3 %v1357_v56 }
 0x23a   :  { %1498 = vmatpush.bf16.msrb.mxu0 %v4737_v28  ;;  %1511 = vmatpush.bf16.msrb.mxu1 %v4738_v61 }
 0x23b   :  { %2984 = vtanh.f32 %v1339_v57  ;;  %1524 = vmatpush.bf16.msrb.mxu2 %v4739_v31  ;;  %1537 = vmatpush.bf16.msrb.mxu3 %v4740_v36 }
 0x23c   :  { %2986 = vtanh.f32 %v1343_v11 }
 0x23d   :  { %v1318_v19 = vpop.f32.mrf.mxu2  ;;  %v1331_v32 = vpop.f32.mrf.mxu3 }
 0x23e   :  { %v1337_v63 = vadd.f32 %v1318_v19, %v1281_v46  ;;  %v1338_v58 = vadd.f32 %v1331_v32, %v1282_v2  ;;  %v1294_v54 = vpop.f32.mrf.mxu0  ;;  %v1307_v35 = vpop.f32.mrf.mxu1  ;;  %1499 = vmatpush.bf16.msrb.mxu0 %v4741_v1  ;;  %1512 = vmatpush.bf16.msrb.mxu1 %v3586_v14 }
 0x23f   :  { %1525 = vmatpush.bf16.msrb.mxu2 %v3590_v4  ;;  %1538 = vmatpush.bf16.msrb.mxu3 %v3592_v22 }
 0x240   :  { %2988 = vtanh.f32 %v1337_v63  ;;  %v1348_v5 = vmul.f32 0.5, %v1338_v58 }
 0x241   :  { %v2985_v26 = vpop.eup %2984 }
 0x242   :  { %v2987_v57 = vpop.eup %2986  ;;  %v1341_v11 = vadd.f32 1.0, %v2985_v26  ;;  %2990 = vtanh.f32 %v1348_v5  ;;  %1500 = vmatpush.bf16.msrb.mxu0 %v3595_v20  ;;  %1513 = vmatpush.bf16.msrb.mxu1 %v3598_v39 }
 0x243   :  { %v1345_v56 = vadd.f32 1.0, %v2987_v57  ;;  %1526 = vmatpush.bf16.msrb.mxu2 %v3602_v48  ;;  %1539 = vmatpush.bf16.msrb.mxu3 %v3604_v24 }
 0x244   :  { %v1342_v46 = vmul.f32 0.5, %v1341_v11 }
 0x245   :  { %v1346_v2 = vmul.f32 0.5, %v1345_v56  ;;  %v1320_v19 = vpop.f32.mrf.mxu2  ;;  %v1333_v32 = vpop.f32.mrf.mxu3 }
 0x246   :  { %v2989_v54 = vpop.eup %2988  ;;  %1501 = vmatpush.bf16.msrb.mxu0 %v3607_v55  ;;  %1514 = vmatpush.bf16.msrb.mxu1 %v3610_v59  ;;  %v4845_v19 = vld [vmem:[#allocation26_spill] sm:$0xff]  ;;  %v4846_v32 = vld [vmem:[#allocation27_spill] sm:$0xff] }
 0x247   :  { %v1352_v63 = vmul.f32 %v1346_v2, %v3862_v53  ;;  %v1353_v58 = vmul.f32 %v2989_v54, %v1342_v46  ;;  %1527 = vmatpush.bf16.msrb.mxu2 %v3614_v52  ;;  %1540 = vmatpush.bf16.msrb.mxu3 %v3616_v27  ;;  %v4843_v46 = vld [vmem:[#allocation24_spill] sm:$0xff]  ;;  %v4844_v2 = vld [vmem:[#allocation25_spill] sm:$0xff] }
 0x248   :  { %v2991_v35 = vpop.eup %2990  ;;  %v4847_v54 = vld [vmem:[#allocation28_spill] sm:$0xff] }
 0x249   :  { %v3982_v5 = vadd.f32 %v1353_v58, %v1352_v63  ;;  %v1350_v26 = vadd.f32 1.0, %v2991_v35  ;;  %v4848_v63 = vld [vmem:[#allocation29_spill] sm:$0xff]  ;;  %v4849_v58 = vld [vmem:[#allocation30_spill] sm:$0xff]  ;;  %v4850_v35 = vld [vmem:[#allocation31_spill] sm:$0xff] }
 0x24a   :  { %1575 = vmatpush.bf16.msra.mxu0 %v3309_v3  ;;  %1588 = vmatpush.bf16.msra.mxu1 %v3311_v7 }
 0x24b   :  { %2992 = vtanh.f32 %v3982_v5  ;;  %1601 = vmatpush.bf16.msra.mxu2 %v3313_v8  ;;  %1614 = vmatpush.bf16.msra.mxu3 %v3316_v12  ;;  %v1351_v53 = vmul.f32 0.5, %v1350_v26  ;;  %v4851_v26 = vld [vmem:[#allocation32_spill] sm:$0xff] }
 0x24e   :  { %1576 = vmatpush.bf16.msra.mxu0 %v3320_v16  ;;  %1589 = vmatpush.bf16.msra.mxu1 %v3322_v17 }
 0x24f   :  { %1602 = vmatpush.bf16.msra.mxu2 %v3325_v21  ;;  %1615 = vmatpush.bf16.msra.mxu3 %v3327_v25 }
 0x251   :  { %v2993_v57 = vpop.eup %2992 }
 0x252   :  { %v1356_v11 = vmul.f32 %v2993_v57, %v1351_v53  ;;  %1577 = vmatpush.bf16.msra.mxu0 %v3330_v29  ;;  %1590 = vmatpush.bf16.msra.mxu1 %v3334_v33  ;;  %v4852_v53 = vld [vmem:[#allocation33_spill] sm:$0xff]  ;;  %v4853_v57 = vld [vmem:[#allocation34_spill] sm:$0xff] }
 0x253   :  { %1603 = vmatpush.bf16.msra.mxu2 %v3336_v34  ;;  %1616 = vmatpush.bf16.msra.mxu3 %v3339_v38 }
 0x254   :  { %v1358_v56 = vpack.c.bf16 %v1356_v11, %v1356_v11  ;;  %v4854_v11 = vld [vmem:[#allocation35_spill] sm:$0xff] }
 0x256   :  { %1502 = vmatmul.bf16.vlgmr.msrb.gmra.mxu0 %v1358_v56  ;;  %1515 = vmatmul.bf16.vlgmr.msrb.gmra.mxu1 %v1358_v56 }
 0x257   :  { %1528 = vmatmul.bf16.vlgmr.msrb.gmra.mxu2 %v1358_v56  ;;  %1541 = vmatmul.bf16.vlgmr.msrb.gmra.mxu3 %v1358_v56  ;;  %v4855_v56 = vld [vmem:[#allocation36_spill] sm:$0xff] }
 0x258   :  { %1578 = vmatpush.bf16.msra.mxu0 %v3342_v44  ;;  %1591 = vmatpush.bf16.msra.mxu1 %v4843_v46 }
 0x259   :  { %1604 = vmatpush.bf16.msra.mxu2 %v4844_v2  ;;  %1617 = vmatpush.bf16.msra.mxu3 %v4845_v19  ;;  %v4856_v19 = vld [vmem:[#allocation37_spill] sm:$0xff] }
 0x25c   :  { %1579 = vmatpush.bf16.msra.mxu0 %v4846_v32  ;;  %1592 = vmatpush.bf16.msra.mxu1 %v4847_v54  ;;  %v4857_v32 = vld [vmem:[#allocation38_spill] sm:$0xff]  ;;  %v4858_v54 = vld [vmem:[#allocation39_spill] sm:$0xff] }
 0x25d   :  { %1605 = vmatpush.bf16.msra.mxu2 %v4848_v63  ;;  %1618 = vmatpush.bf16.msra.mxu3 %v4849_v58  ;;  %v4859_v63 = vld [vmem:[#allocation40_spill] sm:$0xff]  ;;  %v4860_v58 = vld [vmem:[#allocation41_spill] sm:$0xff] }
 0x260   :  { %1580 = vmatpush.bf16.msra.mxu0 %v4850_v35  ;;  %1593 = vmatpush.bf16.msra.mxu1 %v4851_v26  ;;  %v4861_v35 = vld [vmem:[#allocation42_spill] sm:$0xff]  ;;  %v4862_v26 = vld [vmem:[#allocation43_spill] sm:$0xff] }
 0x261   :  { %1606 = vmatpush.bf16.msra.mxu2 %v4852_v53  ;;  %1619 = vmatpush.bf16.msra.mxu3 %v4853_v57  ;;  %v4863_v53 = vld [vmem:[#allocation44_spill] sm:$0xff]  ;;  %v4864_v57 = vld [vmem:[#allocation45_spill] sm:$0xff] }
 0x264   :  { %1581 = vmatpush.bf16.msra.mxu0 %v4854_v11  ;;  %1594 = vmatpush.bf16.msra.mxu1 %v4855_v56  ;;  %v4865_v11 = vld [vmem:[#allocation46_spill] sm:$0xff]  ;;  %v4866_v56 = vld [vmem:[#allocation47_spill] sm:$0xff] }
 0x265   :  { %1607 = vmatpush.bf16.msra.mxu2 %v4856_v19  ;;  %1620 = vmatpush.bf16.msra.mxu3 %v4857_v32  ;;  %v4867_v19 = vld [vmem:[#allocation48_spill] sm:$0xff]  ;;  %v4868_v32 = vld [vmem:[#allocation49_spill] sm:$0xff] }
 0x268   :  { %1582 = vmatpush.bf16.msra.mxu0 %v4858_v54  ;;  %1595 = vmatpush.bf16.msra.mxu1 %v4859_v63  ;;  %v4869_v54 = vld [vmem:[#allocation50_spill] sm:$0xff]  ;;  %v4870_v63 = vld [vmem:[#allocation51_spill] sm:$0xff] }
 0x269   :  { %1608 = vmatpush.bf16.msra.mxu2 %v4860_v58  ;;  %1621 = vmatpush.bf16.msra.mxu3 %v4861_v35  ;;  %v4871_v58 = vld [vmem:[#allocation52_spill] sm:$0xff]  ;;  %v4872_v35 = vld [vmem:[#allocation53_spill] sm:$0xff] }
 0x26c   :  { %1649 = vmatpush.bf16.msrb.mxu0 %v4862_v26  ;;  %1662 = vmatpush.bf16.msrb.mxu1 %v4863_v53  ;;  %v4873_v26 = vld [vmem:[#allocation54_spill] sm:$0xff]  ;;  %v4874_v53 = vld [vmem:[#allocation56_spill] sm:$0xff] }
 0x26d   :  { %1675 = vmatpush.bf16.msrb.mxu2 %v4864_v57  ;;  %1688 = vmatpush.bf16.msrb.mxu3 %v4865_v11  ;;  %v4875_v57 = vld [vmem:[#allocation57_spill] sm:$0xff]  ;;  %v4876_v11 = vld [vmem:[#allocation58_spill] sm:$0xff] }
 0x270   :  { %1650 = vmatpush.bf16.msrb.mxu0 %v4866_v56  ;;  %1663 = vmatpush.bf16.msrb.mxu1 %v4867_v19  ;;  %v4877_v56 = vld [vmem:[#allocation59_spill] sm:$0xff]  ;;  %v4878_v19 = vld [vmem:[#allocation60_spill] sm:$0xff] }
 0x271   :  { %1676 = vmatpush.bf16.msrb.mxu2 %v4868_v32  ;;  %1689 = vmatpush.bf16.msrb.mxu3 %v4869_v54  ;;  %v4879_v32 = vld [vmem:[#allocation61_spill] sm:$0xff]  ;;  %v4880_v54 = vld [vmem:[#allocation62_spill] sm:$0xff] }
 0x274   :  { %1651 = vmatpush.bf16.msrb.mxu0 %v4870_v63  ;;  %1664 = vmatpush.bf16.msrb.mxu1 %v4871_v58  ;;  %v4881_v63 = vld [vmem:[#allocation63_spill] sm:$0xff]  ;;  %v4882_v58 = vld [vmem:[#allocation64_spill] sm:$0xff] }
 0x275   :  { %1677 = vmatpush.bf16.msrb.mxu2 %v4872_v35  ;;  %1690 = vmatpush.bf16.msrb.mxu3 %v4873_v26  ;;  %v4883_v35 = vld [vmem:[#allocation65_spill] sm:$0xff]  ;;  %v4884_v26 = vld [vmem:[#allocation66_spill] sm:$0xff] }
 0x278   :  { %1652 = vmatpush.bf16.msrb.mxu0 %v4874_v53  ;;  %1665 = vmatpush.bf16.msrb.mxu1 %v4875_v57  ;;  %v4885_v53 = vld [vmem:[#allocation67_spill] sm:$0xff]  ;;  %v4886_v57 = vld [vmem:[#allocation68_spill] sm:$0xff] }
 0x279   :  { %1678 = vmatpush.bf16.msrb.mxu2 %v4876_v11  ;;  %1691 = vmatpush.bf16.msrb.mxu3 %v4877_v56  ;;  %v4887_v11 = vld [vmem:[#allocation69_spill] sm:$0xff]  ;;  %v4888_v56 = vld [vmem:[#allocation70_spill] sm:$0xff] }
 0x27c   :  { %1653 = vmatpush.bf16.msrb.mxu0 %v4878_v19  ;;  %1666 = vmatpush.bf16.msrb.mxu1 %v4879_v32  ;;  %v4889_v19 = vld [vmem:[#allocation71_spill] sm:$0xff]  ;;  %v4890_v32 = vld [vmem:[#allocation72_spill] sm:$0xff] }
 0x27d   :  { %1679 = vmatpush.bf16.msrb.mxu2 %v4880_v54  ;;  %1692 = vmatpush.bf16.msrb.mxu3 %v4881_v63  ;;  %v4891_v54 = vld [vmem:[#allocation73_spill] sm:$0xff]  ;;  %v4892_v63 = vld [vmem:[#allocation74_spill] sm:$0xff] }
 0x280   :  { %1654 = vmatpush.bf16.msrb.mxu0 %v4882_v58  ;;  %1667 = vmatpush.bf16.msrb.mxu1 %v4883_v35  ;;  %v4893_v58 = vld [vmem:[#allocation75_spill] sm:$0xff] }
 0x281   :  { %1680 = vmatpush.bf16.msrb.mxu2 %v4884_v26  ;;  %1693 = vmatpush.bf16.msrb.mxu3 %v4885_v53  ;;  %v2800_v53 = vld [vmem:[%s4442_s0 + $0x80] sm:$0xff] }
 0x284   :  { %1655 = vmatpush.bf16.msrb.mxu0 %v4886_v57  ;;  %1668 = vmatpush.bf16.msrb.mxu1 %v4887_v11  ;;  %v2801_v11 = vld [vmem:[%s4442_s0 + $0x88] sm:$0xff] }
 0x285   :  { %1681 = vmatpush.bf16.msrb.mxu2 %v4888_v56  ;;  %1694 = vmatpush.bf16.msrb.mxu3 %v4889_v19 }
 0x288   :  { %1656 = vmatpush.bf16.msrb.mxu0 %v4890_v32  ;;  %1669 = vmatpush.bf16.msrb.mxu1 %v4891_v54 }
 0x289   :  { %1682 = vmatpush.bf16.msrb.mxu2 %v4892_v63  ;;  %1695 = vmatpush.bf16.msrb.mxu3 %v4893_v58  ;;  %v2802_v63 = vld [vmem:[%s4442_s0 + $0x90] sm:$0xff]  ;;  %v2803_v58 = vld [vmem:[%s4442_s0 + $0x98] sm:$0xff] }
 0x2a5   :  { %v1373_v57 = vpop.f32.mrf.mxu0  ;;  %v1386_v56 = vpop.f32.mrf.mxu1 }
 0x2a6   :  { %v1416_v26 = vadd.f32 %v2800_v53, %v1373_v57  ;;  %v1417_v19 = vadd.f32 %v2801_v11, %v1386_v56 }
 0x2a8   :  { %v1420_v35 = vmul.f32 0.5, %v1416_v26  ;;  %v1424_v32 = vmul.f32 0.5, %v1417_v19 }
 0x2aa   :  { %2994 = vtanh.f32 %v1420_v35 }
 0x2ab   :  { %2996 = vtanh.f32 %v1424_v32 }
 0x2ac   :  { %v1399_v54 = vpop.f32.mrf.mxu2  ;;  %v1412_v2 = vpop.f32.mrf.mxu3 }
 0x2ad   :  { %v1418_v46 = vadd.f32 %v2802_v63, %v1399_v54  ;;  %v1419_v44 = vadd.f32 %v2803_v58, %v1412_v2  ;;  %v1375_v38 = vpop.f32.mrf.mxu0  ;;  %v1388_v34 = vpop.f32.mrf.mxu1 }
 0x2af   :  { %2998 = vtanh.f32 %v1418_v46  ;;  %v1429_v53 = vmul.f32 0.5, %v1419_v44 }
 0x2b0   :  { %v2995_v26 = vpop.eup %2994 }
 0x2b1   :  { %v2997_v19 = vpop.eup %2996  ;;  %v1422_v35 = vadd.f32 1.0, %v2995_v26  ;;  %3000 = vtanh.f32 %v1429_v53 }
 0x2b2   :  { %v1426_v57 = vadd.f32 1.0, %v2997_v19 }
 0x2b3   :  { %v1423_v11 = vmul.f32 0.5, %v1422_v35 }
 0x2b4   :  { %v1427_v56 = vmul.f32 0.5, %v1426_v57  ;;  %v1401_v33 = vpop.f32.mrf.mxu2  ;;  %v1414_v29 = vpop.f32.mrf.mxu3 }
 0x2b5   :  { %v2999_v25 = vpop.eup %2998  ;;  %v1447_v21 = vpop.f32.mrf.mxu0 }
 0x2b6   :  { %v1460_v32 = vpop.f32.mrf.mxu1  ;;  %v1433_v17 = vmul.f32 %v1427_v56, %v3946_v62  ;;  %v1434_v54 = vmul.f32 %v2999_v25, %v1423_v11 }
 0x2b7   :  { %v3001_v2 = vpop.eup %3000  ;;  %v1491_v25 = vadd.f32 %v1460_v32, %v4839_v47 }
 0x2b8   :  { %v4066_v38 = vadd.f32 %v1434_v54, %v1433_v17  ;;  %v1431_v34 = vadd.f32 1.0, %v3001_v2  ;;  %v1490_v17 = vadd.f32 %v1447_v21, %v3706_v37 }
 0x2ba   :  { %3002 = vtanh.f32 %v4066_v38  ;;  %v1432_v53 = vmul.f32 0.5, %v1431_v34 }
 0x2bc   :  { %v1473_v44 = vpop.f32.mrf.mxu2  ;;  %v1486_v46 = vpop.f32.mrf.mxu3 }
 0x2bd   :  { %v1449_v63 = vpop.f32.mrf.mxu0  ;;  %v1492_v21 = vadd.f32 %v1473_v44, %v4790_v40  ;;  %v1493_v32 = vadd.f32 %v1486_v46, %v4791_v6 }
 0x2be   :  { %v1462_v58 = vpop.f32.mrf.mxu1 }
 0x2c0   :  { %v3003_v26 = vpop.eup %3002 }
 0x2c1   :  { %v1437_v33 = vmul.f32 %v3003_v26, %v1432_v53 }
 0x2c3   :  { %v1568_v29 = vpack.c.bf16 %v1437_v33, %v1437_v33 }
 0x2c4   :  { %v1475_v19 = vpop.f32.mrf.mxu2  ;;  %v1488_v35 = vpop.f32.mrf.mxu3 }
 0x2c5   :  { %1583 = vmatmul.bf16.vlgmr.msra.gmra.mxu0 %v1568_v29  ;;  %1596 = vmatmul.bf16.vlgmr.msra.gmra.mxu1 %v1568_v29 }
 0x2c6   :  { %1609 = vmatmul.bf16.vlgmr.msra.gmra.mxu2 %v1568_v29  ;;  %1622 = vmatmul.bf16.vlgmr.msra.gmra.mxu3 %v1568_v29 }
 0x2c7   :  { %1705 = vmatpush.bf16.msra.mxu0 %v3509_v51  ;;  %1718 = vmatpush.bf16.msra.mxu1 %v4776_v9 }
 0x2c8   :  { %1731 = vmatpush.bf16.msra.mxu2 %v4777_v15  ;;  %1744 = vmatpush.bf16.msra.mxu3 %v4778_v49 }
 0x2cb   :  { %1706 = vmatpush.bf16.msra.mxu0 %v4835_v45  ;;  %1719 = vmatpush.bf16.msra.mxu1 %v4836_v50 }
 0x2cc   :  { %1732 = vmatpush.bf16.msra.mxu2 %v4837_v41  ;;  %1745 = vmatpush.bf16.msra.mxu3 %v4838_v0 }
 0x2cf   :  { %1707 = vmatpush.bf16.msra.mxu0 %v4840_v60  ;;  %1720 = vmatpush.bf16.msra.mxu1 %v4841_v13 }
 0x2d0   :  { %1733 = vmatpush.bf16.msra.mxu2 %v4784_v18  ;;  %1746 = vmatpush.bf16.msra.mxu3 %v4785_v43 }
 0x2d3   :  { %v1503_v62 = vpop.f32.mrf.mxu0  ;;  %v1516_v57 = vpop.f32.mrf.mxu1  ;;  %1708 = vmatpush.bf16.msra.mxu0 %v4786_v30  ;;  %1721 = vmatpush.bf16.msra.mxu1 %v4842_v23 }
 0x2d4   :  { %v1546_v11 = vadd.f32 %v1503_v62, %v1490_v17  ;;  %v1547_v56 = vadd.f32 %v1516_v57, %v1491_v25  ;;  %1734 = vmatpush.bf16.msra.mxu2 %v4788_v10  ;;  %1747 = vmatpush.bf16.msra.mxu3 %v4789_v42 }
 0x2d5   :  { %1657 = vmatmul.bf16.vlgmr.msrb.gmra.mxu0 %v1568_v29  ;;  %1670 = vmatmul.bf16.vlgmr.msrb.gmra.mxu1 %v1568_v29 }
 0x2d6   :  { %v1550_v54 = vmul.f32 0.5, %v1546_v11  ;;  %v1554_v2 = vmul.f32 0.5, %v1547_v56  ;;  %1683 = vmatmul.bf16.vlgmr.msrb.gmra.mxu2 %v1568_v29  ;;  %1696 = vmatmul.bf16.vlgmr.msrb.gmra.mxu3 %v1568_v29 }
 0x2d7   :  { %1709 = vmatpush.bf16.msra.mxu0 %v4737_v28  ;;  %1722 = vmatpush.bf16.msra.mxu1 %v4738_v61 }
 0x2d8   :  { %3004 = vtanh.f32 %v1550_v54  ;;  %1735 = vmatpush.bf16.msra.mxu2 %v4739_v31  ;;  %1748 = vmatpush.bf16.msra.mxu3 %v4740_v36 }
 0x2d9   :  { %3006 = vtanh.f32 %v1554_v2 }
 0x2da   :  { %v1529_v34 = vpop.f32.mrf.mxu2  ;;  %v1542_v63 = vpop.f32.mrf.mxu3 }
 0x2db   :  { %v1548_v58 = vadd.f32 %v1529_v34, %v1492_v21  ;;  %v1549_v53 = vadd.f32 %v1542_v63, %v1493_v32  ;;  %v1505_v26 = vpop.f32.mrf.mxu0  ;;  %v1518_v33 = vpop.f32.mrf.mxu1  ;;  %1710 = vmatpush.bf16.msra.mxu0 %v4741_v1  ;;  %1723 = vmatpush.bf16.msra.mxu1 %v3586_v14  ;;  %v4894_v34 = vld [vmem:[#allocation16_spill] sm:$0xff] }
 0x2dc   :  { %1736 = vmatpush.bf16.msra.mxu2 %v3590_v4  ;;  %1749 = vmatpush.bf16.msra.mxu3 %v3592_v22 }
 0x2dd   :  { %3008 = vtanh.f32 %v1548_v58  ;;  %v1559_v44 = vmul.f32 0.5, %v1549_v53  ;;  %v4895_v58 = vld [vmem:[#allocation17_spill] sm:$0xff]  ;;  %v4896_v53 = vld [vmem:[#allocation18_spill] sm:$0xff] }
 0x2de   :  { %v3005_v46 = vpop.eup %3004 }
 0x2df   :  { %v3007_v19 = vpop.eup %3006  ;;  %v1552_v35 = vadd.f32 1.0, %v3005_v46  ;;  %3010 = vtanh.f32 %v1559_v44  ;;  %1711 = vmatpush.bf16.msra.mxu0 %v3595_v20  ;;  %1724 = vmatpush.bf16.msra.mxu1 %v3598_v39  ;;  %v4897_v44 = vld [vmem:[#allocation19_spill] sm:$0xff]  ;;  %v4898_v46 = vld [vmem:[#allocation20_spill] sm:$0xff] }
 0x2e0   :  { %v1556_v29 = vadd.f32 1.0, %v3007_v19  ;;  %1737 = vmatpush.bf16.msra.mxu2 %v3602_v48  ;;  %1750 = vmatpush.bf16.msra.mxu3 %v3604_v24  ;;  %v4899_v19 = vld [vmem:[#allocation21_spill] sm:$0xff] }
 0x2e1   :  { %v1553_v17 = vmul.f32 0.5, %v1552_v35  ;;  %v4900_v35 = vld [vmem:[#allocation22_spill] sm:$0xff] }
 0x2e2   :  { %v1557_v25 = vmul.f32 0.5, %v1556_v29  ;;  %v1531_v62 = vpop.f32.mrf.mxu2  ;;  %v1544_v57 = vpop.f32.mrf.mxu3  ;;  %v4901_v29 = vld [vmem:[#allocation23_spill] sm:$0xff] }
 0x2e3   :  { %v3009_v11 = vpop.eup %3008  ;;  %1712 = vmatpush.bf16.msra.mxu0 %v3607_v55  ;;  %1725 = vmatpush.bf16.msra.mxu1 %v3610_v59  ;;  %v4904_v62 = vld [vmem:[#allocation26_spill] sm:$0xff]  ;;  %v4905_v57 = vld [vmem:[#allocation27_spill] sm:$0xff] }
 0x2e4   :  { %v1563_v56 = vmul.f32 %v1557_v25, %v3982_v5  ;;  %v1564_v54 = vmul.f32 %v3009_v11, %v1553_v17  ;;  %1738 = vmatpush.bf16.msra.mxu2 %v3614_v52  ;;  %1751 = vmatpush.bf16.msra.mxu3 %v3616_v27  ;;  %v4902_v17 = vld [vmem:[#allocation24_spill] sm:$0xff]  ;;  %v4903_v25 = vld [vmem:[#allocation25_spill] sm:$0xff] }
 0x2e5   :  { %v3011_v2 = vpop.eup %3010  ;;  %v4906_v11 = vld [vmem:[#allocation28_spill] sm:$0xff] }
 0x2e6   :  { %v4102_v21 = vadd.f32 %v1564_v54, %v1563_v56  ;;  %v1561_v32 = vadd.f32 1.0, %v3011_v2  ;;  %v4907_v56 = vld [vmem:[#allocation29_spill] sm:$0xff]  ;;  %v4908_v54 = vld [vmem:[#allocation30_spill] sm:$0xff]  ;;  %v4909_v2 = vld [vmem:[#allocation31_spill] sm:$0xff] }
 0x2e7   :  { %1786 = vmatpush.bf16.msrb.mxu0 %v3309_v3  ;;  %1799 = vmatpush.bf16.msrb.mxu1 %v3311_v7 }
 0x2e8   :  { %3012 = vtanh.f32 %v4102_v21  ;;  %1812 = vmatpush.bf16.msrb.mxu2 %v3313_v8  ;;  %1825 = vmatpush.bf16.msrb.mxu3 %v3316_v12  ;;  %v1562_v5 = vmul.f32 0.5, %v1561_v32  ;;  %v4910_v32 = vld [vmem:[#allocation32_spill] sm:$0xff] }
 0x2eb   :  { %1787 = vmatpush.bf16.msrb.mxu0 %v3320_v16  ;;  %1800 = vmatpush.bf16.msrb.mxu1 %v4894_v34 }
 0x2ec   :  { %1813 = vmatpush.bf16.msrb.mxu2 %v4895_v58  ;;  %1826 = vmatpush.bf16.msrb.mxu3 %v4896_v53 }
 0x2ee   :  { %v3013_v63 = vpop.eup %3012 }
 0x2ef   :  { %v1567_v26 = vmul.f32 %v3013_v63, %v1562_v5  ;;  %1788 = vmatpush.bf16.msrb.mxu0 %v4897_v44  ;;  %1801 = vmatpush.bf16.msrb.mxu1 %v4898_v46  ;;  %v4911_v5 = vld [vmem:[#allocation33_spill] sm:$0xff]  ;;  %v4912_v63 = vld [vmem:[#allocation34_spill] sm:$0xff] }
 0x2f0   :  { %1814 = vmatpush.bf16.msrb.mxu2 %v4899_v19  ;;  %1827 = vmatpush.bf16.msrb.mxu3 %v4900_v35 }
 0x2f1   :  { %v1569_v33 = vpack.c.bf16 %v1567_v26, %v1567_v26  ;;  %v4913_v26 = vld [vmem:[#allocation35_spill] sm:$0xff] }
 0x2f3   :  { %1713 = vmatmul.bf16.vlgmr.msra.gmra.mxu0 %v1569_v33  ;;  %1726 = vmatmul.bf16.vlgmr.msra.gmra.mxu1 %v1569_v33 }
 0x2f4   :  { %1739 = vmatmul.bf16.vlgmr.msra.gmra.mxu2 %v1569_v33  ;;  %1752 = vmatmul.bf16.vlgmr.msra.gmra.mxu3 %v1569_v33  ;;  %v4914_v33 = vld [vmem:[#allocation36_spill] sm:$0xff] }
 0x2f5   :  { %1789 = vmatpush.bf16.msrb.mxu0 %v4901_v29  ;;  %1802 = vmatpush.bf16.msrb.mxu1 %v4902_v17 }
 0x2f6   :  { %1815 = vmatpush.bf16.msrb.mxu2 %v4903_v25  ;;  %1828 = vmatpush.bf16.msrb.mxu3 %v4904_v62  ;;  %v4915_v62 = vld [vmem:[#allocation37_spill] sm:$0xff] }
 0x2f9   :  { %1790 = vmatpush.bf16.msrb.mxu0 %v4905_v57  ;;  %1803 = vmatpush.bf16.msrb.mxu1 %v4906_v11  ;;  %v4916_v57 = vld [vmem:[#allocation38_spill] sm:$0xff]  ;;  %v4917_v11 = vld [vmem:[#allocation39_spill] sm:$0xff] }
 0x2fa   :  { %1816 = vmatpush.bf16.msrb.mxu2 %v4907_v56  ;;  %1829 = vmatpush.bf16.msrb.mxu3 %v4908_v54  ;;  %v4918_v56 = vld [vmem:[#allocation40_spill] sm:$0xff]  ;;  %v4919_v54 = vld [vmem:[#allocation41_spill] sm:$0xff] }
 0x2fd   :  { %1791 = vmatpush.bf16.msrb.mxu0 %v4909_v2  ;;  %1804 = vmatpush.bf16.msrb.mxu1 %v4910_v32  ;;  %v4920_v2 = vld [vmem:[#allocation42_spill] sm:$0xff]  ;;  %v4921_v32 = vld [vmem:[#allocation43_spill] sm:$0xff] }
 0x2fe   :  { %1817 = vmatpush.bf16.msrb.mxu2 %v4911_v5  ;;  %1830 = vmatpush.bf16.msrb.mxu3 %v4912_v63  ;;  %v4922_v5 = vld [vmem:[#allocation44_spill] sm:$0xff]  ;;  %v4923_v63 = vld [vmem:[#allocation45_spill] sm:$0xff] }
 0x301   :  { %1792 = vmatpush.bf16.msrb.mxu0 %v4913_v26  ;;  %1805 = vmatpush.bf16.msrb.mxu1 %v4914_v33  ;;  %v4924_v26 = vld [vmem:[#allocation46_spill] sm:$0xff]  ;;  %v4925_v33 = vld [vmem:[#allocation47_spill] sm:$0xff] }
 0x302   :  { %1818 = vmatpush.bf16.msrb.mxu2 %v4915_v62  ;;  %1831 = vmatpush.bf16.msrb.mxu3 %v4916_v57  ;;  %v4926_v62 = vld [vmem:[#allocation48_spill] sm:$0xff]  ;;  %v4927_v57 = vld [vmem:[#allocation49_spill] sm:$0xff] }
 0x305   :  { %1793 = vmatpush.bf16.msrb.mxu0 %v4917_v11  ;;  %1806 = vmatpush.bf16.msrb.mxu1 %v4918_v56  ;;  %v4928_v11 = vld [vmem:[#allocation50_spill] sm:$0xff]  ;;  %v4929_v56 = vld [vmem:[#allocation51_spill] sm:$0xff] }
 0x306   :  { %1819 = vmatpush.bf16.msrb.mxu2 %v4919_v54  ;;  %1832 = vmatpush.bf16.msrb.mxu3 %v4920_v2  ;;  %v4930_v54 = vld [vmem:[#allocation52_spill] sm:$0xff]  ;;  %v4931_v2 = vld [vmem:[#allocation53_spill] sm:$0xff] }
 0x309   :  { %1860 = vmatpush.bf16.msra.mxu0 %v4921_v32  ;;  %1873 = vmatpush.bf16.msra.mxu1 %v4922_v5  ;;  %v4932_v32 = vld [vmem:[#allocation54_spill] sm:$0xff]  ;;  %v4933_v5 = vld [vmem:[#allocation56_spill] sm:$0xff] }
 0x30a   :  { %1886 = vmatpush.bf16.msra.mxu2 %v4923_v63  ;;  %1899 = vmatpush.bf16.msra.mxu3 %v4924_v26  ;;  %v4934_v63 = vld [vmem:[#allocation57_spill] sm:$0xff]  ;;  %v4935_v26 = vld [vmem:[#allocation58_spill] sm:$0xff] }
 0x30d   :  { %1861 = vmatpush.bf16.msra.mxu0 %v4925_v33  ;;  %1874 = vmatpush.bf16.msra.mxu1 %v4926_v62  ;;  %v4936_v33 = vld [vmem:[#allocation59_spill] sm:$0xff]  ;;  %v4937_v62 = vld [vmem:[#allocation60_spill] sm:$0xff] }
 0x30e   :  { %1887 = vmatpush.bf16.msra.mxu2 %v4927_v57  ;;  %1900 = vmatpush.bf16.msra.mxu3 %v4928_v11  ;;  %v4938_v57 = vld [vmem:[#allocation61_spill] sm:$0xff]  ;;  %v4939_v11 = vld [vmem:[#allocation62_spill] sm:$0xff] }
 0x311   :  { %1862 = vmatpush.bf16.msra.mxu0 %v4929_v56  ;;  %1875 = vmatpush.bf16.msra.mxu1 %v4930_v54  ;;  %v4940_v56 = vld [vmem:[#allocation63_spill] sm:$0xff]  ;;  %v4941_v54 = vld [vmem:[#allocation64_spill] sm:$0xff] }
 0x312   :  { %1888 = vmatpush.bf16.msra.mxu2 %v4931_v2  ;;  %1901 = vmatpush.bf16.msra.mxu3 %v4932_v32  ;;  %v4942_v2 = vld [vmem:[#allocation65_spill] sm:$0xff]  ;;  %v4943_v32 = vld [vmem:[#allocation66_spill] sm:$0xff] }
 0x315   :  { %1863 = vmatpush.bf16.msra.mxu0 %v4933_v5  ;;  %1876 = vmatpush.bf16.msra.mxu1 %v4934_v63  ;;  %v4944_v5 = vld [vmem:[#allocation67_spill] sm:$0xff]  ;;  %v4945_v63 = vld [vmem:[#allocation68_spill] sm:$0xff] }
 0x316   :  { %1889 = vmatpush.bf16.msra.mxu2 %v4935_v26  ;;  %1902 = vmatpush.bf16.msra.mxu3 %v4936_v33  ;;  %v4946_v26 = vld [vmem:[#allocation69_spill] sm:$0xff]  ;;  %v4947_v33 = vld [vmem:[#allocation70_spill] sm:$0xff] }
 0x319   :  { %1864 = vmatpush.bf16.msra.mxu0 %v4937_v62  ;;  %1877 = vmatpush.bf16.msra.mxu1 %v4938_v57  ;;  %v4948_v62 = vld [vmem:[#allocation71_spill] sm:$0xff]  ;;  %v4949_v57 = vld [vmem:[#allocation72_spill] sm:$0xff] }
 0x31a   :  { %1890 = vmatpush.bf16.msra.mxu2 %v4939_v11  ;;  %1903 = vmatpush.bf16.msra.mxu3 %v4940_v56  ;;  %v4950_v11 = vld [vmem:[#allocation73_spill] sm:$0xff]  ;;  %v4951_v56 = vld [vmem:[#allocation74_spill] sm:$0xff] }
 0x31d   :  { %1865 = vmatpush.bf16.msra.mxu0 %v4941_v54  ;;  %1878 = vmatpush.bf16.msra.mxu1 %v4942_v2  ;;  %v4952_v54 = vld [vmem:[#allocation75_spill] sm:$0xff] }
 0x31e   :  { %1891 = vmatpush.bf16.msra.mxu2 %v4943_v32  ;;  %1904 = vmatpush.bf16.msra.mxu3 %v4944_v5  ;;  %v2804_v5 = vld [vmem:[%s4442_s0 + $0xa0] sm:$0xff] }
 0x321   :  { %1866 = vmatpush.bf16.msra.mxu0 %v4945_v63  ;;  %1879 = vmatpush.bf16.msra.mxu1 %v4946_v26  ;;  %v2805_v26 = vld [vmem:[%s4442_s0 + $0xa8] sm:$0xff] }
 0x322   :  { %1892 = vmatpush.bf16.msra.mxu2 %v4947_v33  ;;  %1905 = vmatpush.bf16.msra.mxu3 %v4948_v62 }
 0x325   :  { %1867 = vmatpush.bf16.msra.mxu0 %v4949_v57  ;;  %1880 = vmatpush.bf16.msra.mxu1 %v4950_v11 }
 0x326   :  { %1893 = vmatpush.bf16.msra.mxu2 %v4951_v56  ;;  %1906 = vmatpush.bf16.msra.mxu3 %v4952_v54  ;;  %v2806_v56 = vld [vmem:[%s4442_s0 + $0xb0] sm:$0xff]  ;;  %v2807_v54 = vld [vmem:[%s4442_s0 + $0xb8] sm:$0xff] }
 0x342   :  { %v1584_v63 = vpop.f32.mrf.mxu0  ;;  %v1597_v33 = vpop.f32.mrf.mxu1 }
 0x343   :  { %v1627_v32 = vadd.f32 %v2804_v5, %v1584_v63  ;;  %v1628_v62 = vadd.f32 %v2805_v26, %v1597_v33 }
 0x345   :  { %v1631_v2 = vmul.f32 0.5, %v1627_v32  ;;  %v1635_v57 = vmul.f32 0.5, %v1628_v62 }
 0x347   :  { %3014 = vtanh.f32 %v1631_v2 }
 0x348   :  { %3016 = vtanh.f32 %v1635_v57 }
 0x349   :  { %v1610_v11 = vpop.f32.mrf.mxu2  ;;  %v1623_v25 = vpop.f32.mrf.mxu3 }
 0x34a   :  { %v1629_v17 = vadd.f32 %v2806_v56, %v1610_v11  ;;  %v1630_v29 = vadd.f32 %v2807_v54, %v1623_v25  ;;  %v1586_v35 = vpop.f32.mrf.mxu0  ;;  %v1599_v19 = vpop.f32.mrf.mxu1 }
 0x34c   :  { %3018 = vtanh.f32 %v1629_v17  ;;  %v1640_v5 = vmul.f32 0.5, %v1630_v29 }
 0x34d   :  { %v3015_v32 = vpop.eup %3014 }
 0x34e   :  { %v3017_v62 = vpop.eup %3016  ;;  %v1633_v2 = vadd.f32 1.0, %v3015_v32  ;;  %3020 = vtanh.f32 %v1640_v5 }
 0x34f   :  { %v1637_v63 = vadd.f32 1.0, %v3017_v62 }
 0x350   :  { %v1634_v26 = vmul.f32 0.5, %v1633_v2 }
 0x351   :  { %v1638_v33 = vmul.f32 0.5, %v1637_v63  ;;  %v1612_v46 = vpop.f32.mrf.mxu2  ;;  %v1625_v44 = vpop.f32.mrf.mxu3 }
 0x352   :  { %v3019_v53 = vpop.eup %3018  ;;  %v1658_v58 = vpop.f32.mrf.mxu0 }
 0x353   :  { %v1671_v57 = vpop.f32.mrf.mxu1  ;;  %v1644_v34 = vmul.f32 %v1638_v33, %v4066_v38  ;;  %v1645_v11 = vmul.f32 %v3019_v53, %v1634_v26  ;;  %v1701_v38 = vadd.f32 %v1658_v58, %v3706_v37 }
 0x354   :  { %v3021_v25 = vpop.eup %3020 }
 0x355   :  { %v4186_v35 = vadd.f32 %v1645_v11, %v1644_v34  ;;  %v1642_v19 = vadd.f32 1.0, %v3021_v25  ;;  %v1702_v34 = vadd.f32 %v1671_v57, %v4839_v47 }
 0x357   :  { %3022 = vtanh.f32 %v4186_v35  ;;  %v1643_v5 = vmul.f32 0.5, %v1642_v19 }
 0x359   :  { %v1684_v29 = vpop.f32.mrf.mxu2  ;;  %v1697_v17 = vpop.f32.mrf.mxu3 }
 0x35a   :  { %v1660_v56 = vpop.f32.mrf.mxu0  ;;  %v1703_v58 = vadd.f32 %v1684_v29, %v4790_v40  ;;  %v1704_v57 = vadd.f32 %v1697_v17, %v4791_v6 }
 0x35b   :  { %v1673_v54 = vpop.f32.mrf.mxu1 }
 0x35d   :  { %v3023_v32 = vpop.eup %3022 }
 0x35e   :  { %v1648_v46 = vmul.f32 %v3023_v32, %v1643_v5 }
 0x360   :  { %v1779_v44 = vpack.c.bf16 %v1648_v46, %v1648_v46 }
 0x361   :  { %v1686_v62 = vpop.f32.mrf.mxu2  ;;  %v1699_v2 = vpop.f32.mrf.mxu3 }
 0x362   :  { %1794 = vmatmul.bf16.vlgmr.msrb.gmra.mxu0 %v1779_v44  ;;  %1807 = vmatmul.bf16.vlgmr.msrb.gmra.mxu1 %v1779_v44 }
 0x363   :  { %1820 = vmatmul.bf16.vlgmr.msrb.gmra.mxu2 %v1779_v44  ;;  %1833 = vmatmul.bf16.vlgmr.msrb.gmra.mxu3 %v1779_v44 }
 0x364   :  { %1916 = vmatpush.bf16.msrb.mxu0 %v3509_v51  ;;  %1929 = vmatpush.bf16.msrb.mxu1 %v4776_v9 }
 0x365   :  { %1942 = vmatpush.bf16.msrb.mxu2 %v4777_v15  ;;  %1955 = vmatpush.bf16.msrb.mxu3 %v4778_v49 }
 0x368   :  { %1917 = vmatpush.bf16.msrb.mxu0 %v4835_v45  ;;  %1930 = vmatpush.bf16.msrb.mxu1 %v4836_v50 }
 0x369   :  { %1943 = vmatpush.bf16.msrb.mxu2 %v4837_v41  ;;  %1956 = vmatpush.bf16.msrb.mxu3 %v4838_v0 }
 0x36c   :  { %1918 = vmatpush.bf16.msrb.mxu0 %v4840_v60  ;;  %1931 = vmatpush.bf16.msrb.mxu1 %v4841_v13 }
 0x36d   :  { %1944 = vmatpush.bf16.msrb.mxu2 %v4784_v18  ;;  %1957 = vmatpush.bf16.msrb.mxu3 %v4785_v43 }
 0x370   :  { %v1714_v53 = vpop.f32.mrf.mxu0  ;;  %v1727_v63 = vpop.f32.mrf.mxu1  ;;  %1919 = vmatpush.bf16.msrb.mxu0 %v4786_v30  ;;  %1932 = vmatpush.bf16.msrb.mxu1 %v4842_v23 }
 0x371   :  { %v1757_v26 = vadd.f32 %v1714_v53, %v1701_v38  ;;  %v1758_v33 = vadd.f32 %v1727_v63, %v1702_v34  ;;  %1945 = vmatpush.bf16.msrb.mxu2 %v4788_v10  ;;  %1958 = vmatpush.bf16.msrb.mxu3 %v4789_v42 }
 0x372   :  { %1868 = vmatmul.bf16.vlgmr.msra.gmra.mxu0 %v1779_v44  ;;  %1881 = vmatmul.bf16.vlgmr.msra.gmra.mxu1 %v1779_v44 }
 0x373   :  { %v1761_v11 = vmul.f32 0.5, %v1757_v26  ;;  %v1765_v25 = vmul.f32 0.5, %v1758_v33  ;;  %1894 = vmatmul.bf16.vlgmr.msra.gmra.mxu2 %v1779_v44  ;;  %1907 = vmatmul.bf16.vlgmr.msra.gmra.mxu3 %v1779_v44 }
 0x374   :  { %1920 = vmatpush.bf16.msrb.mxu0 %v4737_v28  ;;  %1933 = vmatpush.bf16.msrb.mxu1 %v4738_v61 }
 0x375   :  { %3024 = vtanh.f32 %v1761_v11  ;;  %1946 = vmatpush.bf16.msrb.mxu2 %v4739_v31  ;;  %1959 = vmatpush.bf16.msrb.mxu3 %v4740_v36 }
 0x376   :  { %3026 = vtanh.f32 %v1765_v25 }
 0x377   :  { %v1740_v19 = vpop.f32.mrf.mxu2  ;;  %v1753_v56 = vpop.f32.mrf.mxu3 }
 0x378   :  { %v1759_v54 = vadd.f32 %v1740_v19, %v1703_v58  ;;  %v1760_v5 = vadd.f32 %v1753_v56, %v1704_v57  ;;  %v1716_v32 = vpop.f32.mrf.mxu0  ;;  %v1729_v46 = vpop.f32.mrf.mxu1  ;;  %1921 = vmatpush.bf16.msrb.mxu0 %v4741_v1  ;;  %1934 = vmatpush.bf16.msrb.mxu1 %v3586_v14  ;;  %v4953_v19 = vld [vmem:[#allocation16_spill] sm:$0xff] }
 0x379   :  { %1947 = vmatpush.bf16.msrb.mxu2 %v3590_v4  ;;  %1960 = vmatpush.bf16.msrb.mxu3 %v3592_v22 }
 0x37a   :  { %3028 = vtanh.f32 %v1759_v54  ;;  %v1770_v29 = vmul.f32 0.5, %v1760_v5  ;;  %v4954_v54 = vld [vmem:[#allocation17_spill] sm:$0xff]  ;;  %v4955_v5 = vld [vmem:[#allocation18_spill] sm:$0xff] }
 0x37b   :  { %v3025_v17 = vpop.eup %3024 }
 0x37c   :  { %v3027_v62 = vpop.eup %3026  ;;  %v1763_v2 = vadd.f32 1.0, %v3025_v17  ;;  %3030 = vtanh.f32 %v1770_v29  ;;  %1922 = vmatpush.bf16.msrb.mxu0 %v3595_v20  ;;  %1935 = vmatpush.bf16.msrb.mxu1 %v3598_v39  ;;  %v4956_v29 = vld [vmem:[#allocation19_spill] sm:$0xff]  ;;  %v4962_v17 = vld [vmem:[#allocation25_spill] sm:$0xff] }
 0x37d   :  { %v1767_v44 = vadd.f32 1.0, %v3027_v62  ;;  %1948 = vmatpush.bf16.msrb.mxu2 %v3602_v48  ;;  %1961 = vmatpush.bf16.msrb.mxu3 %v3604_v24  ;;  %v4963_v62 = vld [vmem:[#allocation26_spill] sm:$0xff] }
 0x37e   :  { %v1764_v38 = vmul.f32 0.5, %v1763_v2  ;;  %v4964_v2 = vld [vmem:[#allocation27_spill] sm:$0xff] }
 0x37f   :  { %v1768_v34 = vmul.f32 0.5, %v1767_v44  ;;  %v1742_v53 = vpop.f32.mrf.mxu2  ;;  %v1755_v63 = vpop.f32.mrf.mxu3  ;;  %v4965_v44 = vld [vmem:[#allocation28_spill] sm:$0xff] }
 0x380   :  { %v3029_v26 = vpop.eup %3028  ;;  %1923 = vmatpush.bf16.msrb.mxu0 %v3607_v55  ;;  %1936 = vmatpush.bf16.msrb.mxu1 %v3610_v59  ;;  %v4968_v53 = vld [vmem:[#allocation31_spill] sm:$0xff]  ;;  %v4969_v63 = vld [vmem:[#allocation32_spill] sm:$0xff] }
 0x381   :  { %v1774_v33 = vmul.f32 %v1768_v34, %v4102_v21  ;;  %v1775_v11 = vmul.f32 %v3029_v26, %v1764_v38  ;;  %1949 = vmatpush.bf16.msrb.mxu2 %v3614_v52  ;;  %1962 = vmatpush.bf16.msrb.mxu3 %v3616_v27  ;;  %v4966_v38 = vld [vmem:[#allocation29_spill] sm:$0xff]  ;;  %v4967_v34 = vld [vmem:[#allocation30_spill] sm:$0xff] }
 0x382   :  { %v3031_v25 = vpop.eup %3030  ;;  %v4970_v26 = vld [vmem:[#allocation33_spill] sm:$0xff] }
 0x383   :  { %v4222_v58 = vadd.f32 %v1775_v11, %v1774_v33  ;;  %v1772_v57 = vadd.f32 1.0, %v3031_v25  ;;  %v4971_v33 = vld [vmem:[#allocation34_spill] sm:$0xff]  ;;  %v4972_v11 = vld [vmem:[#allocation35_spill] sm:$0xff]  ;;  %v4973_v25 = vld [vmem:[#allocation36_spill] sm:$0xff] }
 0x384   :  { %1997 = vmatpush.bf16.msra.mxu0 %v3309_v3  ;;  %2010 = vmatpush.bf16.msra.mxu1 %v3311_v7  ;;  %v4957_v3 = vld [vmem:[#allocation20_spill] sm:$0xff]  ;;  %v4958_v7 = vld [vmem:[#allocation21_spill] sm:$0xff] }
 0x385   :  { %3032 = vtanh.f32 %v4222_v58  ;;  %2023 = vmatpush.bf16.msra.mxu2 %v3313_v8  ;;  %2036 = vmatpush.bf16.msra.mxu3 %v3316_v12  ;;  %v1773_v21 = vmul.f32 0.5, %v1772_v57  ;;  %v4959_v8 = vld [vmem:[#allocation22_spill] sm:$0xff]  ;;  %v4960_v12 = vld [vmem:[#allocation23_spill] sm:$0xff]  ;;  %v4974_v57 = vld [vmem:[#allocation37_spill] sm:$0xff] }
 0x388   :  { %1998 = vmatpush.bf16.msra.mxu0 %v3320_v16  ;;  %2011 = vmatpush.bf16.msra.mxu1 %v4953_v19  ;;  %v4961_v16 = vld [vmem:[#allocation24_spill] sm:$0xff]  ;;  %v4976_v19 = vld [vmem:[#allocation39_spill] sm:$0xff] }
 0x389   :  { %2024 = vmatpush.bf16.msra.mxu2 %v4954_v54  ;;  %2037 = vmatpush.bf16.msra.mxu3 %v4955_v5  ;;  %v4978_v54 = vld [vmem:[#allocation41_spill] sm:$0xff]  ;;  %v4979_v5 = vld [vmem:[#allocation42_spill] sm:$0xff] }
 0x38b   :  { %v3033_v56 = vpop.eup %3032 }
 0x38c   :  { %v1778_v32 = vmul.f32 %v3033_v56, %v1773_v21  ;;  %1999 = vmatpush.bf16.msra.mxu0 %v4956_v29  ;;  %2012 = vmatpush.bf16.msra.mxu1 %v4957_v3  ;;  %v4975_v21 = vld [vmem:[#allocation38_spill] sm:$0xff]  ;;  %v4977_v56 = vld [vmem:[#allocation40_spill] sm:$0xff]  ;;  %v4982_v29 = vld [vmem:[#allocation45_spill] sm:$0xff] }
 0x38d   :  { %2025 = vmatpush.bf16.msra.mxu2 %v4958_v7  ;;  %2038 = vmatpush.bf16.msra.mxu3 %v4959_v8  ;;  %v4983_v3 = vld [vmem:[#allocation46_spill] sm:$0xff]  ;;  %v4984_v7 = vld [vmem:[#allocation47_spill] sm:$0xff]  ;;  %v4985_v8 = vld [vmem:[#allocation48_spill] sm:$0xff] }
 0x38e   :  { %v1780_v46 = vpack.c.bf16 %v1778_v32, %v1778_v32  ;;  %v4980_v32 = vld [vmem:[#allocation43_spill] sm:$0xff] }
 0x390   :  { %1924 = vmatmul.bf16.vlgmr.msrb.gmra.mxu0 %v1780_v46  ;;  %1937 = vmatmul.bf16.vlgmr.msrb.gmra.mxu1 %v1780_v46 }
 0x391   :  { %1950 = vmatmul.bf16.vlgmr.msrb.gmra.mxu2 %v1780_v46  ;;  %1963 = vmatmul.bf16.vlgmr.msrb.gmra.mxu3 %v1780_v46  ;;  %v4981_v46 = vld [vmem:[#allocation44_spill] sm:$0xff] }
 0x392   :  { %2000 = vmatpush.bf16.msra.mxu0 %v4960_v12  ;;  %2013 = vmatpush.bf16.msra.mxu1 %v4961_v16  ;;  %v4986_v12 = vld [vmem:[#allocation49_spill] sm:$0xff]  ;;  %v4987_v16 = vld [vmem:[#allocation50_spill] sm:$0xff] }
 0x393   :  { %2026 = vmatpush.bf16.msra.mxu2 %v4962_v17  ;;  %2039 = vmatpush.bf16.msra.mxu3 %v4963_v62  ;;  %v4988_v17 = vld [vmem:[#allocation51_spill] sm:$0xff]  ;;  %v4989_v62 = vld [vmem:[#allocation52_spill] sm:$0xff] }
 0x396   :  { %2001 = vmatpush.bf16.msra.mxu0 %v4964_v2  ;;  %2014 = vmatpush.bf16.msra.mxu1 %v4965_v44  ;;  %v4990_v2 = vld [vmem:[#allocation53_spill] sm:$0xff]  ;;  %v4991_v44 = vld [vmem:[#allocation54_spill] sm:$0xff] }
 0x397   :  { %2027 = vmatpush.bf16.msra.mxu2 %v4966_v38  ;;  %2040 = vmatpush.bf16.msra.mxu3 %v4967_v34  ;;  %v4992_v38 = vld [vmem:[#allocation56_spill] sm:$0xff]  ;;  %v4993_v34 = vld [vmem:[#allocation57_spill] sm:$0xff] }
 0x39a   :  { %2002 = vmatpush.bf16.msra.mxu0 %v4968_v53  ;;  %2015 = vmatpush.bf16.msra.mxu1 %v4969_v63  ;;  %v4994_v53 = vld [vmem:[#allocation58_spill] sm:$0xff]  ;;  %v4995_v63 = vld [vmem:[#allocation59_spill] sm:$0xff] }
 0x39b   :  { %2028 = vmatpush.bf16.msra.mxu2 %v4970_v26  ;;  %2041 = vmatpush.bf16.msra.mxu3 %v4971_v33  ;;  %v4996_v26 = vld [vmem:[#allocation60_spill] sm:$0xff]  ;;  %v4997_v33 = vld [vmem:[#allocation61_spill] sm:$0xff] }
 0x39e   :  { %2003 = vmatpush.bf16.msra.mxu0 %v4972_v11  ;;  %2016 = vmatpush.bf16.msra.mxu1 %v4973_v25  ;;  %v4998_v11 = vld [vmem:[#allocation62_spill] sm:$0xff]  ;;  %v4999_v25 = vld [vmem:[#allocation63_spill] sm:$0xff] }
 0x39f   :  { %2029 = vmatpush.bf16.msra.mxu2 %v4974_v57  ;;  %2042 = vmatpush.bf16.msra.mxu3 %v4975_v21  ;;  %v5000_v57 = vld [vmem:[#allocation64_spill] sm:$0xff]  ;;  %v5001_v21 = vld [vmem:[#allocation65_spill] sm:$0xff] }
 0x3a2   :  { %2004 = vmatpush.bf16.msra.mxu0 %v4976_v19  ;;  %2017 = vmatpush.bf16.msra.mxu1 %v4977_v56  ;;  %v5002_v19 = vld [vmem:[#allocation66_spill] sm:$0xff]  ;;  %v5003_v56 = vld [vmem:[#allocation67_spill] sm:$0xff] }
 0x3a3   :  { %2030 = vmatpush.bf16.msra.mxu2 %v4978_v54  ;;  %2043 = vmatpush.bf16.msra.mxu3 %v4979_v5  ;;  %v5004_v54 = vld [vmem:[#allocation68_spill] sm:$0xff]  ;;  %v5005_v5 = vld [vmem:[#allocation69_spill] sm:$0xff] }
 0x3a6   :  { %2071 = vmatpush.bf16.msrb.mxu0 %v4980_v32  ;;  %2084 = vmatpush.bf16.msrb.mxu1 %v4981_v46 }
 0x3a7   :  { %2097 = vmatpush.bf16.msrb.mxu2 %v4982_v29  ;;  %2110 = vmatpush.bf16.msrb.mxu3 %v4983_v3 }
 0x3aa   :  { %2072 = vmatpush.bf16.msrb.mxu0 %v4984_v7  ;;  %2085 = vmatpush.bf16.msrb.mxu1 %v4985_v8 }
 0x3ab   :  { %2098 = vmatpush.bf16.msrb.mxu2 %v4986_v12  ;;  %2111 = vmatpush.bf16.msrb.mxu3 %v4987_v16 }
 0x3ae   :  { %2073 = vmatpush.bf16.msrb.mxu0 %v4988_v17  ;;  %2086 = vmatpush.bf16.msrb.mxu1 %v4989_v62 }
 0x3af   :  { %2099 = vmatpush.bf16.msrb.mxu2 %v4990_v2  ;;  %2112 = vmatpush.bf16.msrb.mxu3 %v4991_v44 }
 0x3b2   :  { %2074 = vmatpush.bf16.msrb.mxu0 %v4992_v38  ;;  %2087 = vmatpush.bf16.msrb.mxu1 %v4993_v34 }
 0x3b3   :  { %2100 = vmatpush.bf16.msrb.mxu2 %v4994_v53  ;;  %2113 = vmatpush.bf16.msrb.mxu3 %v4995_v63  ;;  %v5006_v63 = vld [vmem:[#allocation70_spill] sm:$0xff] }
 0x3b6   :  { %2075 = vmatpush.bf16.msrb.mxu0 %v4996_v26  ;;  %2088 = vmatpush.bf16.msrb.mxu1 %v4997_v33  ;;  %v5007_v26 = vld [vmem:[#allocation71_spill] sm:$0xff]  ;;  %v5008_v33 = vld [vmem:[#allocation72_spill] sm:$0xff] }
 0x3b7   :  { %2101 = vmatpush.bf16.msrb.mxu2 %v4998_v11  ;;  %2114 = vmatpush.bf16.msrb.mxu3 %v4999_v25  ;;  %v5009_v11 = vld [vmem:[#allocation73_spill] sm:$0xff]  ;;  %v5010_v25 = vld [vmem:[#allocation74_spill] sm:$0xff] }
 0x3ba   :  { %2076 = vmatpush.bf16.msrb.mxu0 %v5000_v57  ;;  %2089 = vmatpush.bf16.msrb.mxu1 %v5001_v21  ;;  %v5011_v57 = vld [vmem:[#allocation75_spill] sm:$0xff] }
 0x3bb   :  { %2102 = vmatpush.bf16.msrb.mxu2 %v5002_v19  ;;  %2115 = vmatpush.bf16.msrb.mxu3 %v5003_v56  ;;  %v2808_v56 = vld [vmem:[%s4442_s0 + $0xc0] sm:$0xff] }
 0x3be   :  { %2077 = vmatpush.bf16.msrb.mxu0 %v5004_v54  ;;  %2090 = vmatpush.bf16.msrb.mxu1 %v5005_v5  ;;  %v2809_v5 = vld [vmem:[%s4442_s0 + $0xc8] sm:$0xff] }
 0x3bf   :  { %2103 = vmatpush.bf16.msrb.mxu2 %v5006_v63  ;;  %2116 = vmatpush.bf16.msrb.mxu3 %v5007_v26 }
 0x3c2   :  { %2078 = vmatpush.bf16.msrb.mxu0 %v5008_v33  ;;  %2091 = vmatpush.bf16.msrb.mxu1 %v5009_v11 }
 0x3c3   :  { %2104 = vmatpush.bf16.msrb.mxu2 %v5010_v25  ;;  %2117 = vmatpush.bf16.msrb.mxu3 %v5011_v57  ;;  %v2810_v25 = vld [vmem:[%s4442_s0 + $0xd0] sm:$0xff]  ;;  %v2811_v57 = vld [vmem:[%s4442_s0 + $0xd8] sm:$0xff] }
 0x3df   :  { %v1795_v54 = vpop.f32.mrf.mxu0  ;;  %v1808_v63 = vpop.f32.mrf.mxu1 }
 0x3e0   :  { %v1838_v19 = vadd.f32 %v2808_v56, %v1795_v54  ;;  %v1839_v26 = vadd.f32 %v2809_v5, %v1808_v63 }
 0x3e2   :  { %v1842_v21 = vmul.f32 0.5, %v1838_v19  ;;  %v1846_v33 = vmul.f32 0.5, %v1839_v26 }
 0x3e4   :  { %3034 = vtanh.f32 %v1842_v21 }
 0x3e5   :  { %3036 = vtanh.f32 %v1846_v33 }
 0x3e6   :  { %v1821_v11 = vpop.f32.mrf.mxu2  ;;  %v1834_v53 = vpop.f32.mrf.mxu3 }
 0x3e7   :  { %v1840_v34 = vadd.f32 %v2810_v25, %v1821_v11  ;;  %v1841_v38 = vadd.f32 %v2811_v57, %v1834_v53  ;;  %v1797_v44 = vpop.f32.mrf.mxu0  ;;  %v1810_v2 = vpop.f32.mrf.mxu1 }
 0x3e9   :  { %3038 = vtanh.f32 %v1840_v34  ;;  %v1851_v63 = vmul.f32 0.5, %v1841_v38 }
 0x3ea   :  { %v3035_v19 = vpop.eup %3034 }
 0x3eb   :  { %v3037_v26 = vpop.eup %3036  ;;  %v1844_v21 = vadd.f32 1.0, %v3035_v19  ;;  %3040 = vtanh.f32 %v1851_v63 }
 0x3ec   :  { %v1848_v56 = vadd.f32 1.0, %v3037_v26 }
 0x3ed   :  { %v1845_v54 = vmul.f32 0.5, %v1844_v21 }
 0x3ee   :  { %v1849_v5 = vmul.f32 0.5, %v1848_v56  ;;  %v1823_v62 = vpop.f32.mrf.mxu2  ;;  %v1836_v17 = vpop.f32.mrf.mxu3 }
 0x3ef   :  { %v3039_v16 = vpop.eup %3038  ;;  %v1869_v12 = vpop.f32.mrf.mxu0 }
 0x3f0   :  { %v1882_v33 = vpop.f32.mrf.mxu1  ;;  %v1855_v8 = vmul.f32 %v1849_v5, %v4186_v35  ;;  %v1856_v11 = vmul.f32 %v3039_v16, %v1845_v54  ;;  %v1912_v35 = vadd.f32 %v1869_v12, %v3706_v37 }
 0x3f1   :  { %v3041_v53 = vpop.eup %3040 }
 0x3f2   :  { %v4306_v44 = vadd.f32 %v1856_v11, %v1855_v8  ;;  %v1853_v2 = vadd.f32 1.0, %v3041_v53  ;;  %v1913_v8 = vadd.f32 %v1882_v33, %v4839_v47 }
 0x3f4   :  { %3042 = vtanh.f32 %v4306_v44  ;;  %v1854_v63 = vmul.f32 0.5, %v1853_v2 }
 0x3f6   :  { %v1895_v38 = vpop.f32.mrf.mxu2  ;;  %v1908_v34 = vpop.f32.mrf.mxu3 }
 0x3f7   :  { %v1871_v25 = vpop.f32.mrf.mxu0  ;;  %v1914_v12 = vadd.f32 %v1895_v38, %v4790_v40  ;;  %v1915_v33 = vadd.f32 %v1908_v34, %v4791_v6 }
 0x3f8   :  { %v1884_v57 = vpop.f32.mrf.mxu1 }
 0x3fa   :  { %v3043_v19 = vpop.eup %3042 }
 0x3fb   :  { %v1859_v62 = vmul.f32 %v3043_v19, %v1854_v63 }
 0x3fd   :  { %v1990_v17 = vpack.c.bf16 %v1859_v62, %v1859_v62 }
 0x3fe   :  { %v1897_v26 = vpop.f32.mrf.mxu2  ;;  %v1910_v21 = vpop.f32.mrf.mxu3 }
 0x3ff   :  { %2005 = vmatmul.bf16.vlgmr.msra.gmra.mxu0 %v1990_v17  ;;  %2018 = vmatmul.bf16.vlgmr.msra.gmra.mxu1 %v1990_v17 }
 0x400   :  { %2031 = vmatmul.bf16.vlgmr.msra.gmra.mxu2 %v1990_v17  ;;  %2044 = vmatmul.bf16.vlgmr.msra.gmra.mxu3 %v1990_v17 }
 0x401   :  { %2127 = vmatpush.bf16.msra.mxu0 %v3509_v51  ;;  %2140 = vmatpush.bf16.msra.mxu1 %v4776_v9 }
 0x402   :  { %2153 = vmatpush.bf16.msra.mxu2 %v4777_v15  ;;  %2166 = vmatpush.bf16.msra.mxu3 %v4778_v49 }
 0x405   :  { %2128 = vmatpush.bf16.msra.mxu0 %v4835_v45  ;;  %2141 = vmatpush.bf16.msra.mxu1 %v4836_v50 }
 0x406   :  { %2154 = vmatpush.bf16.msra.mxu2 %v4837_v41  ;;  %2167 = vmatpush.bf16.msra.mxu3 %v4838_v0 }
 0x409   :  { %2129 = vmatpush.bf16.msra.mxu0 %v4840_v60  ;;  %2142 = vmatpush.bf16.msra.mxu1 %v4841_v13 }
 0x40a   :  { %2155 = vmatpush.bf16.msra.mxu2 %v4784_v18  ;;  %2168 = vmatpush.bf16.msra.mxu3 %v4785_v43 }
 0x40d   :  { %v1925_v16 = vpop.f32.mrf.mxu0  ;;  %v1938_v56 = vpop.f32.mrf.mxu1  ;;  %2130 = vmatpush.bf16.msra.mxu0 %v4786_v30  ;;  %2143 = vmatpush.bf16.msra.mxu1 %v4842_v23 }
 0x40e   :  { %v1968_v54 = vadd.f32 %v1925_v16, %v1912_v35  ;;  %v1969_v5 = vadd.f32 %v1938_v56, %v1913_v8  ;;  %2156 = vmatpush.bf16.msra.mxu2 %v4788_v10  ;;  %2169 = vmatpush.bf16.msra.mxu3 %v4789_v42 }
 0x40f   :  { %2079 = vmatmul.bf16.vlgmr.msrb.gmra.mxu0 %v1990_v17  ;;  %2092 = vmatmul.bf16.vlgmr.msrb.gmra.mxu1 %v1990_v17 }
 0x410   :  { %v1972_v11 = vmul.f32 0.5, %v1968_v54  ;;  %v1976_v53 = vmul.f32 0.5, %v1969_v5  ;;  %2105 = vmatmul.bf16.vlgmr.msrb.gmra.mxu2 %v1990_v17  ;;  %2118 = vmatmul.bf16.vlgmr.msrb.gmra.mxu3 %v1990_v17 }
 0x411   :  { %2131 = vmatpush.bf16.msra.mxu0 %v4737_v28  ;;  %2144 = vmatpush.bf16.msra.mxu1 %v4738_v61 }
 0x412   :  { %3044 = vtanh.f32 %v1972_v11  ;;  %2157 = vmatpush.bf16.msra.mxu2 %v4739_v31  ;;  %2170 = vmatpush.bf16.msra.mxu3 %v4740_v36 }
 0x413   :  { %3046 = vtanh.f32 %v1976_v53 }
 0x414   :  { %v1951_v2 = vpop.f32.mrf.mxu2  ;;  %v1964_v25 = vpop.f32.mrf.mxu3 }
 0x415   :  { %v1970_v57 = vadd.f32 %v1951_v2, %v1914_v12  ;;  %v1971_v63 = vadd.f32 %v1964_v25, %v1915_v33  ;;  %v1927_v19 = vpop.f32.mrf.mxu0  ;;  %v1940_v62 = vpop.f32.mrf.mxu1  ;;  %2132 = vmatpush.bf16.msra.mxu0 %v4741_v1  ;;  %2145 = vmatpush.bf16.msra.mxu1 %v3586_v14  ;;  %v5012_v2 = vld [vmem:[#allocation48_spill] sm:$0xff] }
 0x416   :  { %2158 = vmatpush.bf16.msra.mxu2 %v3590_v4  ;;  %2171 = vmatpush.bf16.msra.mxu3 %v3592_v22 }
 0x417   :  { %3048 = vtanh.f32 %v1970_v57  ;;  %v1981_v38 = vmul.f32 0.5, %v1971_v63  ;;  %v5013_v57 = vld [vmem:[#allocation49_spill] sm:$0xff]  ;;  %v5014_v63 = vld [vmem:[#allocation50_spill] sm:$0xff] }
 0x418   :  { %v3045_v34 = vpop.eup %3044 }
 0x419   :  { %v3047_v26 = vpop.eup %3046  ;;  %v1974_v21 = vadd.f32 1.0, %v3045_v34  ;;  %3050 = vtanh.f32 %v1981_v38  ;;  %2133 = vmatpush.bf16.msra.mxu0 %v3595_v20  ;;  %2146 = vmatpush.bf16.msra.mxu1 %v3598_v39  ;;  %v5015_v38 = vld [vmem:[#allocation51_spill] sm:$0xff]  ;;  %v5021_v34 = vld [vmem:[#allocation58_spill] sm:$0xff] }
 0x41a   :  { %v1978_v17 = vadd.f32 1.0, %v3047_v26  ;;  %2159 = vmatpush.bf16.msra.mxu2 %v3602_v48  ;;  %2172 = vmatpush.bf16.msra.mxu3 %v3604_v24  ;;  %v5022_v26 = vld [vmem:[#allocation59_spill] sm:$0xff] }
 0x41b   :  { %v1975_v35 = vmul.f32 0.5, %v1974_v21  ;;  %v5023_v21 = vld [vmem:[#allocation60_spill] sm:$0xff] }
 0x41c   :  { %v1979_v8 = vmul.f32 0.5, %v1978_v17  ;;  %v1953_v16 = vpop.f32.mrf.mxu2  ;;  %v1966_v56 = vpop.f32.mrf.mxu3  ;;  %v5024_v17 = vld [vmem:[#allocation61_spill] sm:$0xff] }
 0x41d   :  { %v3049_v54 = vpop.eup %3048  ;;  %2134 = vmatpush.bf16.msra.mxu0 %v3607_v55  ;;  %2147 = vmatpush.bf16.msra.mxu1 %v3610_v59  ;;  %v5027_v16 = vld [vmem:[#allocation64_spill] sm:$0xff]  ;;  %v5028_v56 = vld [vmem:[#allocation65_spill] sm:$0xff] }
 0x41e   :  { %v1985_v5 = vmul.f32 %v1979_v8, %v4222_v58  ;;  %v1986_v11 = vmul.f32 %v3049_v54, %v1975_v35  ;;  %2160 = vmatpush.bf16.msra.mxu2 %v3614_v52  ;;  %2173 = vmatpush.bf16.msra.mxu3 %v3616_v27  ;;  %v5025_v35 = vld [vmem:[#allocation62_spill] sm:$0xff]  ;;  %v5026_v8 = vld [vmem:[#allocation63_spill] sm:$0xff] }
 0x41f   :  { %v3051_v53 = vpop.eup %3050  ;;  %v5029_v54 = vld [vmem:[#allocation66_spill] sm:$0xff] }
 0x420   :  { %v4342_v12 = vadd.f32 %v1986_v11, %v1985_v5  ;;  %v1983_v33 = vadd.f32 1.0, %v3051_v53  ;;  %v5030_v5 = vld [vmem:[#allocation67_spill] sm:$0xff]  ;;  %v5031_v11 = vld [vmem:[#allocation68_spill] sm:$0xff]  ;;  %v5032_v53 = vld [vmem:[#allocation69_spill] sm:$0xff] }
 0x421   :  { %2202 = vmatpush.bf16.msrb.mxu0 %v4980_v32  ;;  %2215 = vmatpush.bf16.msrb.mxu1 %v4981_v46  ;;  %v5016_v32 = vld [vmem:[#allocation52_spill] sm:$0xff]  ;;  %v5017_v46 = vld [vmem:[#allocation53_spill] sm:$0xff] }
 0x422   :  { %3052 = vtanh.f32 %v4342_v12  ;;  %2228 = vmatpush.bf16.msrb.mxu2 %v4982_v29  ;;  %2241 = vmatpush.bf16.msrb.mxu3 %v4983_v3  ;;  %v1984_v58 = vmul.f32 0.5, %v1983_v33  ;;  %v5018_v29 = vld [vmem:[#allocation54_spill] sm:$0xff]  ;;  %v5019_v3 = vld [vmem:[#allocation56_spill] sm:$0xff] }
 0x423   :  { %v5033_v33 = vld [vmem:[#allocation70_spill] sm:$0xff] }
 0x425   :  { %2203 = vmatpush.bf16.msrb.mxu0 %v4984_v7  ;;  %2216 = vmatpush.bf16.msrb.mxu1 %v5012_v2  ;;  %v5020_v7 = vld [vmem:[#allocation57_spill] sm:$0xff]  ;;  %v5035_v2 = vld [vmem:[#allocation72_spill] sm:$0xff] }
 0x426   :  { %2229 = vmatpush.bf16.msrb.mxu2 %v5013_v57  ;;  %2242 = vmatpush.bf16.msrb.mxu3 %v5014_v63  ;;  %v5037_v57 = vld [vmem:[#allocation74_spill] sm:$0xff]  ;;  %v5038_v63 = vld [vmem:[#allocation75_spill] sm:$0xff] }
 0x428   :  { %v3053_v25 = vpop.eup %3052 }
 0x429   :  { %v1989_v19 = vmul.f32 %v3053_v25, %v1984_v58  ;;  %2204 = vmatpush.bf16.msrb.mxu0 %v5015_v38  ;;  %2217 = vmatpush.bf16.msrb.mxu1 %v5016_v32  ;;  %v5034_v58 = vld [vmem:[#allocation71_spill] sm:$0xff]  ;;  %v5036_v25 = vld [vmem:[#allocation73_spill] sm:$0xff] }
 0x42a   :  { %2230 = vmatpush.bf16.msrb.mxu2 %v5017_v46  ;;  %2243 = vmatpush.bf16.msrb.mxu3 %v5018_v29 }
 0x42b   :  { %v1991_v62 = vpack.c.bf16 %v1989_v19, %v1989_v19 }
 0x42d   :  { %2135 = vmatmul.bf16.vlgmr.msra.gmra.mxu0 %v1991_v62  ;;  %2148 = vmatmul.bf16.vlgmr.msra.gmra.mxu1 %v1991_v62 }
 0x42e   :  { %2161 = vmatmul.bf16.vlgmr.msra.gmra.mxu2 %v1991_v62  ;;  %2174 = vmatmul.bf16.vlgmr.msra.gmra.mxu3 %v1991_v62 }
 0x42f   :  { %2205 = vmatpush.bf16.msrb.mxu0 %v5019_v3  ;;  %2218 = vmatpush.bf16.msrb.mxu1 %v5020_v7 }
 0x430   :  { %2231 = vmatpush.bf16.msrb.mxu2 %v5021_v34  ;;  %2244 = vmatpush.bf16.msrb.mxu3 %v5022_v26 }
 0x433   :  { %2206 = vmatpush.bf16.msrb.mxu0 %v5023_v21  ;;  %2219 = vmatpush.bf16.msrb.mxu1 %v5024_v17 }
 0x434   :  { %2232 = vmatpush.bf16.msrb.mxu2 %v5025_v35  ;;  %2245 = vmatpush.bf16.msrb.mxu3 %v5026_v8 }
 0x437   :  { %2207 = vmatpush.bf16.msrb.mxu0 %v5027_v16  ;;  %2220 = vmatpush.bf16.msrb.mxu1 %v5028_v56 }
 0x438   :  { %2233 = vmatpush.bf16.msrb.mxu2 %v5029_v54  ;;  %2246 = vmatpush.bf16.msrb.mxu3 %v5030_v5 }
 0x43b   :  { %2208 = vmatpush.bf16.msrb.mxu0 %v5031_v11  ;;  %2221 = vmatpush.bf16.msrb.mxu1 %v5032_v53 }
 0x43c   :  { %2234 = vmatpush.bf16.msrb.mxu2 %v5033_v33  ;;  %2247 = vmatpush.bf16.msrb.mxu3 %v5034_v58 }
 0x43f   :  { %2209 = vmatpush.bf16.msrb.mxu0 %v5035_v2  ;;  %2222 = vmatpush.bf16.msrb.mxu1 %v5036_v25 }
 0x440   :  { %2235 = vmatpush.bf16.msrb.mxu2 %v5037_v57  ;;  %2248 = vmatpush.bf16.msrb.mxu3 %v5038_v63 }
 0x443   :  { %2259 = vmatpush.bf16.msra.mxu0 %v3509_v51  ;;  %2272 = vmatpush.bf16.msra.mxu1 %v4776_v9  ;;  %v2812_v51 = vld [vmem:[%s4442_s0 + $0xe0] sm:$0xff] }
 0x444   :  { %2285 = vmatpush.bf16.msra.mxu2 %v4777_v15  ;;  %2298 = vmatpush.bf16.msra.mxu3 %v4778_v49 }
 0x447   :  { %2260 = vmatpush.bf16.msra.mxu0 %v4835_v45  ;;  %2273 = vmatpush.bf16.msra.mxu1 %v4836_v50 }
 0x448   :  { %2286 = vmatpush.bf16.msra.mxu2 %v4837_v41  ;;  %2299 = vmatpush.bf16.msra.mxu3 %v4838_v0 }
 0x44b   :  { %2261 = vmatpush.bf16.msra.mxu0 %v4840_v60  ;;  %2274 = vmatpush.bf16.msra.mxu1 %v4841_v13 }
 0x44c   :  { %2287 = vmatpush.bf16.msra.mxu2 %v4784_v18  ;;  %2300 = vmatpush.bf16.msra.mxu3 %v4785_v43 }
 0x44f   :  { %2262 = vmatpush.bf16.msra.mxu0 %v4786_v30  ;;  %2275 = vmatpush.bf16.msra.mxu1 %v4842_v23 }
 0x450   :  { %2288 = vmatpush.bf16.msra.mxu2 %v4788_v10  ;;  %2301 = vmatpush.bf16.msra.mxu3 %v4789_v42 }
 0x453   :  { %2263 = vmatpush.bf16.msra.mxu0 %v4737_v28  ;;  %2276 = vmatpush.bf16.msra.mxu1 %v4738_v61 }
 0x454   :  { %2289 = vmatpush.bf16.msra.mxu2 %v4739_v31  ;;  %2302 = vmatpush.bf16.msra.mxu3 %v4740_v36 }
 0x457   :  { %2264 = vmatpush.bf16.msra.mxu0 %v4741_v1  ;;  %2277 = vmatpush.bf16.msra.mxu1 %v3586_v14  ;;  %v2813_v14 = vld [vmem:[%s4442_s0 + $0xe8] sm:$0xff] }
 0x458   :  { %2290 = vmatpush.bf16.msra.mxu2 %v3590_v4  ;;  %2303 = vmatpush.bf16.msra.mxu3 %v3592_v22 }
 0x45b   :  { %2265 = vmatpush.bf16.msra.mxu0 %v3595_v20  ;;  %2278 = vmatpush.bf16.msra.mxu1 %v3598_v39 }
 0x45c   :  { %2291 = vmatpush.bf16.msra.mxu2 %v3602_v48  ;;  %2304 = vmatpush.bf16.msra.mxu3 %v3604_v24 }
 0x45f   :  { %2266 = vmatpush.bf16.msra.mxu0 %v3607_v55  ;;  %2279 = vmatpush.bf16.msra.mxu1 %v3610_v59  ;;  %v2814_v55 = vld [vmem:[%s4442_s0 + $0xf0] sm:$0xff]  ;;  %v2815_v59 = vld [vmem:[%s4442_s0 + $0xf8] sm:$0xff] }
 0x460   :  { %2292 = vmatpush.bf16.msra.mxu2 %v3614_v52  ;;  %2305 = vmatpush.bf16.msra.mxu3 %v3616_v27 }
 0x47c   :  { %v2006_v4 = vpop.f32.mrf.mxu0  ;;  %v2019_v22 = vpop.f32.mrf.mxu1 }
 0x47d   :  { %v2049_v20 = vadd.f32 %v2812_v51, %v2006_v4  ;;  %v2050_v39 = vadd.f32 %v2813_v14, %v2019_v22 }
 0x47f   :  { %v2053_v48 = vmul.f32 0.5, %v2049_v20  ;;  %v2057_v24 = vmul.f32 0.5, %v2050_v39 }
 0x481   :  { %3054 = vtanh.f32 %v2053_v48 }
 0x482   :  { %3056 = vtanh.f32 %v2057_v24 }
 0x483   :  { %v2032_v52 = vpop.f32.mrf.mxu2  ;;  %v2045_v27 = vpop.f32.mrf.mxu3 }
 0x484   :  { %v2051_v1 = vadd.f32 %v2814_v55, %v2032_v52  ;;  %v2052_v36 = vadd.f32 %v2815_v59, %v2045_v27  ;;  %v2008_v28 = vpop.f32.mrf.mxu0  ;;  %v2021_v31 = vpop.f32.mrf.mxu1 }
 0x486   :  { %3058 = vtanh.f32 %v2051_v1  ;;  %v2062_v61 = vmul.f32 0.5, %v2052_v36 }
 0x487   :  { %v3055_v9 = vpop.eup %3054 }
 0x488   :  { %v3057_v15 = vpop.eup %3056  ;;  %v2055_v49 = vadd.f32 1.0, %v3055_v9  ;;  %3060 = vtanh.f32 %v2062_v61 }
 0x489   :  { %v2059_v30 = vadd.f32 1.0, %v3057_v15 }
 0x48a   :  { %v2056_v18 = vmul.f32 0.5, %v2055_v49  ;;  %v2348_v49 = vld [vmem:[#allocation9 + $0x78] sm:$0xff] }
 0x48b   :  { %v2060_v43 = vmul.f32 0.5, %v2059_v30  ;;  %v2034_v10 = vpop.f32.mrf.mxu2  ;;  %v2047_v42 = vpop.f32.mrf.mxu3 }
 0x48c   :  { %v3059_v45 = vpop.eup %3058  ;;  %v2080_v50 = vpop.f32.mrf.mxu0 }
 0x48d   :  { %v2093_v41 = vpop.f32.mrf.mxu1  ;;  %v2066_v0 = vmul.f32 %v2060_v43, %v4306_v44  ;;  %v2067_v60 = vmul.f32 %v3059_v45, %v2056_v18  ;;  %v2123_v44 = vadd.f32 %v2080_v50, %v3706_v37 }
 0x48e   :  { %v3061_v13 = vpop.eup %3060  ;;  %v2124_v17 = vadd.f32 %v2093_v41, %v4839_v47  ;;  %v2347_v41 = vld [vmem:[#allocation9 + $0x70] sm:$0xff] }
 0x48f   :  { %v2068_v23 = vadd.f32 %v2067_v60, %v2066_v0  ;;  %v2064_v19 = vadd.f32 1.0, %v3061_v13  ;;  %v2346_v0 = vld [vmem:[#allocation9 + $0x68] sm:$0xff]  ;;  %v2345_v60 = vld [vmem:[#allocation9 + $0x60] sm:$0xff]  ;;  %v2344_v13 = vld [vmem:[#allocation9 + $0x58] sm:$0xff] }
 0x491   :  { %3062 = vtanh.f32 %v2068_v23  ;;  %v2065_v29 = vmul.f32 0.5, %v2064_v19  ;;  %v2343_v23 = vld [vmem:[#allocation9 + $0x50] sm:$0xff]  ;;  %v2342_v19 = vld [vmem:[#allocation9 + $0x48] sm:$0xff] }
 0x493   :  { %v2106_v62 = vpop.f32.mrf.mxu2  ;;  %v2119_v38 = vpop.f32.mrf.mxu3 }
 0x494   :  { %v2082_v32 = vpop.f32.mrf.mxu0  ;;  %v2125_v11 = vadd.f32 %v2106_v62, %v4790_v40  ;;  %v2126_v53 = vadd.f32 %v2119_v38, %v4791_v6  ;;  %v2341_v62 = vld [vmem:[#allocation9 + $0x40] sm:$0xff]  ;;  %v2340_v38 = vld [vmem:[#allocation9 + $0x38] sm:$0xff] }
 0x495   :  { %v2095_v46 = vpop.f32.mrf.mxu1  ;;  %v2339_v32 = vld [vmem:[#allocation9 + $0x30] sm:$0xff] }
 0x497   :  { %v3063_v3 = vpop.eup %3062 }
 0x498   :  { %v2070_v7 = vmul.f32 %v3063_v3, %v2065_v29 }
 0x49a   :  { %v2201_v34 = vpack.c.bf16 %v2070_v7, %v2070_v7 }
 0x49b   :  { %v2108_v26 = vpop.f32.mrf.mxu2  ;;  %v2121_v21 = vpop.f32.mrf.mxu3 }
 0x49c   :  { %2210 = vmatmul.bf16.vlgmr.msrb.gmra.mxu0 %v2201_v34  ;;  %2223 = vmatmul.bf16.vlgmr.msrb.gmra.mxu1 %v2201_v34 }
 0x49d   :  { %2236 = vmatmul.bf16.vlgmr.msrb.gmra.mxu2 %v2201_v34  ;;  %2249 = vmatmul.bf16.vlgmr.msrb.gmra.mxu3 %v2201_v34  ;;  %v2338_v34 = vld [vmem:[#allocation9 + $0x28] sm:$0xff] }
 0x49e   :  { %2353 = vmatpush.msrb.mxu0 %v2348_v49 }
 0x4a0   :  { %2354 = vmatpush.msrb.mxu0 %v2347_v41 }
 0x4a2   :  { %2355 = vmatpush.msrb.mxu0 %v2346_v0 }
 0x4a4   :  { %2356 = vmatpush.msrb.mxu0 %v2345_v60 }
 0x4a6   :  { %2357 = vmatpush.msrb.mxu0 %v2344_v13 }
 0x4a8   :  { %2358 = vmatpush.msrb.mxu0 %v2343_v23 }
 0x4aa   :  { %v2136_v35 = vpop.f32.mrf.mxu0  ;;  %v2149_v8 = vpop.f32.mrf.mxu1  ;;  %2359 = vmatpush.msrb.mxu0 %v2342_v19 }
 0x4ab   :  { %v2179_v16 = vadd.f32 %v2136_v35, %v2123_v44  ;;  %v2180_v56 = vadd.f32 %v2149_v8, %v2124_v17  ;;  %v2337_v44 = vld [vmem:[#allocation9 + $0x20] sm:$0xff]  ;;  %v2336_v8 = vld [vmem:[#allocation9 + $0x18] sm:$0xff] }
 0x4ac   :  { %2360 = vmatpush.msrb.mxu0 %v2341_v62 }
 0x4ad   :  { %v2183_v54 = vmul.f32 0.5, %v2179_v16  ;;  %v2187_v5 = vmul.f32 0.5, %v2180_v56 }
 0x4ae   :  { %2361 = vmatpush.msrb.mxu0 %v2340_v38 }
 0x4af   :  { %3064 = vtanh.f32 %v2183_v54 }
 0x4b0   :  { %3066 = vtanh.f32 %v2187_v5  ;;  %2362 = vmatpush.msrb.mxu0 %v2339_v32 }
 0x4b1   :  { %v2162_v33 = vpop.f32.mrf.mxu2  ;;  %v2175_v58 = vpop.f32.mrf.mxu3 }
 0x4b2   :  { %v2181_v2 = vadd.f32 %v2162_v33, %v2125_v11  ;;  %v2182_v25 = vadd.f32 %v2175_v58, %v2126_v53  ;;  %v2138_v57 = vpop.f32.mrf.mxu0  ;;  %v2151_v63 = vpop.f32.mrf.mxu1  ;;  %2363 = vmatpush.msrb.mxu0 %v2338_v34  ;;  %v2334_v58 = vld [vmem:[#allocation9 + $0x8] sm:$0xff] }
 0x4b4   :  { %3068 = vtanh.f32 %v2181_v2  ;;  %v2192_v51 = vmul.f32 0.5, %v2182_v25  ;;  %2364 = vmatpush.msrb.mxu0 %v2337_v44  ;;  %v2333_v25 = vld [vmem:[#allocation9] sm:$0xff] }
 0x4b5   :  { %v3065_v14 = vpop.eup %3064 }
 0x4b6   :  { %v3067_v4 = vpop.eup %3066  ;;  %v2185_v22 = vadd.f32 1.0, %v3065_v14  ;;  %3070 = vtanh.f32 %v2192_v51  ;;  %2365 = vmatpush.msrb.mxu0 %v2336_v8 }
 0x4b7   :  { %v2189_v20 = vadd.f32 1.0, %v3067_v4 }
 0x4b8   :  { %v2186_v39 = vmul.f32 0.5, %v2185_v22 }
 0x4b9   :  { %v2190_v48 = vmul.f32 0.5, %v2189_v20  ;;  %v2164_v24 = vpop.f32.mrf.mxu2  ;;  %v2177_v55 = vpop.f32.mrf.mxu3 }
 0x4ba   :  { %v3069_v59 = vpop.eup %3068 }
 0x4bb   :  { %v2196_v52 = vmul.f32 %v2190_v48, %v4342_v12  ;;  %v2197_v27 = vmul.f32 %v3069_v59, %v2186_v39 }
 0x4bc   :  { %v3071_v1 = vpop.eup %3070 }
 0x4bd   :  { %v4431_v36 = vadd.f32 %v2197_v27, %v2196_v52  ;;  %v2194_v28 = vadd.f32 1.0, %v3071_v1 }
 0x4bf   :  { %3072 = vtanh.f32 %v4431_v36  ;;  %v2195_v31 = vmul.f32 0.5, %v2194_v28  ;;  %v2923_v28 = vld [vmem:[#allocation10] ss:$0 sm:$0xff] }
 0x4c5   :  { %v3073_v61 = vpop.eup %3072 }
 0x4c6   :  { %v2200_v9 = vmul.f32 %v3073_v61, %v2195_v31 }
 0x4c8   :  { %v2258_v15 = vpack.c.bf16 %v2200_v9, %v2200_v9 }
 0x4ca   :  { %2267 = vmatmul.bf16.vlgmr.msra.gmra.mxu0 %v2258_v15  ;;  %2280 = vmatmul.bf16.vlgmr.msra.gmra.mxu1 %v2258_v15 }
 0x4cb   :  { %2293 = vmatmul.bf16.vlgmr.msra.gmra.mxu2 %v2258_v15  ;;  %2306 = vmatmul.bf16.vlgmr.msra.gmra.mxu3 %v2258_v15 }
 0x519   :  { %v2211_v30 = vpop.f32.mrf.mxu0  ;;  %v2224_v18 = vpop.f32.mrf.mxu1 }
 0x51a   :  { %v2254_v46 = vadd.f32 %v2211_v30, %v3706_v37  ;;  %v2255_v29 = vadd.f32 %v2224_v18, %v4839_v47  ;;  %v2335_v47 = vld [vmem:[#allocation9 + $0x10] sm:$0xff] }
 0x51b   :  { %2366 = vmatpush.msrb.mxu0 %v2335_v47 }
 0x51d   :  { %2367 = vmatpush.msrb.mxu0 %v2334_v58 }
 0x51f   :  { %2368 = vmatpush.msrb.mxu0 %v2333_v25 }
 0x520   :  { %v2237_v12 = vpop.f32.mrf.mxu2  ;;  %v2250_v43 = vpop.f32.mrf.mxu3 }
 0x521   :  { %v2213_v10 = vpop.f32.mrf.mxu0  ;;  %v2226_v42 = vpop.f32.mrf.mxu1  ;;  %v2256_v16 = vadd.f32 %v2237_v12, %v4790_v40  ;;  %v2257_v37 = vadd.f32 %v2250_v43, %v4791_v6 }
 0x528   :  { %v2239_v45 = vpop.f32.mrf.mxu2  ;;  %v2252_v50 = vpop.f32.mrf.mxu3 }
 0x547   :  { %v2268_v3 = vpop.f32.mrf.mxu0  ;;  %v2281_v7 = vpop.f32.mrf.mxu1 }
 0x548   :  { %v2311_v26 = vadd.f32 %v2268_v3, %v2254_v46  ;;  %v2312_v21 = vadd.f32 %v2281_v7, %v2255_v29 }
 0x54a   :  { %v2315_v17 = vmul.f32 0.5, %v2311_v26  ;;  %v2319_v35 = vmul.f32 0.5, %v2312_v21 }
 0x54c   :  { %3074 = vtanh.f32 %v2315_v17 }
 0x54d   :  { %3076 = vtanh.f32 %v2319_v35 }
 0x54e   :  { %v2294_v56 = vpop.f32.mrf.mxu2  ;;  %v2307_v54 = vpop.f32.mrf.mxu3 }
 0x54f   :  { %v2313_v5 = vadd.f32 %v2294_v56, %v2256_v16  ;;  %v2314_v11 = vadd.f32 %v2307_v54, %v2257_v37  ;;  %v2270_v53 = vpop.f32.mrf.mxu0  ;;  %v2283_v33 = vpop.f32.mrf.mxu1 }
 0x551   :  { %3078 = vtanh.f32 %v2313_v5  ;;  %v2324_v2 = vmul.f32 0.5, %v2314_v11 }
 0x552   :  { %v3075_v57 = vpop.eup %3074 }
 0x553   :  { %v3077_v63 = vpop.eup %3076  ;;  %v2317_v40 = vadd.f32 1.0, %v3075_v57  ;;  %3080 = vtanh.f32 %v2324_v2 }
 0x554   :  { %v2321_v51 = vadd.f32 1.0, %v3077_v63 }
 0x555   :  { %v2318_v6 = vmul.f32 0.5, %v2317_v40 }
 0x556   :  { %v2322_v14 = vmul.f32 0.5, %v2321_v51  ;;  %v2296_v4 = vpop.f32.mrf.mxu2  ;;  %v2309_v22 = vpop.f32.mrf.mxu3 }
 0x557   :  { %v3079_v20 = vpop.eup %3078 }
 0x558   :  { %v2328_v39 = vmul.f32 %v2322_v14, %v4431_v36  ;;  %v2329_v48 = vmul.f32 %v3079_v20, %v2318_v6 }
 0x559   :  { %v3081_v24 = vpop.eup %3080 }
 0x55a   :  { %v2330_v55 = vadd.f32 %v2329_v48, %v2328_v39  ;;  %v2326_v59 = vadd.f32 1.0, %v3081_v24 }
 0x55c   :  { %3082 = vtanh.f32 %v2330_v55  ;;  %v2327_v52 = vmul.f32 0.5, %v2326_v59 }
 0x562   :  { %v3083_v27 = vpop.eup %3082 }
 0x563   :  { %v2332_v1 = vmul.f32 %v3083_v27, %v2327_v52 }
 0x565   :  { %2369 = vmatmul.f32.vlgmr.msrb.gmra.mxu0 %v2332_v1 }
 0x5e2   :  { %v2370_v31 = vpop.f32.mrf.mxu0 }
 0x5e3   :  { %v2371_v61 = vadd.f32 %v2923_v28, %v2370_v31 }
 0x5e5   :  { %2373 = vmax.xlane.f32.xlu0 %v2371_v61 }
 0x658   :  { %v2374_v9 = vpop.xlane.xlu0 %2373 }
 0x659   :  { %v2375_v15 = vsub.f32 %v2371_v61, %v2374_v9 }
 0x65b   :  { %v2376_v49 = vmul.f32 1.442695, %v2375_v15 }
 0x65d   :  { %3084 = vpow2.f32 %v2376_v49 }
 0x663   :  { %v3085_v30 = vpop.eup %3084 }
 0x664   :  { %2378 = vadd.xlane.f32.xlu0 %v3085_v30 }
 0x6d7   :  { %v2379_v36 = vpop.xlane.xlu0 %2378 }
 0x6d8   :  { %3086 = vrcp.f32 %v2379_v36  ;;  %v2391_v10 = vand.u32 2147483648, %v2379_v36  ;;  %v2389_v45 = vand.u32 2147483647, %v2379_v36  ;;  %vm2385_vm1 = vweird.f32 %v2379_v36 }
 0x6da   :  { %v2392_v41 = vor.u32 1.1754944e-38, %v2391_v10  ;;  %vm2390_vm3 = vcmp.eq.f32.partialorder %v2389_v45, 8.507059e+37 }
 0x6de   :  { %v3087_v18 = vpop.eup %3086 }
 0x6df   :  { %v2381_v12 = vmul.f32 %v3087_v18, %v2379_v36  ;;  %vm2386_vm0 = vweird.f32 %v3087_v18 }
 0x6e0   :  { %vm2387_vm2 = vmor %vm2385_vm1, %vm2386_vm0 }
 0x6e1   :  { %v2382_v43 = vsub.f32 1.0, %v2381_v12 }
 0x6e3   :  { %v2383_v42 = vmul.f32 %v3087_v18, %v2382_v43 }
 0x6e5   :  { %v2384_v50 = vadd.f32 %v3087_v18, %v2383_v42 }
 0x6e7   :  { %v2388_v0 = vsel %vm2387_vm2, %v3087_v18, %v2384_v50 }
 0x6e8   :  { %v2393_v60 = vsel %vm2390_vm3, %v2392_v41, %v2388_v0 }
 0x6e9   :  { %v2394_v13 = vmul.f32 %v3085_v30, %v2393_v60 }
 0x6eb   :  { %2395 = vst [vmem:[%s4449_s7] sm:$0xff] %v2394_v13 }
 0x6ec   :  { %2400 = vsyncpa [#allocation3], 1 }
 0x6ed   :  { %2401 = vsyncpa [#allocation5], 1 }
 0x6ee   :  { %2402 = vsyncpa [#allocation8], 1 }
 0x6ef   :  { %2403 = vsyncpa [#allocation11], 1 }

</bundles_post_ra>
